<compile_context>
chip_gen: v7x
topology: tpu7x:2x2x1
jax: 0.10.0
libtpu: 0.0.40
codegen_flags: <defaults>
</compile_context>

<pallas_src>
import jax
import jax.numpy as jnp
from jax.experimental import pallas as pl
from jax.experimental.pallas import tpu as pltpu


def _sigmoid(x):
    return 1.0 / (1.0 + jnp.exp(-x))


def milstm_kernel(x_ref, h_ref, c0_ref, wx_ref, wh_ref, p_ref, hx_ref, cx_ref):
    # x_ref  : (B, In)        wx_ref : (In, 4*th)
    # h_ref  : (B, H)         wh_ref : (H, 4*th)
    # c0_ref : (B, th)        p_ref  : (5, 4*th) rows = [bx, bh, alpha, b1, b2]
    th = cx_ref.shape[1]

    gx = jnp.dot(x_ref[...], wx_ref[...], preferred_element_type=jnp.float32)
    gx = gx + p_ref[0:1, :]
    gh = jnp.dot(h_ref[...], wh_ref[...], preferred_element_type=jnp.float32)
    gh = gh + p_ref[1:2, :]

    pre = p_ref[2:3, :] * gx * gh + p_ref[3:4, :] * gx + p_ref[4:5, :] * gh

    f_g = _sigmoid(pre[:, 0 * th:1 * th])
    i_g = _sigmoid(pre[:, 1 * th:2 * th])
    o_g = _sigmoid(pre[:, 2 * th:3 * th])
    z_t = jnp.tanh(pre[:, 3 * th:4 * th])

    cx = f_g * c0_ref[...] + i_g * z_t
    hx_ref[...] = o_g * jnp.tanh(cx)
    cx_ref[...] = cx


def milstm_forward(x, h0, c0, Wx, bx, Wh, bh, alpha, beta1, beta2, *, tile_h=256):
    """x:(B,In)  h0,c0:(B,H)
       Wx:(4,H,In) bx:(4,H)  Wh:(4,H,H) bh:(4,H)  alpha/beta1/beta2:(4,H)
       gate order [f, i, o, z], torch nn.Linear weight layout (out, in)."""
    B, In = x.shape
    H = h0.shape[1]
    th = min(tile_h, H)
    assert H % th == 0 and th % 128 == 0
    Hn = H // th
    G = 4 * th

    def pack_w(W):  # (4, H, K) -> (Hn, K, 4*th) with Wp[j,k,g*th+t] = W[g,j*th+t,k]
        K = W.shape[2]
        return (W.reshape(4, Hn, th, K)
                 .transpose(1, 3, 0, 2)
                 .reshape(Hn, K, G))

    def pack_v(v):  # (4, H) -> (Hn, 4*th)
        return v.reshape(4, Hn, th).transpose(1, 0, 2).reshape(Hn, G)

    wx_p = pack_w(Wx)                                            # (Hn, In, G)
    wh_p = pack_w(Wh)                                            # (Hn, H,  G)
    params = jnp.stack([pack_v(bx), pack_v(bh), pack_v(alpha),
                        pack_v(beta1), pack_v(beta2)], axis=1)   # (Hn, 5, G)

    flops = 2 * B * 4 * H * (In + H) + 20 * B * H
    bytes_accessed = 4 * (4 * H * (In + H) + 5 * 4 * H + B * (In + 3 * H) + 2 * B * H)

    hx, cx = pl.pallas_call(
        milstm_kernel,
        out_shape=(jax.ShapeDtypeStruct((B, H), jnp.float32),
                   jax.ShapeDtypeStruct((B, H), jnp.float32)),
        grid_spec=pltpu.PrefetchScalarGridSpec(
            num_scalar_prefetch=0,
            grid=(Hn,),
            in_specs=[
                pl.BlockSpec((B, In), lambda j: (0, 0)),
                pl.BlockSpec((B, H), lambda j: (0, 0)),
                pl.BlockSpec((B, th), lambda j: (0, j)),
                pl.BlockSpec((None, In, G), lambda j: (j, 0, 0)),
                pl.BlockSpec((None, H, G), lambda j: (j, 0, 0)),
                pl.BlockSpec((None, 5, G), lambda j: (j, 0, 0)),
            ],
            out_specs=[
                pl.BlockSpec((B, th), lambda j: (0, j)),
                pl.BlockSpec((B, th), lambda j: (0, j)),
            ],
        ),
        compiler_params=pltpu.CompilerParams(
            dimension_semantics=("parallel",)),
        cost_estimate=pl.CostEstimate(
            flops=flops, transcendentals=6 * B * H,
            bytes_accessed=bytes_accessed),
    )(x, h0, c0, wx_p, wh_p, params)
    return hx, cx


def milstm_ref(x, h0, c0, Wx, bx, Wh, bh, alpha, beta1, beta2):
    """Pure-JAX reference with the exact torch semantics."""
    gx = [x @ Wx[g].T + bx[g] for g in range(4)]
    gh = [h0 @ Wh[g].T + bh[g] for g in range(4)]

    def gate(g, act):
        return act(alpha[g] * gx[g] * gh[g] + beta1[g] * gx[g] + beta2[g] * gh[g])

    f_g = gate(0, _sigmoid)
    i_g = gate(1, _sigmoid)
    o_g = gate(2, _sigmoid)
    z_t = gate(3, jnp.tanh)
    cx = f_g * c0 + i_g * z_t
    hx = o_g * jnp.tanh(cx)
    return hx, cx


if __name__ == "__main__":
    # Small shapes consistent with the module (scaled down from 784 / 1024):
    B, In, H = 8, 256, 512

    key = jax.random.PRNGKey(0)
    ks = jax.random.split(key, 7)
    x = jax.random.normal(ks[0], (B, In), jnp.float32)
    h0 = jax.random.normal(ks[1], (B, H), jnp.float32)
    c0 = jax.random.normal(ks[2], (B, H), jnp.float32)
    Wx = jax.random.normal(ks[3], (4, H, In), jnp.float32) / jnp.sqrt(In)
    bx = jax.random.normal(ks[4], (4, H), jnp.float32) * 0.1
    Wh = jax.random.normal(ks[5], (4, H, H), jnp.float32) / jnp.sqrt(H)
    bh = jax.random.normal(ks[6], (4, H), jnp.float32) * 0.1
    # alpha / beta parameters are initialized to ones in the module.
    alpha = jnp.ones((4, H), jnp.float32)
    beta1 = jnp.ones((4, H), jnp.float32)
    beta2 = jnp.ones((4, H), jnp.float32)

    hx, cx = milstm_forward(x, h0, c0, Wx, bx, Wh, bh, alpha, beta1, beta2)
    hx = jax.block_until_ready(hx)
    cx = jax.block_until_ready(cx)
    assert hx.shape == (B, H) and cx.shape == (B, H)

    hx_r, cx_r = milstm_ref(x, h0, c0, Wx, bx, Wh, bh, alpha, beta1, beta2)
    hx_r = jax.block_until_ready(hx_r)
    cx_r = jax.block_until_ready(cx_r)
    assert jnp.allclose(hx, hx_r, rtol=1e-3, atol=1e-3), (
        float(jnp.max(jnp.abs(hx - hx_r))))
    assert jnp.allclose(cx, cx_r, rtol=1e-3, atol=1e-3), (
        float(jnp.max(jnp.abs(cx - cx_r))))

    print("KERNEL_OK")
</pallas_src>

<mosaic_0001>
module attributes {stable_mosaic.version = 11 : i64} {
  func.func @milstm_kernel(%arg0: i32, %arg1: memref<8x256xf32, #tpu.memory_space<vmem>>, %arg2: memref<8x512xf32, #tpu.memory_space<vmem>>, %arg3: memref<8x256xf32, #tpu.memory_space<vmem>>, %arg4: memref<1x256x1024xf32, #tpu.memory_space<vmem>>, %arg5: memref<1x512x1024xf32, #tpu.memory_space<vmem>>, %arg6: memref<1x5x1024xf32, #tpu.memory_space<vmem>>, %arg7: memref<8x256xf32, #tpu.memory_space<vmem>>, %arg8: memref<8x256xf32, #tpu.memory_space<vmem>>) attributes {dimension_semantics = [#tpu.dimension_semantics<parallel>], iteration_bounds = array<i64: 2>, scalar_prefetch = 0 : i64, scratch_operands = 0 : i64, tpu.core_type = #tpu.core_type<tc>, window_params = [{pipeline_mode = #tpu.pipeline_mode<synchronous>, transform_indices = @transform_0, window_bounds = array<i64: 8, 256>}, {pipeline_mode = #tpu.pipeline_mode<synchronous>, transform_indices = @transform_1, window_bounds = array<i64: 8, 512>}, {transform_indices = @transform_2, window_bounds = array<i64: 8, 256>}, {transform_indices = @transform_3, window_bounds = array<i64: 1, 256, 1024>}, {transform_indices = @transform_4, window_bounds = array<i64: 1, 512, 1024>}, {transform_indices = @transform_5, window_bounds = array<i64: 1, 5, 1024>}, {transform_indices = @transform_6, window_bounds = array<i64: 8, 256>}, {transform_indices = @transform_7, window_bounds = array<i64: 8, 256>}]} {
    %c0 = arith.constant 0 : index
    %c0_0 = arith.constant 0 : index
    %0 = vector.load %arg1[%c0, %c0_0] : memref<8x256xf32, #tpu.memory_space<vmem>>, vector<8x256xf32>
    %c0_1 = arith.constant 0 : index
    %c0_2 = arith.constant 0 : index
    %c0_3 = arith.constant 0 : index
    %1 = vector.load %arg4[%c0_1, %c0_2, %c0_3] : memref<1x256x1024xf32, #tpu.memory_space<vmem>>, vector<1x256x1024xf32>
    %2 = vector.shape_cast %1 : vector<1x256x1024xf32> to vector<256x1024xf32>
    %cst = arith.constant dense<0.000000e+00> : vector<8x1024xf32>
    %3 = tpu.matmul %0, %2, %cst {dimension_numbers = #tpu.dot_dimension_numbers<[1], [0], [0], [1], [0, 0, 1, 1], [], []>} : vector<8x256xf32>, vector<256x1024xf32>, vector<8x1024xf32> -> vector<8x1024xf32>
    %c0_4 = arith.constant 0 : index
    %c0_5 = arith.constant 0 : index
    %c0_6 = arith.constant 0 : index
    %4 = vector.load %arg6[%c0_4, %c0_5, %c0_6] : memref<1x5x1024xf32, #tpu.memory_space<vmem>>, vector<1x1x1024xf32>
    %5 = vector.shape_cast %4 : vector<1x1x1024xf32> to vector<1x1024xf32>
    %6 = vector.broadcast %5 : vector<1x1024xf32> to vector<8x1024xf32>
    %7 = arith.addf %3, %6 : vector<8x1024xf32>
    %c0_7 = arith.constant 0 : index
    %c0_8 = arith.constant 0 : index
    %8 = vector.load %arg2[%c0_7, %c0_8] : memref<8x512xf32, #tpu.memory_space<vmem>>, vector<8x512xf32>
    %c0_9 = arith.constant 0 : index
    %c0_10 = arith.constant 0 : index
    %c0_11 = arith.constant 0 : index
    %9 = vector.load %arg5[%c0_9, %c0_10, %c0_11] : memref<1x512x1024xf32, #tpu.memory_space<vmem>>, vector<1x512x1024xf32>
    %10 = vector.shape_cast %9 : vector<1x512x1024xf32> to vector<512x1024xf32>
    %cst_12 = arith.constant dense<0.000000e+00> : vector<8x1024xf32>
    %11 = tpu.matmul %8, %10, %cst_12 {dimension_numbers = #tpu.dot_dimension_numbers<[1], [0], [0], [1], [0, 0, 1, 1], [], []>} : vector<8x512xf32>, vector<512x1024xf32>, vector<8x1024xf32> -> vector<8x1024xf32>
    %c0_13 = arith.constant 0 : index
    %c1 = arith.constant 1 : index
    %c0_14 = arith.constant 0 : index
    %12 = vector.load %arg6[%c0_13, %c1, %c0_14] : memref<1x5x1024xf32, #tpu.memory_space<vmem>>, vector<1x1x1024xf32>
    %13 = vector.shape_cast %12 : vector<1x1x1024xf32> to vector<1x1024xf32>
    %14 = vector.broadcast %13 : vector<1x1024xf32> to vector<8x1024xf32>
    %15 = arith.addf %11, %14 : vector<8x1024xf32>
    %c0_15 = arith.constant 0 : index
    %c2 = arith.constant 2 : index
    %c0_16 = arith.constant 0 : index
    %16 = vector.load %arg6[%c0_15, %c2, %c0_16] : memref<1x5x1024xf32, #tpu.memory_space<vmem>>, vector<1x1x1024xf32>
    %17 = vector.shape_cast %16 : vector<1x1x1024xf32> to vector<1x1024xf32>
    %18 = vector.broadcast %17 : vector<1x1024xf32> to vector<8x1024xf32>
    %19 = arith.mulf %18, %7 : vector<8x1024xf32>
    %20 = arith.mulf %19, %15 : vector<8x1024xf32>
    %c0_17 = arith.constant 0 : index
    %c3 = arith.constant 3 : index
    %c0_18 = arith.constant 0 : index
    %21 = vector.load %arg6[%c0_17, %c3, %c0_18] : memref<1x5x1024xf32, #tpu.memory_space<vmem>>, vector<1x1x1024xf32>
    %22 = vector.shape_cast %21 : vector<1x1x1024xf32> to vector<1x1024xf32>
    %23 = vector.broadcast %22 : vector<1x1024xf32> to vector<8x1024xf32>
    %24 = arith.mulf %23, %7 : vector<8x1024xf32>
    %25 = arith.addf %20, %24 : vector<8x1024xf32>
    %c0_19 = arith.constant 0 : index
    %c4 = arith.constant 4 : index
    %c0_20 = arith.constant 0 : index
    %26 = vector.load %arg6[%c0_19, %c4, %c0_20] : memref<1x5x1024xf32, #tpu.memory_space<vmem>>, vector<1x1x1024xf32>
    %27 = vector.shape_cast %26 : vector<1x1x1024xf32> to vector<1x1024xf32>
    %28 = vector.broadcast %27 : vector<1x1024xf32> to vector<8x1024xf32>
    %29 = arith.mulf %28, %15 : vector<8x1024xf32>
    %30 = arith.addf %25, %29 : vector<8x1024xf32>
    %31 = vector.extract_strided_slice %30 {offsets = [0, 0], sizes = [8, 256], strides = [1, 1]} : vector<8x1024xf32> to vector<8x256xf32>
    %cst_21 = arith.constant 0.000000e+00 : f32
    %32 = vector.broadcast %cst_21 : f32 to vector<8x256xf32>
    %33 = arith.subf %32, %31 : vector<8x256xf32>
    %34 = math.exp %33 : vector<8x256xf32>
    %cst_22 = arith.constant 1.000000e+00 : f32
    %35 = vector.broadcast %cst_22 : f32 to vector<8x256xf32>
    %36 = arith.addf %35, %34 : vector<8x256xf32>
    %cst_23 = arith.constant 1.000000e+00 : f32
    %37 = vector.broadcast %cst_23 : f32 to vector<8x256xf32>
    %38 = arith.divf %37, %36 : vector<8x256xf32>
    %39 = vector.extract_strided_slice %30 {offsets = [0, 256], sizes = [8, 256], strides = [1, 1]} : vector<8x1024xf32> to vector<8x256xf32>
    %cst_24 = arith.constant 0.000000e+00 : f32
    %40 = vector.broadcast %cst_24 : f32 to vector<8x256xf32>
    %41 = arith.subf %40, %39 : vector<8x256xf32>
    %42 = math.exp %41 : vector<8x256xf32>
    %cst_25 = arith.constant 1.000000e+00 : f32
    %43 = vector.broadcast %cst_25 : f32 to vector<8x256xf32>
    %44 = arith.addf %43, %42 : vector<8x256xf32>
    %cst_26 = arith.constant 1.000000e+00 : f32
    %45 = vector.broadcast %cst_26 : f32 to vector<8x256xf32>
    %46 = arith.divf %45, %44 : vector<8x256xf32>
    %47 = vector.extract_strided_slice %30 {offsets = [0, 512], sizes = [8, 256], strides = [1, 1]} : vector<8x1024xf32> to vector<8x256xf32>
    %cst_27 = arith.constant 0.000000e+00 : f32
    %48 = vector.broadcast %cst_27 : f32 to vector<8x256xf32>
    %49 = arith.subf %48, %47 : vector<8x256xf32>
    %50 = math.exp %49 : vector<8x256xf32>
    %cst_28 = arith.constant 1.000000e+00 : f32
    %51 = vector.broadcast %cst_28 : f32 to vector<8x256xf32>
    %52 = arith.addf %51, %50 : vector<8x256xf32>
    %cst_29 = arith.constant 1.000000e+00 : f32
    %53 = vector.broadcast %cst_29 : f32 to vector<8x256xf32>
    %54 = arith.divf %53, %52 : vector<8x256xf32>
    %55 = vector.extract_strided_slice %30 {offsets = [0, 768], sizes = [8, 256], strides = [1, 1]} : vector<8x1024xf32> to vector<8x256xf32>
    %56 = math.tanh %55 : vector<8x256xf32>
    %c0_30 = arith.constant 0 : index
    %c0_31 = arith.constant 0 : index
    %57 = vector.load %arg3[%c0_30, %c0_31] : memref<8x256xf32, #tpu.memory_space<vmem>>, vector<8x256xf32>
    %58 = arith.mulf %38, %57 : vector<8x256xf32>
    %59 = arith.mulf %46, %56 : vector<8x256xf32>
    %60 = arith.addf %58, %59 : vector<8x256xf32>
    %61 = math.tanh %60 : vector<8x256xf32>
    %62 = arith.mulf %54, %61 : vector<8x256xf32>
    %c0_32 = arith.constant 0 : index
    %c0_33 = arith.constant 0 : index
    %63 = vector.load %arg7[%c0_32, %c0_33] : memref<8x256xf32, #tpu.memory_space<vmem>>, vector<8x256xf32>
    tpu.vector_store %arg7[%c0_32, %c0_33], %62 {strides = array<i32>} : memref<8x256xf32, #tpu.memory_space<vmem>>, vector<8x256xf32>,
    %c0_34 = arith.constant 0 : index
    %c0_35 = arith.constant 0 : index
    %64 = vector.load %arg8[%c0_34, %c0_35] : memref<8x256xf32, #tpu.memory_space<vmem>>, vector<8x256xf32>
    tpu.vector_store %arg8[%c0_34, %c0_35], %60 {strides = array<i32>} : memref<8x256xf32, #tpu.memory_space<vmem>>, vector<8x256xf32>,
    return
  }
  func.func @transform_0(%arg0: i32) -> (i32, i32) {
    %c0_i32 = arith.constant 0 : i32
    %c0_i32_0 = arith.constant 0 : i32
    %c0_i32_1 = arith.constant 0 : i32
    return %c0_i32, %c0_i32_0 : i32, i32
  }
  func.func @transform_1(%arg0: i32) -> (i32, i32) {
    %c0_i32 = arith.constant 0 : i32
    %c0_i32_0 = arith.constant 0 : i32
    %c0_i32_1 = arith.constant 0 : i32
    return %c0_i32, %c0_i32_0 : i32, i32
  }
  func.func @transform_2(%arg0: i32) -> (i32, i32) {
    %c0_i32 = arith.constant 0 : i32
    %c0_i32_0 = arith.constant 0 : i32
    return %c0_i32, %arg0 : i32, i32
  }
  func.func @transform_3(%arg0: i32) -> (i32, i32, i32) {
    %c0_i32 = arith.constant 0 : i32
    %c0_i32_0 = arith.constant 0 : i32
    %c0_i32_1 = arith.constant 0 : i32
    return %arg0, %c0_i32, %c0_i32_0 : i32, i32, i32
  }
  func.func @transform_4(%arg0: i32) -> (i32, i32, i32) {
    %c0_i32 = arith.constant 0 : i32
    %c0_i32_0 = arith.constant 0 : i32
    %c0_i32_1 = arith.constant 0 : i32
    return %arg0, %c0_i32, %c0_i32_0 : i32, i32, i32
  }
  func.func @transform_5(%arg0: i32) -> (i32, i32, i32) {
    %c0_i32 = arith.constant 0 : i32
    %c0_i32_0 = arith.constant 0 : i32
    %c0_i32_1 = arith.constant 0 : i32
    return %arg0, %c0_i32, %c0_i32_0 : i32, i32, i32
  }
  func.func @transform_6(%arg0: i32) -> (i32, i32) {
    %c0_i32 = arith.constant 0 : i32
    %c0_i32_0 = arith.constant 0 : i32
    return %c0_i32, %arg0 : i32, i32
  }
  func.func @transform_7(%arg0: i32) -> (i32, i32) {
    %c0_i32 = arith.constant 0 : i32
    %c0_i32_0 = arith.constant 0 : i32
    return %c0_i32, %arg0 : i32, i32
  }
}

</mosaic_0001>

<bundles_post_ra>
// kernel: tpu_custom_call.1
= control target key start
LH: loop header
LB: loop body
LE: loop exit
PB: predicated region body
PF: predicated region fallthrough
CT: control target
= control target key end

     0   :  { %s5116_s0 = inlined_call_operand.hbm [shape: f32[8,256], index: 0, kind: input, shape index: {}]   ;;  %s5117_s1 = inlined_call_operand.hbm [shape: f32[8,512], index: 1, kind: input, shape index: {}]   ;;  %s5118_s2 = inlined_call_operand.hbm [shape: f32[8,512], index: 2, kind: input, shape index: {}]   ;;  %s5119_s3 = inlined_call_operand.hbm [shape: f32[2,256,1024], index: 3, kind: input, shape index: {}]   ;;  %s5120_s4 = inlined_call_operand.hbm [shape: f32[2,512,1024], index: 4, kind: input, shape index: {}]   ;;  %s5121_s5 = inlined_call_operand.vmem [shape: f32[2,5,1024], index: 5, kind: input, shape index: {}]   ;;  %s5122_s6 = inlined_call_operand.hbm [shape: f32[8,512], index: 6, kind: output, shape index: {0}]   ;;  %s5123_s7 = inlined_call_operand.hbm [shape: f32[8,512], index: 7, kind: output, shape index: {1}]  }
   0x1   :  { %5141 = sst [smem:[#allocation23_spill]] %s5116_s0 }
   0x2   :  { %5142 = sst [smem:[#allocation24_spill]] %s5118_s2 }
   0x3   :  { %5143 = sst [smem:[#allocation25_spill]] %s5119_s3 }
   0x4   :  { %5144 = sst [smem:[#allocation26_spill]] %s5122_s6 }
   0x5   :  { %13 = vsyncpa [#allocation3], 0 }
   0x6   :  { %14 = vsyncpa [#allocation6], 0 }
   0x7   :  { %15 = vsyncpa [#allocation4], 0 }
   0x8   :  { %17 = vsyncpa [#allocation4 + $0x1], 0 }
   0x9   :  { %18 = vsyncpa [#allocation12], 0 }
   0xa   :  { %20 = vsyncpa [#allocation12 + $0x1], 0  ;;  %s3838_s24 = smov 0   ;;  %s3840_s25 = smov 0  }
   0xb   :  { %s3842_s26 = smov 0   ;;  %s3844_s27 = smov 0  }
   0xc LB: > { %5145 = sst [smem:[#allocation18_spill]] %s3775_s24  ;;  %s3859_s28 = sadd.s32 4294967295, %s3787_s27   ;;  %s3787_s27 = sphi %s3844_s27, %s5184_s27   ;;  %s3783_s26 = sphi %s3842_s26, %s5186_s26   ;;  %s3779_s25 = sphi %s3840_s25, %s5188_s25   ;;  %s3775_s24 = sphi %s3838_s24, %s5187_s24  }
   0xd   : > { %5146 = sst [smem:[#allocation19_spill]] %s3783_s26  ;;  %s2585_s29 = sadd.s32 4294967294, %s3787_s27  }
   0xe   : > { %s3863_s30 = sadd.s32 1, %s3787_s27   ;;  %s75_s8 = sadd.s32 1, %s3783_s26 }
   0xf   : > { %5147 = sst [smem:[#allocation20_spill]] %s3863_s30  ;;  %s72_s9 = ssub.s32 %s3787_s27, %s3863_s30 }
  0x10   : > { %p5124_p0 = scmp.ne.s32.totalorder %s3783_s26, %s3779_s25  ;;  %p73_p1 = scmp.eq.s32.totalorder %s72_s9, 0 }
  0x11   : > { %p88_p2 = scmp.ne.s32.totalorder %s3779_s25, %s3775_s24  ;;  %p5125_p3 = scmp.eq.s32.totalorder %s3859_s28, 0 }
  0x12   : > { %p190_p4 = scmp.eq.s32.totalorder %s3859_s28, 1  ;;  %p196_p7 = scmp.eq.s32.totalorder %s2585_s29, 1 }
  0x13   : > { %s3875_s10 = scalar_select %p73_p1, %s3783_s26, %s75_s8  }
  0x14   : > { %p3879_p5 = por %p5125_p3, %p88_p2  ;;  %p3886_p6 = por %p190_p4, %p5124_p0 }
  0x15   : > { %5148 = sst [smem:[#allocation21_spill]] %s3875_s10  ;;  %p2586_p8 = scmp.ge.s32.totalorder %s3787_s27, 1 }
  0x16   : > { %s5149_s11 = scalar_select %p3879_p5, 1, 0 }
  0x17   : > { %s5150_s12 = scalar_select %p3886_p6, 1, 0 }
  0x18   : > { %p229_p9 = scmp.lt.s32.totalorder %s3787_s27, 3  ;;  %p3892_p10 = por %p196_p7, %p88_p2 }
  0x19   : > { %s3789_s15 = smov [#allocation2]   ;;  %p83_p1 = scmp.eq.s32.totalorder %s3787_s27, 0 }
  0x1a   : > { %s5151_s13 = scalar_select %p3892_p10, 1, 0 }
  0x1b   : > { %p3896_p11 = pnand %p2586_p8, %p229_p9  ;;  %s242_s16 = sshll.u32 %s3789_s15, 4  ;;  %s243_s16 = int_to_ptr.vmem [resolvable:$true] %s242_s16 }
  0x1c   : > { %5152 = sst [smem:[#allocation22_spill]] %s5151_s13  ;;  %p5155_p2 = scmp.ne.s32.totalorder %s3783_s26, %s3779_s25 }
  0x1d   : > { %s5153_s14 = scalar_select %p3896_p11, 1, 0 }
  0x1e   : > { %p3433_p13 = pneg %p3896_p11  ;;  %p3915_p7 = por %p83_p1, %p5155_p2 }
  0x1f   : > { %s3920_s20 = sand.u32 1, %s3783_s26   ;;  %s5157_s0 = sld [smem:[#allocation23_spill]] }
  0x20   : > { %p3908_p0 = pnand %p3433_p13, %p5125_p3  ;;  %s2590_s21 = sshll.u32 %s3920_s20, 4 }
  0x21   : > { %s5156_s19 = scalar_select %p3915_p7, 1, 0 }
  0x22   : > { %s5154_s18 = scalar_select %p3908_p0, 1, 0 }
  0x23   : > { %p5129_p9 = pneg %p3908_p0 }
  0x25   : > { %s3535_s29 = scalar_lea.hbm %s5157_s0, 256 }
  0x26   : > { %p3536_p8 = scmp.ne.s32.totalorder %s5157_s0, %s3535_s29  ;;  %p3542_p2 = scmp.lt.u32.totalorder %s3535_s29, %s5157_s0 }
  0x28   : > { %p3538_p13 = pnand %p5129_p9, %p3536_p8 }
  0x2a   : > { %p3539_p1 = pneg %p3538_p13 }
  0x2c   : > { %p3544_p12 = pnand %p3542_p2, %p3539_p1 }
  0x2e   : > { %3547 = shalt.err (!%p3544_p12)
}
  0x2f   : > { %s3548_s10 = scalar_lea.vmem %s243_s16, 256  ;;  %p3556_p6 = scmp.lt.s32.totalorder %s243_s16, %s243_s16 }
  0x30   : > { %p3549_p3 = scmp.ne.s32.totalorder %s243_s16, %s3548_s10  ;;  %p3557_p5 = scmp.lt.s32.totalorder %s3548_s10, %s3548_s10 }
  0x32   : > { %p3551_p4 = pnand %p3549_p3, %p5129_p9  ;;  %p3558_p11 = por %p3557_p5, %p3556_p6 }
  0x34   : > { %p3552_p10 = pneg %p3551_p4 }
  0x36   : > { %p3559_p7 = pnand %p3558_p11, %p3552_p10 }
  0x38   : > { %3562 = shalt.err (!%p3559_p7)
}
  0x39   : > { %3436 = dma.hbm_to_vmem [thread:$0]  (!%p3908_p0), %s5157_s0, 256, %s243_s16, [#allocation3]  }
  0x3a   : > { %s2625_s17 = sshll.u32 %s3787_s27, 8  ;;  %s5158_s2 = sld [smem:[#allocation24_spill]] }
  0x3b   : > { %s268_s9 = scalar_lea.vmem [#allocation7], %s2590_s21  ;;  %p5159_p3 = scmp.ne.s32.totalorder %s5156_s19, 0 }
  0x3c   : > { %s276_s15 = sshll.u32 %s268_s9, 4  ;;  %p5160_p5 = scmp.lt.s32.totalorder %s3787_s27, 2  ;;  %s3951_s15 = int_to_ptr.vmem [resolvable:$true] %s276_s15 }
  0x3d   : > { %s5162_s29 = sand.u32 1, %s3787_s27  }
  0x3e   : > { %p3957_p6 = pnand %p5160_p5, %p5159_p3 }
  0x40   : > { %s3949_s10 = scalar_lea.hbm %s5158_s2, %s2625_s17  ;;  %s3965_s17 = scalar_lea.sflag [#allocation3], %s5162_s29 }
  0x41   : > { %s5161_s22 = scalar_select %p3957_p6, 1, 0 }
  0x42   : > { %s3563_s8 = scalar_lea.hbm %s3949_s10, 256  ;;  %p3971_p11 = pneg %p3957_p6 }
  0x43   : > { %p3564_p10 = scmp.ne.s32.totalorder %s3949_s10, %s3563_s8  ;;  %s3568_s0 = scalar_lea.hbm %s5158_s2, 512 }
  0x44   : > { %s5163_s21 = scalar_select %p3971_p11, 1, 0 }
  0x45   : > { %p3566_p12 = pnand %p3971_p11, %p3564_p10  ;;  %p3569_p7 = scmp.lt.u32.totalorder %s3949_s10, %s5158_s2 }
  0x46   : > { %p3570_p8 = scmp.lt.u32.totalorder %s3568_s0, %s3563_s8  ;;  %p3572_p1 = scmp.lt.u32.totalorder %s3563_s8, %s3949_s10 }
  0x47   : > { %p3567_p4 = pneg %p3566_p12 }
  0x48   : > { %p3571_p13 = por %p3570_p8, %p3569_p7 }
  0x4a   : > { %p3573_p2 = por %p3572_p1, %p3571_p13 }
  0x4c   : > { %p3574_p3 = pnand %p3573_p2, %p3567_p4 }
  0x4e   : > { %3577 = shalt.err (!%p3574_p3)
}
  0x4f   : > { %s3578_s29 = scalar_lea.vmem %s3951_s15, 256  ;;  %s3790_s19 = smov [#allocation7]  }
  0x50   : > { %p3579_p5 = scmp.ne.s32.totalorder %s3951_s15, %s3578_s29  ;;  %s3583_s9 = sshll.u32 %s3790_s19, 4  ;;  %s3584_s9 = int_to_ptr.vmem [resolvable:$false] %s3583_s9 }
  0x51   : > { %s3585_s16 = scalar_lea.vmem %s3584_s9, 512  ;;  %p3586_p9 = scmp.lt.s32.totalorder %s3951_s15, %s3584_s9 }
  0x52   : > { %p3581_p10 = pnand %p3579_p5, %p3971_p11  ;;  %p3587_p0 = scmp.lt.s32.totalorder %s3585_s16, %s3578_s29 }
  0x54   : > { %p3582_p12 = pneg %p3581_p10  ;;  %p3588_p7 = por %p3587_p0, %p3586_p9 }
  0x56   : > { %p3589_p8 = pnand %p3588_p7, %p3582_p12 }
  0x58   : > { %3592 = shalt.err (!%p3589_p8)
}
  0x59   : > { %3443 = dma.hbm_to_vmem [thread:$0]  (!%p3957_p6), %s3949_s10, 256, %s3951_s15, %s3965_s17  }
  0x5a   : > { %s5164_s0 = sshll.u32 %s3920_s20, 11  ;;  %s5165_s19 = sshll.u32 %s3920_s20, 12 }
  0x5b   : > { %s287_s23 = scalar_lea.vmem [#allocation8], %s5164_s0  ;;  %s3999_s2 = scalar_lea.vmem [#allocation9], %s5165_s19 }
  0x5c   : > { %s294_s8 = sshll.u32 %s287_s23, 4  ;;  %s315_s29 = sshll.u32 %s3999_s2, 4  ;;  %s4008_s8 = int_to_ptr.vmem [resolvable:$true] %s294_s8  ;;  %s4043_s29 = int_to_ptr.vmem [resolvable:$true] %s315_s29 }
  0x5d   : > { %s2626_s9 = sshll.u32 %s3787_s27, 15  ;;  %s5166_s3 = sld [smem:[#allocation25_spill]] }
  0x63   : > { %s4006_s30 = scalar_lea.hbm %s5166_s3, %s2626_s9  ;;  %s3598_s0 = scalar_lea.hbm %s5166_s3, 65536 }
  0x64   : > { %s3593_s10 = scalar_lea.hbm %s4006_s30, 32768  ;;  %p3599_p13 = scmp.lt.u32.totalorder %s4006_s30, %s5166_s3 }
  0x65   : > { %p3594_p0 = scmp.ne.s32.totalorder %s4006_s30, %s3593_s10  ;;  %p3600_p1 = scmp.lt.u32.totalorder %s3598_s0, %s3593_s10 }
  0x66   : > { %p3602_p3 = scmp.lt.u32.totalorder %s3593_s10, %s4006_s30 }
  0x67   : > { %p3596_p9 = pnand %p3594_p0, %p3971_p11  ;;  %p3601_p2 = por %p3600_p1, %p3599_p13 }
  0x69   : > { %p3597_p4 = pneg %p3596_p9  ;;  %p3603_p5 = por %p3602_p3, %p3601_p2 }
  0x6b   : > { %p3604_p10 = pnand %p3603_p5, %p3597_p4 }
  0x6d   : > { %3607 = shalt.err (!%p3604_p10)
}
  0x6e   : > { %s3608_s26 = scalar_lea.vmem %s4008_s8, 32768  ;;  %s3791_s9 = smov [#allocation8]  }
  0x6f   : > { %p3609_p12 = scmp.ne.s32.totalorder %s4008_s8, %s3608_s26  ;;  %s3613_s16 = sshll.u32 %s3791_s9, 4  ;;  %s3614_s16 = int_to_ptr.vmem [resolvable:$false] %s3613_s16 }
  0x70   : > { %s3615_s20 = scalar_lea.vmem %s3614_s16, 65536  ;;  %p3616_p0 = scmp.lt.s32.totalorder %s4008_s8, %s3614_s16 }
  0x71   : > { %p3611_p7 = pnand %p3609_p12, %p3971_p11  ;;  %p3617_p9 = scmp.lt.s32.totalorder %s3615_s20, %s3608_s26 }
  0x73   : > { %p3612_p8 = pneg %p3611_p7  ;;  %p3618_p13 = por %p3617_p9, %p3616_p0 }
  0x75   : > { %p3619_p1 = pnand %p3618_p13, %p3612_p8 }
  0x77   : > { %3622 = shalt.err (!%p3619_p1)
}
  0x78   : > { %s3792_s10 = smov 1024   ;;  %s3793_s15 = smov 64  }
  0x79   : > { %3446 = dma.hbm_to_vmem [thread:$0]  (!%p3957_p6), %s4006_s30, 32768, %s4008_s8, %s3965_s17, %s3792_s10, %s3792_s10, %s3793_s15  }
  0x7a   : > { %s2627_s0 = sshll.u32 %s3787_s27, 16  ;;  %s3794_s23 = smov [#allocation5]  }
  0x7b   : > { %s253_s19 = sshll.u32 %s3794_s23, 4  ;;  %s4039_s16 = scalar_lea.hbm %s5120_s4, %s2627_s0  ;;  %s254_s19 = int_to_ptr.vmem [resolvable:$true] %s253_s19 }
  0x7c   : > { %s3623_s13 = scalar_lea.hbm %s5117_s1, 512  ;;  %p5167_p2 = scmp.ne.s32.totalorder %s5154_s18, 0 }
  0x7d   : > { %p3624_p4 = scmp.ne.s32.totalorder %s5117_s1, %s3623_s13  ;;  %p3630_p12 = scmp.lt.u32.totalorder %s3623_s13, %s5117_s1 }
  0x7e   : > { %p5168_p3 = pneg %p5167_p2 }
  0x80   : > { %p3626_p5 = pnand %p3624_p4, %p5168_p3 }
  0x82   : > { %p3627_p10 = pneg %p3626_p5 }
  0x84   : > { %p3632_p7 = pnand %p3630_p12, %p3627_p10 }
  0x86   : > { %3635 = shalt.err (!%p3632_p7)
}
  0x87   : > { %s3636_s2 = scalar_lea.vmem %s254_s19, 512  ;;  %p5169_p0 = pmov %p5168_p3 }
  0x88   : > { %p3637_p8 = scmp.ne.s32.totalorder %s254_s19, %s3636_s2  ;;  %p3644_p1 = scmp.lt.s32.totalorder %s254_s19, %s254_s19 }
  0x89   : > { %p3645_p6 = scmp.lt.s32.totalorder %s3636_s2, %s3636_s2 }
  0x8a   : > { %p3639_p9 = pnand %p3637_p8, %p5169_p0 }
  0x8b   : > { %p3646_p11 = por %p3645_p6, %p3644_p1 }
  0x8c   : > { %p3640_p13 = pneg %p3639_p9 }
  0x8e   : > { %p3647_p3 = pnand %p3646_p11, %p3640_p13 }
  0x90   : > { %3650 = shalt.err (!%p3647_p3)
}
  0x91   : > { %3439 = dma.hbm_to_vmem [thread:$0]  (!%p5167_p2), %s5117_s1, 512, %s254_s19, [#allocation6]  }
  0x92   : > { %s3651_s24 = scalar_lea.hbm %s4039_s16, 65536  ;;  %p5170_p5 = scmp.ne.s32.totalorder %s5163_s21, 0 }
  0x93   : > { %p3652_p4 = scmp.ne.s32.totalorder %s4039_s16, %s3651_s24  ;;  %s3656_s23 = scalar_lea.hbm %s5120_s4, 131072 }
  0x94   : > { %p3657_p6 = scmp.lt.u32.totalorder %s4039_s16, %s5120_s4  ;;  %p3658_p11 = scmp.lt.u32.totalorder %s3656_s23, %s3651_s24 }
  0x95   : > { %p3654_p10 = pnand %p3652_p4, %p5170_p5  ;;  %p3660_p8 = scmp.lt.u32.totalorder %s3651_s24, %s4039_s16 }
  0x96   : > { %p3659_p7 = por %p3658_p11, %p3657_p6 }
  0x97   : > { %p3655_p12 = pneg %p3654_p10 }
  0x98   : > { %p3661_p0 = por %p3660_p8, %p3659_p7 }
  0x9a   : > { %p3662_p9 = pnand %p3661_p0, %p3655_p12 }
  0x9c   : > { %3665 = shalt.err (!%p3662_p9)
}
  0x9d   : > { %s3666_s19 = scalar_lea.vmem %s4043_s29, 65536  ;;  %s3795_s9 = smov [#allocation9]  }
  0x9e   : > { %p3667_p2 = scmp.ne.s32.totalorder %s4043_s29, %s3666_s19  ;;  %s3671_s20 = sshll.u32 %s3795_s9, 4  ;;  %s3672_s20 = int_to_ptr.vmem [resolvable:$false] %s3671_s20 }
  0x9f   : > { %s3673_s30 = scalar_lea.vmem %s3672_s20, 131072  ;;  %p3674_p3 = scmp.lt.s32.totalorder %s4043_s29, %s3672_s20 }
  0xa0   : > { %p3669_p13 = pnand %p3667_p2, %p5170_p5  ;;  %p3675_p4 = scmp.lt.s32.totalorder %s3673_s30, %s3666_s19 }
  0xa2   : > { %p3670_p1 = pneg %p3669_p13  ;;  %p3676_p10 = por %p3675_p4, %p3674_p3 }
  0xa4   : > { %p3677_p6 = pnand %p3676_p10, %p3670_p1 }
  0xa6   : > { %3680 = shalt.err (!%p3677_p6)
}
  0xa7   : > { %p5171_p12 = scmp.ne.s32.totalorder %s5161_s22, 0  ;;  %p5172_p5 = scmp.ne.s32.totalorder %s5153_s14, 0 }
  0xa8   : > { %p5173_p11 = scmp.eq.s32.totalorder (!%p5172_p5), %s3859_s28, 0 }
  0xa9   : > { %3449 = dma.hbm_to_vmem [thread:$0]  (!%p5171_p12), %s4039_s16, 65536, %s4043_s29, %s3965_s17, %s3792_s10, %s3792_s10, %s3793_s15  }
  0xaa   : > { %335 = sbr.rel (%p5172_p5) target bundleno = 855 (0x357), region = 44 }
  0xb1   : > { %3754 = dma.done.wait (%p5173_p11), [#allocation3], 256   ;;  %p5174_p7 = pmov %p5173_p11 }
  0xb3   : > { %3756 = vsyncadd (%p5174_p7), [#allocation3], 4294967040  ;;  %p5175_p8 = pmov %p5174_p7 }
  0xb4   : > { %p5176_p0 = pmov %p5174_p7 }
  0xb5   : > { %3758 = dma.done.wait (%p5175_p8), [#allocation6], 512  }
  0xb6   : > { %3760 = vsyncadd (%p5176_p0), [#allocation6], 4294966784  ;;  %s345_s22 = sand.u32 1, %s3859_s28   ;;  %s4102_s17 = sand.u32 1, %s3779_s25  }
  0xb7   : > { %s4105_s14 = sshll.u32 %s4102_s17, 4  ;;  %s346_s21 = scalar_lea.sflag [#allocation3], %s345_s22 }
  0xb8   : > { %s349_s29 = scalar_lea.vmem [#allocation7], %s4105_s14  ;;  %p5177_p9 = scmp.ne.s32.totalorder %s5149_s11, 0 }
  0xba   : > { %3762 = dma.done.wait (%p5177_p9), %s346_s21, 98560  }
  0xbb   : > { %3764 = vsyncadd (%p5177_p9), %s346_s21, 4294868736  ;;  %s2603_s10 = sshll.u32 %s4102_s17, 11  ;;  %s2604_s11 = sshll.u32 %s4102_s17, 12 }
  0xbc   : > { %s4113_s15 = scalar_lea.vmem [#allocation8], %s2603_s10  ;;  %s4382_s16 = scalar_lea.vmem [#allocation9], %s2604_s11 }
  0xbd   : > { %v429_v0 = vld [vmem:[%s4113_s15 + $0x8] sm:$0xff]  ;;  %v431_v2 = vld [vmem:[%s4113_s15 + $0x18] sm:$0xff]  ;;  %v428_v5 = vld [vmem:[%s4113_s15] sm:$0xff]  ;;  %p419_p2 = scmp.lt.s32.totalorder %s3859_s28, 1  ;;  %s2629_s13 = sshll.u32 %s3859_s28, 8 }
  0xbe   : > { %v437_v1 = vld [vmem:[%s4113_s15 + $0x48] sm:$0xff]  ;;  %v439_v4 = vld [vmem:[%s4113_s15 + $0x58] sm:$0xff]  ;;  %v436_v6 = vld [vmem:[%s4113_s15 + $0x40] sm:$0xff]  ;;  %s417_s0 = scalar_lea.vmem [#allocation11], %s4105_s14  ;;  %s5040_s19 = scalar_lea.hbm %s5123_s7, %s2629_s13 }
  0xbf   : > { %v2631_v3 = vpack.c.bf16 %v437_v1, %v429_v0  ;;  %v2695_v7 = vpack.c.bf16 %v439_v4, %v431_v2  ;;  %v2633_v8 = vpack.c.bf16 %v436_v6, %v428_v5  ;;  %v430_v9 = vld [vmem:[%s4113_s15 + $0x10] sm:$0xff]  ;;  %v445_v11 = vld [vmem:[%s4113_s15 + $0x88] sm:$0xff]  ;;  %v447_v14 = vld [vmem:[%s4113_s15 + $0x98] sm:$0xff]  ;;  %s420_s8 = scalar_select %p419_p2, %s3859_s28, 1 }
  0xc0   : > { %v438_v10 = vld [vmem:[%s4113_s15 + $0x50] sm:$0xff]  ;;  %v453_v13 = vld [vmem:[%s4113_s15 + $0xc8] sm:$0xff]  ;;  %v455_v15 = vld [vmem:[%s4113_s15 + $0xd8] sm:$0xff]  ;;  %s2412_s23 = sshll.u32 %s417_s0, 4  ;;  %s2384_s9 = scalar_lea.sflag [#allocation12], %s4102_s17  ;;  %s5042_s23 = int_to_ptr.vmem [resolvable:$true] %s2412_s23 }
  0xc1   : > { %2632 = vmatprep.subr.bf16.mxu0 %v2631_v3  ;;  %v2697_v12 = vpack.c.bf16 %v438_v10, %v430_v9  ;;  %2696 = vmatprep.subr.bf16.mxu1 %v2695_v7  ;;  %v2635_v16 = vpack.c.bf16 %v453_v13, %v445_v11  ;;  %v2699_v17 = vpack.c.bf16 %v455_v15, %v447_v14  ;;  %v444_v18 = vld [vmem:[%s4113_s15 + $0x80] sm:$0xff]  ;;  %v446_v20 = vld [vmem:[%s4113_s15 + $0x90] sm:$0xff]  ;;  %v461_v23 = vld [vmem:[%s4113_s15 + $0x108] sm:$0xff]  ;;  %s2628_s2 = sshll.u32 %s420_s8, 6  ;;  %s3681_s20 = scalar_lea.vmem %s5042_s23, 256 }
  0xc2   : > { %2634 = vmatpush1.bf16.msra.mxu0 %v2633_v8  ;;  %v452_v19 = vld [vmem:[%s4113_s15 + $0xc0] sm:$0xff]  ;;  %v454_v22 = vld [vmem:[%s4113_s15 + $0xd0] sm:$0xff]  ;;  %v469_v24 = vld [vmem:[%s4113_s15 + $0x148] sm:$0xff]  ;;  %s423_s24 = scalar_lea.vmem %s5121_s5, %s2628_s2  ;;  %p3682_p13 = scmp.ne.s32.totalorder %s5042_s23, %s3681_s20 }
  0xc3   : > { %2698 = vmatpush1.bf16.msra.mxu1 %v2697_v12  ;;  %v2637_v21 = vpack.c.bf16 %v452_v19, %v444_v18  ;;  %2636 = vmatprep.subr.bf16.mxu0 %v2635_v16  ;;  %v2701_v25 = vpack.c.bf16 %v454_v22, %v446_v20  ;;  %v2639_v26 = vpack.c.bf16 %v469_v24, %v461_v23  ;;  %v463_v27 = vld [vmem:[%s4113_s15 + $0x118] sm:$0xff]  ;;  %v460_v29 = vld [vmem:[%s4113_s15 + $0x100] sm:$0xff]  ;;  %v462_v32 = vld [vmem:[%s4113_s15 + $0x110] sm:$0xff]  ;;  %p5178_p1 = scmp.ne.s32.totalorder %s5150_s12, 0  ;;  %s3796_s30 = smov [#allocation11]  }
  0xc4   : > { %2700 = vmatprep.subr.bf16.mxu1 %v2699_v17  ;;  %v471_v28 = vld [vmem:[%s4113_s15 + $0x158] sm:$0xff]  ;;  %v468_v31 = vld [vmem:[%s4113_s15 + $0x140] sm:$0xff]  ;;  %v470_v33 = vld [vmem:[%s4113_s15 + $0x150] sm:$0xff]  ;;  %s3685_s22 = sshll.u32 %s3796_s30, 4  ;;  %s3686_s22 = int_to_ptr.vmem [resolvable:$false] %s3685_s22 }
  0xc5   : > { %v2703_v30 = vpack.c.bf16 %v471_v28, %v463_v27  ;;  %v2641_v34 = vpack.c.bf16 %v468_v31, %v460_v29  ;;  %v477_v35 = vld [vmem:[%s4113_s15 + $0x188] sm:$0xff]  ;;  %v479_v37 = vld [vmem:[%s4113_s15 + $0x198] sm:$0xff]  ;;  %v2705_v38 = vpack.c.bf16 %v470_v33, %v462_v32  ;;  %v476_v41 = vld [vmem:[%s4113_s15 + $0x180] sm:$0xff]  ;;  %p3683_p3 = pnand %p3682_p13, %p5178_p1  ;;  %s3687_s21 = scalar_lea.vmem %s3686_s22, 512 }
  0xc6   : > { %2638 = vmatpush1.bf16.msra.mxu0 %v2637_v21  ;;  %v485_v36 = vld [vmem:[%s4113_s15 + $0x1c8] sm:$0xff]  ;;  %v487_v40 = vld [vmem:[%s4113_s15 + $0x1d8] sm:$0xff]  ;;  %v484_v42 = vld [vmem:[%s4113_s15 + $0x1c0] sm:$0xff]  ;;  %p3688_p10 = scmp.lt.s32.totalorder %s5042_s23, %s3686_s22  ;;  %p3689_p6 = scmp.lt.s32.totalorder %s3687_s21, %s3681_s20 }
  0xc7   : > { %2702 = vmatpush1.bf16.msra.mxu1 %v2701_v25  ;;  %2640 = vmatprep.subr.bf16.mxu0 %v2639_v26  ;;  %v2643_v39 = vpack.c.bf16 %v485_v36, %v477_v35  ;;  %v2707_v43 = vpack.c.bf16 %v487_v40, %v479_v37  ;;  %v478_v44 = vld [vmem:[%s4113_s15 + $0x190] sm:$0xff]  ;;  %v493_v46 = vld [vmem:[%s4113_s15 + $0x208] sm:$0xff]  ;;  %v495_v48 = vld [vmem:[%s4113_s15 + $0x218] sm:$0xff]  ;;  %v2645_v50 = vpack.c.bf16 %v484_v42, %v476_v41  ;;  %p3684_p4 = pneg %p3683_p3 }
  0xc8   : > { %2704 = vmatprep.subr.bf16.mxu1 %v2703_v30  ;;  %v486_v45 = vld [vmem:[%s4113_s15 + $0x1d0] sm:$0xff]  ;;  %v501_v47 = vld [vmem:[%s4113_s15 + $0x248] sm:$0xff]  ;;  %v503_v49 = vld [vmem:[%s4113_s15 + $0x258] sm:$0xff]  ;;  %p3690_p12 = por %p3689_p6, %p3688_p10 }
  0xc9   : > { %v2709_v51 = vpack.c.bf16 %v486_v45, %v478_v44  ;;  %v2647_v52 = vpack.c.bf16 %v501_v47, %v493_v46  ;;  %v492_v53 = vld [vmem:[%s4113_s15 + $0x200] sm:$0xff]  ;;  %v494_v55 = vld [vmem:[%s4113_s15 + $0x210] sm:$0xff]  ;;  %v2711_v56 = vpack.c.bf16 %v503_v49, %v495_v48  ;;  %v509_v58 = vld [vmem:[%s4113_s15 + $0x288] sm:$0xff] }
  0xca   : > { %2642 = vmatpush1.bf16.msra.mxu0 %v2641_v34  ;;  %v500_v54 = vld [vmem:[%s4113_s15 + $0x240] sm:$0xff]  ;;  %v502_v57 = vld [vmem:[%s4113_s15 + $0x250] sm:$0xff]  ;;  %v517_v59 = vld [vmem:[%s4113_s15 + $0x2c8] sm:$0xff]  ;;  %p3691_p5 = pnand %p3690_p12, %p3684_p4 }
  0xcb   : > { %2706 = vmatpush1.bf16.msra.mxu1 %v2705_v38  ;;  %2644 = vmatprep.subr.bf16.mxu0 %v2643_v39  ;;  %v511_v60 = vld [vmem:[%s4113_s15 + $0x298] sm:$0xff]  ;;  %v2649_v62 = vpack.c.bf16 %v500_v54, %v492_v53  ;;  %v2713_v63 = vpack.c.bf16 %v502_v57, %v494_v55  ;;  %v2651_v0 = vpack.c.bf16 %v517_v59, %v509_v58  ;;  %v508_v1 = vld [vmem:[%s4113_s15 + $0x280] sm:$0xff]  ;;  %v510_v3 = vld [vmem:[%s4113_s15 + $0x290] sm:$0xff] }
  0xcc   : > { %2708 = vmatprep.subr.bf16.mxu1 %v2707_v43  ;;  %v519_v61 = vld [vmem:[%s4113_s15 + $0x2d8] sm:$0xff]  ;;  %v516_v2 = vld [vmem:[%s4113_s15 + $0x2c0] sm:$0xff]  ;;  %v518_v5 = vld [vmem:[%s4113_s15 + $0x2d0] sm:$0xff] }
  0xcd   : > { %v2715_v4 = vpack.c.bf16 %v519_v61, %v511_v60  ;;  %v525_v6 = vld [vmem:[%s4113_s15 + $0x308] sm:$0xff]  ;;  %v527_v8 = vld [vmem:[%s4113_s15 + $0x318] sm:$0xff]  ;;  %v2653_v10 = vpack.c.bf16 %v516_v2, %v508_v1  ;;  %v2717_v11 = vpack.c.bf16 %v518_v5, %v510_v3  ;;  %v524_v13 = vld [vmem:[%s4113_s15 + $0x300] sm:$0xff] }
  0xce   : > { %2646 = vmatpush1.bf16.msra.mxu0 %v2645_v50  ;;  %v533_v7 = vld [vmem:[%s4113_s15 + $0x348] sm:$0xff]  ;;  %v535_v9 = vld [vmem:[%s4113_s15 + $0x358] sm:$0xff]  ;;  %v532_v14 = vld [vmem:[%s4113_s15 + $0x340] sm:$0xff] }
  0xcf   : > { %2710 = vmatpush1.bf16.msra.mxu1 %v2709_v51  ;;  %2648 = vmatprep.subr.bf16.mxu0 %v2647_v52  ;;  %v2655_v12 = vpack.c.bf16 %v533_v7, %v525_v6  ;;  %v526_v15 = vld [vmem:[%s4113_s15 + $0x310] sm:$0xff]  ;;  %v2719_v16 = vpack.c.bf16 %v535_v9, %v527_v8  ;;  %v541_v18 = vld [vmem:[%s4113_s15 + $0x388] sm:$0xff]  ;;  %v543_v20 = vld [vmem:[%s4113_s15 + $0x398] sm:$0xff]  ;;  %v2657_v22 = vpack.c.bf16 %v532_v14, %v524_v13 }
  0xd0   : > { %2712 = vmatprep.subr.bf16.mxu1 %v2711_v56  ;;  %v534_v17 = vld [vmem:[%s4113_s15 + $0x350] sm:$0xff]  ;;  %v549_v19 = vld [vmem:[%s4113_s15 + $0x3c8] sm:$0xff]  ;;  %v551_v21 = vld [vmem:[%s4113_s15 + $0x3d8] sm:$0xff] }
  0xd1   : > { %v2721_v23 = vpack.c.bf16 %v534_v17, %v526_v15  ;;  %v2659_v24 = vpack.c.bf16 %v549_v19, %v541_v18  ;;  %v540_v25 = vld [vmem:[%s4113_s15 + $0x380] sm:$0xff]  ;;  %v542_v27 = vld [vmem:[%s4113_s15 + $0x390] sm:$0xff]  ;;  %v2723_v28 = vpack.c.bf16 %v551_v21, %v543_v20  ;;  %v557_v30 = vld [vmem:[%s4113_s15 + $0x408] sm:$0xff] }
  0xd2   : > { %2650 = vmatpush1.bf16.msra.mxu0 %v2649_v62  ;;  %v548_v26 = vld [vmem:[%s4113_s15 + $0x3c0] sm:$0xff]  ;;  %v550_v29 = vld [vmem:[%s4113_s15 + $0x3d0] sm:$0xff]  ;;  %v565_v31 = vld [vmem:[%s4113_s15 + $0x448] sm:$0xff] }
  0xd3   : > { %2714 = vmatpush1.bf16.msra.mxu1 %v2713_v63  ;;  %2652 = vmatprep.subr.bf16.mxu0 %v2651_v0  ;;  %v559_v32 = vld [vmem:[%s4113_s15 + $0x418] sm:$0xff]  ;;  %v2661_v34 = vpack.c.bf16 %v548_v26, %v540_v25  ;;  %v2725_v35 = vpack.c.bf16 %v550_v29, %v542_v27  ;;  %v2663_v36 = vpack.c.bf16 %v565_v31, %v557_v30  ;;  %v556_v37 = vld [vmem:[%s4113_s15 + $0x400] sm:$0xff]  ;;  %v558_v39 = vld [vmem:[%s4113_s15 + $0x410] sm:$0xff] }
  0xd4   : > { %2716 = vmatprep.subr.bf16.mxu1 %v2715_v4  ;;  %v567_v33 = vld [vmem:[%s4113_s15 + $0x458] sm:$0xff]  ;;  %v564_v38 = vld [vmem:[%s4113_s15 + $0x440] sm:$0xff]  ;;  %v566_v41 = vld [vmem:[%s4113_s15 + $0x450] sm:$0xff] }
  0xd5   : > { %v2727_v40 = vpack.c.bf16 %v567_v33, %v559_v32  ;;  %v573_v42 = vld [vmem:[%s4113_s15 + $0x488] sm:$0xff]  ;;  %v575_v44 = vld [vmem:[%s4113_s15 + $0x498] sm:$0xff]  ;;  %v2665_v46 = vpack.c.bf16 %v564_v38, %v556_v37  ;;  %v2729_v47 = vpack.c.bf16 %v566_v41, %v558_v39  ;;  %v572_v49 = vld [vmem:[%s4113_s15 + $0x480] sm:$0xff] }
  0xd6   : > { %2654 = vmatpush1.bf16.msra.mxu0 %v2653_v10  ;;  %v581_v43 = vld [vmem:[%s4113_s15 + $0x4c8] sm:$0xff]  ;;  %v583_v45 = vld [vmem:[%s4113_s15 + $0x4d8] sm:$0xff]  ;;  %v580_v50 = vld [vmem:[%s4113_s15 + $0x4c0] sm:$0xff] }
  0xd7   : > { %2718 = vmatpush1.bf16.msra.mxu1 %v2717_v11  ;;  %2656 = vmatprep.subr.bf16.mxu0 %v2655_v12  ;;  %v2667_v48 = vpack.c.bf16 %v581_v43, %v573_v42  ;;  %v574_v51 = vld [vmem:[%s4113_s15 + $0x490] sm:$0xff]  ;;  %v2731_v52 = vpack.c.bf16 %v583_v45, %v575_v44  ;;  %v589_v54 = vld [vmem:[%s4113_s15 + $0x508] sm:$0xff]  ;;  %v591_v56 = vld [vmem:[%s4113_s15 + $0x518] sm:$0xff]  ;;  %v2669_v58 = vpack.c.bf16 %v580_v50, %v572_v49 }
  0xd8   : > { %2720 = vmatprep.subr.bf16.mxu1 %v2719_v16  ;;  %v582_v53 = vld [vmem:[%s4113_s15 + $0x4d0] sm:$0xff]  ;;  %v597_v55 = vld [vmem:[%s4113_s15 + $0x548] sm:$0xff]  ;;  %v599_v57 = vld [vmem:[%s4113_s15 + $0x558] sm:$0xff] }
  0xd9   : > { %v2733_v59 = vpack.c.bf16 %v582_v53, %v574_v51  ;;  %v2671_v60 = vpack.c.bf16 %v597_v55, %v589_v54  ;;  %v588_v61 = vld [vmem:[%s4113_s15 + $0x500] sm:$0xff]  ;;  %v590_v63 = vld [vmem:[%s4113_s15 + $0x510] sm:$0xff]  ;;  %v2735_v0 = vpack.c.bf16 %v599_v57, %v591_v56  ;;  %v605_v2 = vld [vmem:[%s4113_s15 + $0x588] sm:$0xff] }
  0xda   : > { %2658 = vmatpush1.bf16.msra.mxu0 %v2657_v22  ;;  %v596_v62 = vld [vmem:[%s4113_s15 + $0x540] sm:$0xff]  ;;  %v598_v1 = vld [vmem:[%s4113_s15 + $0x550] sm:$0xff]  ;;  %v613_v3 = vld [vmem:[%s4113_s15 + $0x5c8] sm:$0xff] }
  0xdb   : > { %2722 = vmatpush1.bf16.msra.mxu1 %v2721_v23  ;;  %2660 = vmatprep.subr.bf16.mxu0 %v2659_v24  ;;  %v607_v4 = vld [vmem:[%s4113_s15 + $0x598] sm:$0xff]  ;;  %v2673_v6 = vpack.c.bf16 %v596_v62, %v588_v61  ;;  %v604_v7 = vld [vmem:[%s4113_s15 + $0x580] sm:$0xff]  ;;  %v2737_v8 = vpack.c.bf16 %v598_v1, %v590_v63  ;;  %v2675_v9 = vpack.c.bf16 %v613_v3, %v605_v2  ;;  %v606_v11 = vld [vmem:[%s4113_s15 + $0x590] sm:$0xff] }
  0xdc   : > { %2724 = vmatprep.subr.bf16.mxu1 %v2723_v28  ;;  %v615_v5 = vld [vmem:[%s4113_s15 + $0x5d8] sm:$0xff]  ;;  %v612_v10 = vld [vmem:[%s4113_s15 + $0x5c0] sm:$0xff]  ;;  %v614_v12 = vld [vmem:[%s4113_s15 + $0x5d0] sm:$0xff] }
  0xdd   : > { %v2739_v13 = vpack.c.bf16 %v615_v5, %v607_v4  ;;  %v621_v14 = vld [vmem:[%s4113_s15 + $0x608] sm:$0xff]  ;;  %v4213_v16 = vld [vmem:[#allocation2 + $0x8] sm:$0xff]  ;;  %v2677_v19 = vpack.c.bf16 %v612_v10, %v604_v7  ;;  %v2741_v20 = vpack.c.bf16 %v614_v12, %v606_v11  ;;  %v620_v22 = vld [vmem:[%s4113_s15 + $0x600] sm:$0xff] }
  0xde   : > { %2662 = vmatpush1.bf16.msra.mxu0 %v2661_v34  ;;  %v629_v15 = vld [vmem:[%s4113_s15 + $0x648] sm:$0xff]  ;;  %v623_v17 = vld [vmem:[%s4113_s15 + $0x618] sm:$0xff]  ;;  %792 = vmatprep.mubr.f32.mxu0 %v4213_v16  ;;  %v628_v23 = vld [vmem:[%s4113_s15 + $0x640] sm:$0xff] }
  0xdf   : > { %2726 = vmatpush1.bf16.msra.mxu1 %v2725_v35  ;;  %2664 = vmatprep.subr.bf16.mxu0 %v2663_v36  ;;  %v631_v18 = vld [vmem:[%s4113_s15 + $0x658] sm:$0xff]  ;;  %v2679_v21 = vpack.c.bf16 %v629_v15, %v621_v14  ;;  %v622_v24 = vld [vmem:[%s4113_s15 + $0x610] sm:$0xff]  ;;  %v637_v27 = vld [vmem:[%s4113_s15 + $0x688] sm:$0xff]  ;;  %v2681_v31 = vpack.c.bf16 %v628_v23, %v620_v22 }
  0xe0   : > { %2728 = vmatprep.subr.bf16.mxu1 %v2727_v40  ;;  %863 = vmatprep.mubr.f32.mxu1 %v4213_v16  ;;  %v2743_v25 = vpack.c.bf16 %v631_v18, %v623_v17  ;;  %v630_v26 = vld [vmem:[%s4113_s15 + $0x650] sm:$0xff]  ;;  %v645_v28 = vld [vmem:[%s4113_s15 + $0x6c8] sm:$0xff]  ;;  %v639_v29 = vld [vmem:[%s4113_s15 + $0x698] sm:$0xff] }
  0xe1   : > { %v647_v30 = vld [vmem:[%s4113_s15 + $0x6d8] sm:$0xff]  ;;  %v2745_v32 = vpack.c.bf16 %v630_v26, %v622_v24  ;;  %v2683_v33 = vpack.c.bf16 %v645_v28, %v637_v27  ;;  %v636_v34 = vld [vmem:[%s4113_s15 + $0x680] sm:$0xff]  ;;  %v638_v36 = vld [vmem:[%s4113_s15 + $0x690] sm:$0xff] }
  0xe2   : > { %2666 = vmatpush1.bf16.msra.mxu0 %v2665_v46  ;;  %v644_v35 = vld [vmem:[%s4113_s15 + $0x6c0] sm:$0xff]  ;;  %v2747_v37 = vpack.c.bf16 %v647_v30, %v639_v29  ;;  %v646_v38 = vld [vmem:[%s4113_s15 + $0x6d0] sm:$0xff]  ;;  %v653_v39 = vld [vmem:[%s4113_s15 + $0x708] sm:$0xff] }
  0xe3   : > { %2730 = vmatpush1.bf16.msra.mxu1 %v2729_v47  ;;  %2668 = vmatprep.subr.bf16.mxu0 %v2667_v48  ;;  %v661_v40 = vld [vmem:[%s4113_s15 + $0x748] sm:$0xff]  ;;  %v655_v41 = vld [vmem:[%s4113_s15 + $0x718] sm:$0xff]  ;;  %v2685_v43 = vpack.c.bf16 %v644_v35, %v636_v34  ;;  %v2749_v44 = vpack.c.bf16 %v646_v38, %v638_v36  ;;  %v652_v46 = vld [vmem:[%s4113_s15 + $0x700] sm:$0xff] }
  0xe4   : > { %2732 = vmatprep.subr.bf16.mxu1 %v2731_v52  ;;  %v663_v42 = vld [vmem:[%s4113_s15 + $0x758] sm:$0xff]  ;;  %v2687_v45 = vpack.c.bf16 %v661_v40, %v653_v39  ;;  %v660_v47 = vld [vmem:[%s4113_s15 + $0x740] sm:$0xff]  ;;  %v654_v48 = vld [vmem:[%s4113_s15 + $0x710] sm:$0xff] }
  0xe5   : > { %v2751_v49 = vpack.c.bf16 %v663_v42, %v655_v41  ;;  %v662_v50 = vld [vmem:[%s4113_s15 + $0x750] sm:$0xff]  ;;  %v669_v51 = vld [vmem:[%s4113_s15 + $0x788] sm:$0xff]  ;;  %v671_v53 = vld [vmem:[%s4113_s15 + $0x798] sm:$0xff]  ;;  %v2689_v55 = vpack.c.bf16 %v660_v47, %v652_v46 }
  0xe6   : > { %2670 = vmatpush1.bf16.msra.mxu0 %v2669_v58  ;;  %v677_v52 = vld [vmem:[%s4113_s15 + $0x7c8] sm:$0xff]  ;;  %v679_v54 = vld [vmem:[%s4113_s15 + $0x7d8] sm:$0xff]  ;;  %v2753_v56 = vpack.c.bf16 %v662_v50, %v654_v48  ;;  %v668_v58 = vld [vmem:[%s4113_s15 + $0x780] sm:$0xff] }
  0xe7   : > { %2734 = vmatpush1.bf16.msra.mxu1 %v2733_v59  ;;  %2672 = vmatprep.subr.bf16.mxu0 %v2671_v60  ;;  %v2691_v57 = vpack.c.bf16 %v677_v52, %v669_v51  ;;  %v676_v59 = vld [vmem:[%s4113_s15 + $0x7c0] sm:$0xff]  ;;  %v670_v60 = vld [vmem:[%s4113_s15 + $0x790] sm:$0xff]  ;;  %v2755_v61 = vpack.c.bf16 %v679_v54, %v671_v53  ;;  %v433_v63 = vld [vmem:[%s4113_s15 + $0x28] sm:$0xff] }
  0xe8   : > { %2736 = vmatprep.subr.bf16.mxu1 %v2735_v0  ;;  %v678_v62 = vld [vmem:[%s4113_s15 + $0x7d0] sm:$0xff]  ;;  %v441_v0 = vld [vmem:[%s4113_s15 + $0x68] sm:$0xff]  ;;  %v435_v1 = vld [vmem:[%s4113_s15 + $0x38] sm:$0xff]  ;;  %v2693_v3 = vpack.c.bf16 %v676_v59, %v668_v58 }
  0xe9   : > { %v443_v2 = vld [vmem:[%s4113_s15 + $0x78] sm:$0xff]  ;;  %v2757_v4 = vpack.c.bf16 %v678_v62, %v670_v60  ;;  %v2759_v5 = vpack.c.bf16 %v441_v0, %v433_v63  ;;  %v440_v7 = vld [vmem:[%s4113_s15 + $0x60] sm:$0xff]  ;;  %v442_v10 = vld [vmem:[%s4113_s15 + $0x70] sm:$0xff] }
  0xea   : > { %2674 = vmatpush1.bf16.msra.mxu0 %v2673_v6  ;;  %v432_v6 = vld [vmem:[%s4113_s15 + $0x20] sm:$0xff]  ;;  %v449_v11 = vld [vmem:[%s4113_s15 + $0xa8] sm:$0xff]  ;;  %v459_v14 = vld [vmem:[%s4113_s15 + $0xf8] sm:$0xff] }
  0xeb   : > { %2738 = vmatpush1.bf16.msra.mxu1 %v2737_v8  ;;  %2676 = vmatprep.subr.bf16.mxu0 %v2675_v9  ;;  %v434_v8 = vld [vmem:[%s4113_s15 + $0x30] sm:$0xff]  ;;  %v2823_v9 = vpack.c.bf16 %v443_v2, %v435_v1  ;;  %v457_v12 = vld [vmem:[%s4113_s15 + $0xe8] sm:$0xff]  ;;  %v2761_v17 = vpack.c.bf16 %v440_v7, %v432_v6  ;;  %v467_v27 = vld [vmem:[%s4113_s15 + $0x138] sm:$0xff] }
  0xec   : > { %2740 = vmatprep.subr.bf16.mxu1 %v2739_v13  ;;  %v451_v13 = vld [vmem:[%s4113_s15 + $0xb8] sm:$0xff]  ;;  %v4259_v15 = vld [vmem:[#allocation2] sm:$0xff]  ;;  %v2825_v18 = vpack.c.bf16 %v442_v10, %v434_v8  ;;  %v473_v26 = vld [vmem:[%s4113_s15 + $0x168] sm:$0xff] }
  0xed   : > { %v450_v22 = vld [vmem:[%s4113_s15 + $0xb0] sm:$0xff]  ;;  %v2827_v23 = vpack.c.bf16 %v459_v14, %v451_v13  ;;  %v475_v28 = vld [vmem:[%s4113_s15 + $0x178] sm:$0xff]  ;;  %v489_v38 = vld [vmem:[%s4113_s15 + $0x1e8] sm:$0xff] }
  0xee   : > { %2678 = vmatpush1.bf16.msra.mxu0 %v2677_v19  ;;  %v2763_v19 = vpack.c.bf16 %v457_v12, %v449_v11  ;;  %v458_v24 = vld [vmem:[%s4113_s15 + $0xf0] sm:$0xff]  ;;  %v2831_v35 = vpack.c.bf16 %v475_v28, %v467_v27  ;;  %v483_v39 = vld [vmem:[%s4113_s15 + $0x1b8] sm:$0xff]  ;;  %v513_v60 = vld [vmem:[%s4113_s15 + $0x2a8] sm:$0xff] }
  0xef   : > { %2742 = vmatpush1.bf16.msra.mxu1 %v2741_v20  ;;  %2680 = vmatprep.subr.bf16.mxu0 %v2679_v21  ;;  %v448_v20 = vld [vmem:[%s4113_s15 + $0xa0] sm:$0xff]  ;;  %v2829_v30 = vpack.c.bf16 %v458_v24, %v450_v22  ;;  %v466_v34 = vld [vmem:[%s4113_s15 + $0x130] sm:$0xff]  ;;  %v491_v40 = vld [vmem:[%s4113_s15 + $0x1f8] sm:$0xff] }
  0xf0   : > { %2744 = vmatprep.subr.bf16.mxu1 %v2743_v25  ;;  %v456_v21 = vld [vmem:[%s4113_s15 + $0xe0] sm:$0xff]  ;;  %v465_v25 = vld [vmem:[%s4113_s15 + $0x128] sm:$0xff]  ;;  %v474_v36 = vld [vmem:[%s4113_s15 + $0x170] sm:$0xff]  ;;  %v2835_v47 = vpack.c.bf16 %v491_v40, %v483_v39 }
  0xf1   : > { %v2765_v29 = vpack.c.bf16 %v456_v21, %v448_v20  ;;  %v2833_v42 = vpack.c.bf16 %v474_v36, %v466_v34  ;;  %v482_v46 = vld [vmem:[%s4113_s15 + $0x1b0] sm:$0xff]  ;;  %v499_v50 = vld [vmem:[%s4113_s15 + $0x238] sm:$0xff]  ;;  %v529_v8 = vld [vmem:[%s4113_s15 + $0x328] sm:$0xff] }
  0xf2   : > { %2682 = vmatpush1.bf16.msra.mxu0 %v2681_v31  ;;  %v2767_v31 = vpack.c.bf16 %v473_v26, %v465_v25  ;;  %v490_v48 = vld [vmem:[%s4113_s15 + $0x1f0] sm:$0xff]  ;;  %v507_v51 = vld [vmem:[%s4113_s15 + $0x278] sm:$0xff]  ;;  %v545_v22 = vld [vmem:[%s4113_s15 + $0x3a8] sm:$0xff] }
  0xf3   : > { %2746 = vmatpush1.bf16.msra.mxu1 %v2745_v32  ;;  %2684 = vmatprep.subr.bf16.mxu0 %v2683_v33  ;;  %v464_v32 = vld [vmem:[%s4113_s15 + $0x120] sm:$0xff]  ;;  %v2837_v53 = vpack.c.bf16 %v490_v48, %v482_v46  ;;  %v2839_v58 = vpack.c.bf16 %v507_v51, %v499_v50  ;;  %v506_v59 = vld [vmem:[%s4113_s15 + $0x270] sm:$0xff]  ;;  %v515_v62 = vld [vmem:[%s4113_s15 + $0x2b8] sm:$0xff] }
  0xf4   : > { %2748 = vmatprep.subr.bf16.mxu1 %v2747_v37  ;;  %v472_v33 = vld [vmem:[%s4113_s15 + $0x160] sm:$0xff]  ;;  %v481_v37 = vld [vmem:[%s4113_s15 + $0x1a8] sm:$0xff]  ;;  %v523_v63 = vld [vmem:[%s4113_s15 + $0x2f8] sm:$0xff] }
  0xf5   : > { %v2769_v41 = vpack.c.bf16 %v472_v33, %v464_v32  ;;  %v2843_v6 = vpack.c.bf16 %v523_v63, %v515_v62  ;;  %v522_v7 = vld [vmem:[%s4113_s15 + $0x2f0] sm:$0xff]  ;;  %v531_v10 = vld [vmem:[%s4113_s15 + $0x338] sm:$0xff]  ;;  %v561_v34 = vld [vmem:[%s4113_s15 + $0x428] sm:$0xff] }
  0xf6   : > { %2686 = vmatpush1.bf16.msra.mxu0 %v2685_v43  ;;  %v2771_v43 = vpack.c.bf16 %v489_v38, %v481_v37  ;;  %v539_v11 = vld [vmem:[%s4113_s15 + $0x378] sm:$0xff]  ;;  %v538_v21 = vld [vmem:[%s4113_s15 + $0x370] sm:$0xff]  ;;  %v577_v46 = vld [vmem:[%s4113_s15 + $0x4a8] sm:$0xff] }
  0xf7   : > { %2750 = vmatpush1.bf16.msra.mxu1 %v2749_v44  ;;  %2688 = vmatprep.subr.bf16.mxu0 %v2687_v45  ;;  %v480_v44 = vld [vmem:[%s4113_s15 + $0x1a0] sm:$0xff]  ;;  %v2847_v20 = vpack.c.bf16 %v539_v11, %v531_v10  ;;  %v547_v24 = vld [vmem:[%s4113_s15 + $0x3b8] sm:$0xff]  ;;  %v554_v33 = vld [vmem:[%s4113_s15 + $0x3f0] sm:$0xff] }
  0xf8   : > { %2752 = vmatprep.subr.bf16.mxu1 %v2751_v49  ;;  %v488_v45 = vld [vmem:[%s4113_s15 + $0x1e0] sm:$0xff]  ;;  %v497_v49 = vld [vmem:[%s4113_s15 + $0x228] sm:$0xff]  ;;  %v555_v25 = vld [vmem:[%s4113_s15 + $0x3f8] sm:$0xff] }
  0xf9   : > { %v2773_v52 = vpack.c.bf16 %v488_v45, %v480_v44  ;;  %v2851_v32 = vpack.c.bf16 %v555_v25, %v547_v24  ;;  %v563_v36 = vld [vmem:[%s4113_s15 + $0x438] sm:$0xff]  ;;  %v570_v45 = vld [vmem:[%s4113_s15 + $0x470] sm:$0xff] }
  0xfa   : > { %2690 = vmatpush1.bf16.msra.mxu0 %v2689_v55  ;;  %v496_v55 = vld [vmem:[%s4113_s15 + $0x220] sm:$0xff]  ;;  %v571_v37 = vld [vmem:[%s4113_s15 + $0x478] sm:$0xff] }
  0xfb   : > { %2754 = vmatpush1.bf16.msra.mxu1 %v2753_v56  ;;  %2692 = vmatprep.subr.bf16.mxu0 %v2691_v57  ;;  %v504_v56 = vld [vmem:[%s4113_s15 + $0x260] sm:$0xff]  ;;  %v498_v57 = vld [vmem:[%s4113_s15 + $0x230] sm:$0xff]  ;;  %v2855_v44 = vpack.c.bf16 %v571_v37, %v563_v36  ;;  %v579_v48 = vld [vmem:[%s4113_s15 + $0x4b8] sm:$0xff] }
  0xfc   : > { %2756 = vmatprep.subr.bf16.mxu1 %v2755_v61  ;;  %v521_v61 = vld [vmem:[%s4113_s15 + $0x2e8] sm:$0xff]  ;;  %v2777_v0 = vpack.c.bf16 %v504_v56, %v496_v55  ;;  %v2841_v1 = vpack.c.bf16 %v506_v59, %v498_v57  ;;  %v586_v56 = vld [vmem:[%s4113_s15 + $0x4f0] sm:$0xff]  ;;  %v595_v59 = vld [vmem:[%s4113_s15 + $0x538] sm:$0xff] }
  0xfd   : > { %v2779_v2 = vpack.c.bf16 %v521_v61, %v513_v60  ;;  %v593_v57 = vld [vmem:[%s4113_s15 + $0x528] sm:$0xff]  ;;  %v603_v60 = vld [vmem:[%s4113_s15 + $0x578] sm:$0xff] }
  0xfe   : > { %2694 = vmatpush1.bf16.msra.mxu0 %v2693_v3  ;;  %v512_v3 = vld [vmem:[%s4113_s15 + $0x2a0] sm:$0xff] }
  0xff   : > { %2758 = vmatpush1.bf16.msra.mxu1 %v2757_v4  ;;  %2760 = vmatprep.subr.bf16.mxu0 %v2759_v5  ;;  %v520_v4 = vld [vmem:[%s4113_s15 + $0x2e0] sm:$0xff]  ;;  %v514_v5 = vld [vmem:[%s4113_s15 + $0x2b0] sm:$0xff] }
 0x100   : > { %2824 = vmatprep.subr.bf16.mxu1 %v2823_v9  ;;  %v537_v9 = vld [vmem:[%s4113_s15 + $0x368] sm:$0xff]  ;;  %v2781_v12 = vpack.c.bf16 %v520_v4, %v512_v3  ;;  %v2845_v13 = vpack.c.bf16 %v522_v7, %v514_v5  ;;  %v2863_v3 = vpack.c.bf16 %v603_v60, %v595_v59  ;;  %v602_v4 = vld [vmem:[%s4113_s15 + $0x570] sm:$0xff]  ;;  %v611_v7 = vld [vmem:[%s4113_s15 + $0x5b8] sm:$0xff] }
 0x101   : > { %793 = vmatmul.mubr.f32.vlgmr.msra.gmra.mrb[0].mxu0 %v4259_v15  ;;  %v2783_v14 = vpack.c.bf16 %v537_v9, %v529_v8  ;;  %v609_v5 = vld [vmem:[%s4113_s15 + $0x5a8] sm:$0xff]  ;;  %v619_v8 = vld [vmem:[%s4113_s15 + $0x5f8] sm:$0xff] }
 0x102   : > { %864 = vmatmul.mubr.f32.vlgmr.msra.gmra.mrb[0].mxu1 %v4259_v15  ;;  %2762 = vmatpush1.bf16.msra.mxu0 %v2761_v17  ;;  %v528_v17 = vld [vmem:[%s4113_s15 + $0x320] sm:$0xff] }
 0x103   : > { %2826 = vmatpush1.bf16.msra.mxu1 %v2825_v18  ;;  %2764 = vmatprep.subr.bf16.mxu0 %v2763_v19  ;;  %v536_v18 = vld [vmem:[%s4113_s15 + $0x360] sm:$0xff]  ;;  %v530_v19 = vld [vmem:[%s4113_s15 + $0x330] sm:$0xff] }
 0x104   : > { %2828 = vmatprep.subr.bf16.mxu1 %v2827_v23  ;;  %934 = vmatprep.mubr.f32.mxu0 %v4213_v16  ;;  %v553_v23 = vld [vmem:[%s4113_s15 + $0x3e8] sm:$0xff]  ;;  %v2785_v26 = vpack.c.bf16 %v536_v18, %v528_v17  ;;  %v2849_v27 = vpack.c.bf16 %v538_v21, %v530_v19  ;;  %v2867_v17 = vpack.c.bf16 %v619_v8, %v611_v7  ;;  %v618_v18 = vld [vmem:[%s4113_s15 + $0x5f0] sm:$0xff]  ;;  %v627_v21 = vld [vmem:[%s4113_s15 + $0x638] sm:$0xff] }
 0x105   : > { %1005 = vmatprep.mubr.f32.mxu1 %v4213_v16  ;;  %v505_v16 = vld [vmem:[%s4113_s15 + $0x268] sm:$0xff]  ;;  %v2787_v28 = vpack.c.bf16 %v553_v23, %v545_v22  ;;  %v635_v22 = vld [vmem:[%s4113_s15 + $0x678] sm:$0xff] }
 0x106   : > { %2766 = vmatpush1.bf16.msra.mxu0 %v2765_v29  ;;  %v2775_v54 = vpack.c.bf16 %v505_v16, %v497_v49  ;;  %v544_v29 = vld [vmem:[%s4113_s15 + $0x3a0] sm:$0xff]  ;;  %v587_v49 = vld [vmem:[%s4113_s15 + $0x4f8] sm:$0xff]  ;;  %v625_v19 = vld [vmem:[%s4113_s15 + $0x628] sm:$0xff] }
 0x107   : > { %2830 = vmatpush1.bf16.msra.mxu1 %v2829_v30  ;;  %2768 = vmatprep.subr.bf16.mxu0 %v2767_v31  ;;  %v552_v30 = vld [vmem:[%s4113_s15 + $0x3e0] sm:$0xff]  ;;  %v546_v31 = vld [vmem:[%s4113_s15 + $0x3b0] sm:$0xff]  ;;  %v2859_v55 = vpack.c.bf16 %v587_v49, %v579_v48 }
 0x108   : > { %2832 = vmatprep.subr.bf16.mxu1 %v2831_v35  ;;  %v569_v35 = vld [vmem:[%s4113_s15 + $0x468] sm:$0xff]  ;;  %v2789_v38 = vpack.c.bf16 %v552_v30, %v544_v29  ;;  %v2853_v39 = vpack.c.bf16 %v554_v33, %v546_v31  ;;  %v2871_v29 = vpack.c.bf16 %v635_v22, %v627_v21  ;;  %v634_v30 = vld [vmem:[%s4113_s15 + $0x670] sm:$0xff]  ;;  %v643_v33 = vld [vmem:[%s4113_s15 + $0x6b8] sm:$0xff] }
 0x109   : > { %v2791_v40 = vpack.c.bf16 %v569_v35, %v561_v34  ;;  %v641_v31 = vld [vmem:[%s4113_s15 + $0x6a8] sm:$0xff]  ;;  %v651_v34 = vld [vmem:[%s4113_s15 + $0x6f8] sm:$0xff] }
 0x10a   : > { %2770 = vmatpush1.bf16.msra.mxu0 %v2769_v41  ;;  %v560_v41 = vld [vmem:[%s4113_s15 + $0x420] sm:$0xff] }
 0x10b   : > { %2834 = vmatpush1.bf16.msra.mxu1 %v2833_v42  ;;  %2772 = vmatprep.subr.bf16.mxu0 %v2771_v43  ;;  %v568_v42 = vld [vmem:[%s4113_s15 + $0x460] sm:$0xff]  ;;  %v562_v43 = vld [vmem:[%s4113_s15 + $0x430] sm:$0xff] }
 0x10c   : > { %2836 = vmatprep.subr.bf16.mxu1 %v2835_v47  ;;  %v585_v47 = vld [vmem:[%s4113_s15 + $0x4e8] sm:$0xff]  ;;  %v2793_v16 = vpack.c.bf16 %v568_v42, %v560_v41  ;;  %v2857_v50 = vpack.c.bf16 %v570_v45, %v562_v43  ;;  %v2875_v41 = vpack.c.bf16 %v651_v34, %v643_v33  ;;  %v650_v42 = vld [vmem:[%s4113_s15 + $0x6f0] sm:$0xff]  ;;  %v659_v45 = vld [vmem:[%s4113_s15 + $0x738] sm:$0xff] }
 0x10d   : > { %v2795_v51 = vpack.c.bf16 %v585_v47, %v577_v46  ;;  %v657_v43 = vld [vmem:[%s4113_s15 + $0x728] sm:$0xff]  ;;  %v667_v46 = vld [vmem:[%s4113_s15 + $0x778] sm:$0xff] }
 0x10e   : > { %2774 = vmatpush1.bf16.msra.mxu0 %v2773_v52  ;;  %v576_v52 = vld [vmem:[%s4113_s15 + $0x4a0] sm:$0xff] }
 0x10f   : > { %2838 = vmatpush1.bf16.msra.mxu1 %v2837_v53  ;;  %2776 = vmatprep.subr.bf16.mxu0 %v2775_v54  ;;  %v584_v53 = vld [vmem:[%s4113_s15 + $0x4e0] sm:$0xff]  ;;  %v578_v54 = vld [vmem:[%s4113_s15 + $0x4b0] sm:$0xff] }
 0x110   : > { %2840 = vmatprep.subr.bf16.mxu1 %v2839_v58  ;;  %v601_v58 = vld [vmem:[%s4113_s15 + $0x568] sm:$0xff]  ;;  %v2797_v61 = vpack.c.bf16 %v584_v53, %v576_v52  ;;  %v2861_v62 = vpack.c.bf16 %v586_v56, %v578_v54  ;;  %v2879_v52 = vpack.c.bf16 %v667_v46, %v659_v45  ;;  %v666_v53 = vld [vmem:[%s4113_s15 + $0x770] sm:$0xff]  ;;  %v675_v56 = vld [vmem:[%s4113_s15 + $0x7b8] sm:$0xff] }
 0x111   : > { %v2799_v63 = vpack.c.bf16 %v601_v58, %v593_v57  ;;  %v673_v54 = vld [vmem:[%s4113_s15 + $0x7a8] sm:$0xff]  ;;  %v683_v57 = vld [vmem:[%s4113_s15 + $0x7f8] sm:$0xff] }
 0x112   : > { %2778 = vmatpush1.bf16.msra.mxu0 %v2777_v0  ;;  %v592_v0 = vld [vmem:[%s4113_s15 + $0x520] sm:$0xff] }
 0x113   : > { %2842 = vmatpush1.bf16.msra.mxu1 %v2841_v1  ;;  %2780 = vmatprep.subr.bf16.mxu0 %v2779_v2  ;;  %v600_v1 = vld [vmem:[%s4113_s15 + $0x560] sm:$0xff]  ;;  %v594_v2 = vld [vmem:[%s4113_s15 + $0x530] sm:$0xff] }
 0x114   : > { %2844 = vmatprep.subr.bf16.mxu1 %v2843_v6  ;;  %v617_v6 = vld [vmem:[%s4113_s15 + $0x5e8] sm:$0xff]  ;;  %v2801_v9 = vpack.c.bf16 %v600_v1, %v592_v0  ;;  %v2865_v10 = vpack.c.bf16 %v602_v4, %v594_v2  ;;  %v2883_v0 = vpack.c.bf16 %v683_v57, %v675_v56  ;;  %v682_v1 = vld [vmem:[%s4113_s15 + $0x7f0] sm:$0xff]  ;;  %v1019_v4 = vld [vmem:[%s4382_s16 + $0x18] sm:$0xff] }
 0x115   : > { %v2803_v11 = vpack.c.bf16 %v617_v6, %v609_v5  ;;  %v1017_v2 = vld [vmem:[%s4382_s16 + $0x8] sm:$0xff]  ;;  %v1027_v5 = vld [vmem:[%s4382_s16 + $0x58] sm:$0xff] }
 0x116   : > { %2782 = vmatpush1.bf16.msra.mxu0 %v2781_v12  ;;  %v608_v12 = vld [vmem:[%s4113_s15 + $0x5a0] sm:$0xff] }
 0x117   : > { %2846 = vmatpush1.bf16.msra.mxu1 %v2845_v13  ;;  %2784 = vmatprep.subr.bf16.mxu0 %v2783_v14  ;;  %v616_v13 = vld [vmem:[%s4113_s15 + $0x5e0] sm:$0xff]  ;;  %v610_v14 = vld [vmem:[%s4113_s15 + $0x5b0] sm:$0xff] }
 0x118   : > { %2848 = vmatprep.subr.bf16.mxu1 %v2847_v20  ;;  %v633_v20 = vld [vmem:[%s4113_s15 + $0x668] sm:$0xff]  ;;  %v2805_v23 = vpack.c.bf16 %v616_v13, %v608_v12  ;;  %v2869_v24 = vpack.c.bf16 %v618_v18, %v610_v14  ;;  %v3015_v12 = vpack.c.bf16 %v1027_v5, %v1019_v4  ;;  %v1026_v13 = vld [vmem:[%s4382_s16 + $0x50] sm:$0xff]  ;;  %v1035_v18 = vld [vmem:[%s4382_s16 + $0x98] sm:$0xff] }
 0x119   : > { %v2807_v25 = vpack.c.bf16 %v633_v20, %v625_v19  ;;  %v1033_v14 = vld [vmem:[%s4382_s16 + $0x88] sm:$0xff]  ;;  %v1043_v19 = vld [vmem:[%s4382_s16 + $0xd8] sm:$0xff] }
 0x11a   : > { %2786 = vmatpush1.bf16.msra.mxu0 %v2785_v26  ;;  %v624_v26 = vld [vmem:[%s4113_s15 + $0x620] sm:$0xff] }
 0x11b   : > { %2850 = vmatpush1.bf16.msra.mxu1 %v2849_v27  ;;  %2788 = vmatprep.subr.bf16.mxu0 %v2787_v28  ;;  %v632_v27 = vld [vmem:[%s4113_s15 + $0x660] sm:$0xff]  ;;  %v626_v28 = vld [vmem:[%s4113_s15 + $0x630] sm:$0xff] }
 0x11c   : > { %2852 = vmatprep.subr.bf16.mxu1 %v2851_v32  ;;  %v649_v32 = vld [vmem:[%s4113_s15 + $0x6e8] sm:$0xff]  ;;  %v2809_v35 = vpack.c.bf16 %v632_v27, %v624_v26  ;;  %v2873_v36 = vpack.c.bf16 %v634_v30, %v626_v28  ;;  %v3019_v26 = vpack.c.bf16 %v1043_v19, %v1035_v18  ;;  %v1042_v27 = vld [vmem:[%s4382_s16 + $0xd0] sm:$0xff]  ;;  %v1051_v30 = vld [vmem:[%s4382_s16 + $0x118] sm:$0xff] }
 0x11d   : > { %v2811_v37 = vpack.c.bf16 %v649_v32, %v641_v31  ;;  %v1049_v28 = vld [vmem:[%s4382_s16 + $0x108] sm:$0xff]  ;;  %v1059_v31 = vld [vmem:[%s4382_s16 + $0x158] sm:$0xff] }
 0x11e   : > { %2790 = vmatpush1.bf16.msra.mxu0 %v2789_v38  ;;  %v640_v38 = vld [vmem:[%s4113_s15 + $0x6a0] sm:$0xff]  ;;  %v1013_v32 = vld [vmem:[#allocation5 + $0x8] sm:$0xff] }
 0x11f   : > { %2854 = vmatpush1.bf16.msra.mxu1 %v2853_v39  ;;  %2792 = vmatprep.subr.bf16.mxu0 %v2791_v40  ;;  %v648_v39 = vld [vmem:[%s4113_s15 + $0x6e0] sm:$0xff]  ;;  %v642_v40 = vld [vmem:[%s4113_s15 + $0x6b0] sm:$0xff] }
 0x120   : > { %2856 = vmatprep.subr.bf16.mxu1 %v2855_v44  ;;  %v665_v44 = vld [vmem:[%s4113_s15 + $0x768] sm:$0xff]  ;;  %v2813_v47 = vpack.c.bf16 %v648_v39, %v640_v38  ;;  %v2877_v48 = vpack.c.bf16 %v650_v42, %v642_v40  ;;  %v1050_v38 = vld [vmem:[%s4382_s16 + $0x110] sm:$0xff]  ;;  %v3023_v39 = vpack.c.bf16 %v1059_v31, %v1051_v30 }
 0x121   : > { %v2815_v49 = vpack.c.bf16 %v665_v44, %v657_v43  ;;  %v1058_v40 = vld [vmem:[%s4382_s16 + $0x150] sm:$0xff]  ;;  %v1073_v42 = vld [vmem:[%s4382_s16 + $0x1c8] sm:$0xff]  ;;  %v1075_v43 = vld [vmem:[%s4382_s16 + $0x1d8] sm:$0xff] }
 0x122   : > { %2794 = vmatpush1.bf16.msra.mxu0 %v2793_v16  ;;  %v656_v16 = vld [vmem:[%s4113_s15 + $0x720] sm:$0xff]  ;;  %v3025_v45 = vpack.c.bf16 %v1058_v40, %v1050_v38  ;;  %v1153_v38 = vld [vmem:[%s4382_s16 + $0x448] sm:$0xff]  ;;  %v1155_v40 = vld [vmem:[%s4382_s16 + $0x458] sm:$0xff] }
 0x123   : > { %2858 = vmatpush1.bf16.msra.mxu1 %v2857_v50  ;;  %2796 = vmatprep.subr.bf16.mxu0 %v2795_v51  ;;  %v664_v50 = vld [vmem:[%s4113_s15 + $0x760] sm:$0xff]  ;;  %v658_v51 = vld [vmem:[%s4113_s15 + $0x730] sm:$0xff] }
 0x124   : > { %2860 = vmatprep.subr.bf16.mxu1 %v2859_v55  ;;  %v681_v55 = vld [vmem:[%s4113_s15 + $0x7e8] sm:$0xff]  ;;  %v2817_v58 = vpack.c.bf16 %v664_v50, %v656_v16  ;;  %v2881_v59 = vpack.c.bf16 %v666_v53, %v658_v51  ;;  %v1074_v50 = vld [vmem:[%s4382_s16 + $0x1d0] sm:$0xff]  ;;  %v1083_v53 = vld [vmem:[%s4382_s16 + $0x218] sm:$0xff] }
 0x125   : > { %v2819_v60 = vpack.c.bf16 %v681_v55, %v673_v54  ;;  %v1081_v51 = vld [vmem:[%s4382_s16 + $0x208] sm:$0xff]  ;;  %v1091_v54 = vld [vmem:[%s4382_s16 + $0x258] sm:$0xff] }
 0x126   : > { %2798 = vmatpush1.bf16.msra.mxu0 %v2797_v61  ;;  %v672_v61 = vld [vmem:[%s4113_s15 + $0x7a0] sm:$0xff] }
 0x127   : > { %2862 = vmatpush1.bf16.msra.mxu1 %v2861_v62  ;;  %2800 = vmatprep.subr.bf16.mxu0 %v2799_v63  ;;  %v680_v62 = vld [vmem:[%s4113_s15 + $0x7e0] sm:$0xff]  ;;  %v674_v63 = vld [vmem:[%s4113_s15 + $0x7b0] sm:$0xff] }
 0x128   : > { %2864 = vmatprep.subr.bf16.mxu1 %v2863_v3  ;;  %v1025_v3 = vld [vmem:[%s4382_s16 + $0x48] sm:$0xff]  ;;  %v2821_v6 = vpack.c.bf16 %v680_v62, %v672_v61  ;;  %v2885_v7 = vpack.c.bf16 %v682_v1, %v674_v63  ;;  %v3031_v61 = vpack.c.bf16 %v1091_v54, %v1083_v53  ;;  %v1090_v62 = vld [vmem:[%s4382_s16 + $0x250] sm:$0xff]  ;;  %v1099_v1 = vld [vmem:[%s4382_s16 + $0x298] sm:$0xff] }
 0x129   : > { %v2887_v8 = vpack.c.bf16 %v1025_v3, %v1017_v2  ;;  %v1097_v63 = vld [vmem:[%s4382_s16 + $0x288] sm:$0xff]  ;;  %v1107_v2 = vld [vmem:[%s4382_s16 + $0x2d8] sm:$0xff]  ;;  %v1160_v54 = vld [vmem:[%s4382_s16 + $0x480] sm:$0xff] }
 0x12a   : > { %2802 = vmatpush1.bf16.msra.mxu0 %v2801_v9  ;;  %v1016_v9 = vld [vmem:[%s4382_s16] sm:$0xff] }
 0x12b   : > { %2866 = vmatpush1.bf16.msra.mxu1 %v2865_v10  ;;  %2804 = vmatprep.subr.bf16.mxu0 %v2803_v11  ;;  %v1024_v10 = vld [vmem:[%s4382_s16 + $0x40] sm:$0xff]  ;;  %v1018_v11 = vld [vmem:[%s4382_s16 + $0x10] sm:$0xff] }
 0x12c   : > { %2868 = vmatprep.subr.bf16.mxu1 %v2867_v17  ;;  %v1041_v17 = vld [vmem:[%s4382_s16 + $0xc8] sm:$0xff]  ;;  %v2889_v20 = vpack.c.bf16 %v1024_v10, %v1016_v9  ;;  %v3017_v21 = vpack.c.bf16 %v1026_v13, %v1018_v11  ;;  %v3035_v9 = vpack.c.bf16 %v1107_v2, %v1099_v1  ;;  %v1106_v10 = vld [vmem:[%s4382_s16 + $0x2d0] sm:$0xff]  ;;  %v1115_v13 = vld [vmem:[%s4382_s16 + $0x318] sm:$0xff] }
 0x12d   : > { %v2891_v22 = vpack.c.bf16 %v1041_v17, %v1033_v14  ;;  %v1113_v11 = vld [vmem:[%s4382_s16 + $0x308] sm:$0xff]  ;;  %v1123_v14 = vld [vmem:[%s4382_s16 + $0x358] sm:$0xff]  ;;  %v1176_v2 = vld [vmem:[%s4382_s16 + $0x500] sm:$0xff] }
 0x12e   : > { %2806 = vmatpush1.bf16.msra.mxu0 %v2805_v23  ;;  %v1032_v23 = vld [vmem:[%s4382_s16 + $0x80] sm:$0xff] }
 0x12f   : > { %2870 = vmatpush1.bf16.msra.mxu1 %v2869_v24  ;;  %2808 = vmatprep.subr.bf16.mxu0 %v2807_v25  ;;  %v1040_v24 = vld [vmem:[%s4382_s16 + $0xc0] sm:$0xff]  ;;  %v1034_v25 = vld [vmem:[%s4382_s16 + $0x90] sm:$0xff] }
 0x130   : > { %2872 = vmatprep.subr.bf16.mxu1 %v2871_v29  ;;  %v1057_v29 = vld [vmem:[%s4382_s16 + $0x148] sm:$0xff]  ;;  %v2893_v33 = vpack.c.bf16 %v1040_v24, %v1032_v23  ;;  %v3021_v34 = vpack.c.bf16 %v1042_v27, %v1034_v25  ;;  %v3039_v23 = vpack.c.bf16 %v1123_v14, %v1115_v13  ;;  %v1122_v24 = vld [vmem:[%s4382_s16 + $0x350] sm:$0xff]  ;;  %v1131_v27 = vld [vmem:[%s4382_s16 + $0x398] sm:$0xff] }
 0x131   : > { %v1129_v25 = vld [vmem:[%s4382_s16 + $0x388] sm:$0xff]  ;;  %v1192_v14 = vld [vmem:[%s4382_s16 + $0x580] sm:$0xff] }
 0x132   : > { %2810 = vmatpush1.bf16.msra.mxu0 %v2809_v35  ;;  %v2895_v35 = vpack.c.bf16 %v1057_v29, %v1049_v28  ;;  %v1139_v28 = vld [vmem:[%s4382_s16 + $0x3d8] sm:$0xff] }
 0x133   : > { %2874 = vmatpush1.bf16.msra.mxu1 %v2873_v36  ;;  %2812 = vmatprep.subr.bf16.mxu0 %v2811_v37  ;;  %v1048_v36 = vld [vmem:[%s4382_s16 + $0x100] sm:$0xff] }
 0x134   : > { %2876 = vmatprep.subr.bf16.mxu1 %v2875_v41  ;;  %v1056_v37 = vld [vmem:[%s4382_s16 + $0x140] sm:$0xff]  ;;  %v1065_v41 = vld [vmem:[%s4382_s16 + $0x188] sm:$0xff] }
 0x135   : > { %v2897_v44 = vpack.c.bf16 %v1056_v37, %v1048_v36  ;;  %v2899_v46 = vpack.c.bf16 %v1073_v42, %v1065_v41  ;;  %v1138_v36 = vld [vmem:[%s4382_s16 + $0x3d0] sm:$0xff]  ;;  %v1145_v37 = vld [vmem:[%s4382_s16 + $0x408] sm:$0xff] }
 0x136   : > { %2814 = vmatpush1.bf16.msra.mxu0 %v2813_v47  ;;  %v1064_v47 = vld [vmem:[%s4382_s16 + $0x180] sm:$0xff] }
 0x137   : > { %2878 = vmatpush1.bf16.msra.mxu1 %v2877_v48  ;;  %2816 = vmatprep.subr.bf16.mxu0 %v2815_v49  ;;  %v1072_v48 = vld [vmem:[%s4382_s16 + $0x1c0] sm:$0xff]  ;;  %v1066_v49 = vld [vmem:[%s4382_s16 + $0x190] sm:$0xff] }
 0x138   : > { %2880 = vmatprep.subr.bf16.mxu1 %v2879_v52  ;;  %v1089_v52 = vld [vmem:[%s4382_s16 + $0x248] sm:$0xff]  ;;  %v2901_v55 = vpack.c.bf16 %v1072_v48, %v1064_v47  ;;  %v3029_v56 = vpack.c.bf16 %v1074_v50, %v1066_v49  ;;  %v1154_v47 = vld [vmem:[%s4382_s16 + $0x450] sm:$0xff]  ;;  %v1171_v50 = vld [vmem:[%s4382_s16 + $0x4d8] sm:$0xff] }
 0x139   : > { %v2903_v57 = vpack.c.bf16 %v1089_v52, %v1081_v51  ;;  %v1161_v48 = vld [vmem:[%s4382_s16 + $0x488] sm:$0xff] }
 0x13a   : > { %2818 = vmatpush1.bf16.msra.mxu0 %v2817_v58  ;;  %v1080_v58 = vld [vmem:[%s4382_s16 + $0x200] sm:$0xff]  ;;  %v1169_v49 = vld [vmem:[%s4382_s16 + $0x4c8] sm:$0xff] }
 0x13b   : > { %2882 = vmatpush1.bf16.msra.mxu1 %v2881_v59  ;;  %2820 = vmatprep.subr.bf16.mxu0 %v2819_v60  ;;  %v1088_v59 = vld [vmem:[%s4382_s16 + $0x240] sm:$0xff]  ;;  %v1082_v60 = vld [vmem:[%s4382_s16 + $0x210] sm:$0xff]  ;;  %v2923_v53 = vpack.c.bf16 %v1169_v49, %v1161_v48 }
 0x13c   : > { %2884 = vmatprep.subr.bf16.mxu1 %v2883_v0  ;;  %v1105_v0 = vld [vmem:[%s4382_s16 + $0x2c8] sm:$0xff]  ;;  %v2905_v3 = vpack.c.bf16 %v1088_v59, %v1080_v58  ;;  %v3033_v4 = vpack.c.bf16 %v1090_v62, %v1082_v60  ;;  %v1170_v58 = vld [vmem:[%s4382_s16 + $0x4d0] sm:$0xff]  ;;  %v1187_v62 = vld [vmem:[%s4382_s16 + $0x558] sm:$0xff] }
 0x13d   : > { %v2907_v5 = vpack.c.bf16 %v1105_v0, %v1097_v63  ;;  %v1177_v59 = vld [vmem:[%s4382_s16 + $0x508] sm:$0xff] }
 0x13e   : > { %2822 = vmatpush1.bf16.msra.mxu0 %v2821_v6  ;;  %v1096_v6 = vld [vmem:[%s4382_s16 + $0x280] sm:$0xff]  ;;  %v1185_v60 = vld [vmem:[%s4382_s16 + $0x548] sm:$0xff] }
 0x13f   : > { %2886 = vmatpush1.bf16.msra.mxu1 %v2885_v7  ;;  %2888 = vmatprep.subr.bf16.mxu0 %v2887_v8  ;;  %v1104_v7 = vld [vmem:[%s4382_s16 + $0x2c0] sm:$0xff]  ;;  %v1098_v8 = vld [vmem:[%s4382_s16 + $0x290] sm:$0xff]  ;;  %v2927_v1 = vpack.c.bf16 %v1185_v60, %v1177_v59 }
 0x140   : > { %3016 = vmatprep.subr.bf16.mxu1 %v3015_v12  ;;  %v1121_v12 = vld [vmem:[%s4382_s16 + $0x348] sm:$0xff]  ;;  %v2909_v17 = vpack.c.bf16 %v1104_v7, %v1096_v6  ;;  %v3037_v18 = vpack.c.bf16 %v1106_v10, %v1098_v8  ;;  %v1186_v6 = vld [vmem:[%s4382_s16 + $0x550] sm:$0xff]  ;;  %v1203_v10 = vld [vmem:[%s4382_s16 + $0x5d8] sm:$0xff] }
 0x141   : > { %935 = vmatmul.mubr.f32.vlgmr.msra.gmra.mrb[2].mxu0 %v4259_v15  ;;  %v2911_v19 = vpack.c.bf16 %v1121_v12, %v1113_v11  ;;  %v1193_v7 = vld [vmem:[%s4382_s16 + $0x588] sm:$0xff] }
 0x142   : > { %1006 = vmatmul.mubr.f32.vlgmr.msra.gmra.mrb[2].mxu1 %v4259_v15  ;;  %2890 = vmatpush1.bf16.msra.mxu0 %v2889_v20  ;;  %v1067_v15 = vld [vmem:[%s4382_s16 + $0x198] sm:$0xff]  ;;  %v1112_v20 = vld [vmem:[%s4382_s16 + $0x300] sm:$0xff]  ;;  %v1201_v8 = vld [vmem:[%s4382_s16 + $0x5c8] sm:$0xff] }
 0x143   : > { %3018 = vmatpush1.bf16.msra.mxu1 %v3017_v21  ;;  %2892 = vmatprep.subr.bf16.mxu0 %v2891_v22  ;;  %v3027_v16 = vpack.c.bf16 %v1075_v43, %v1067_v15  ;;  %v1120_v21 = vld [vmem:[%s4382_s16 + $0x340] sm:$0xff]  ;;  %v1114_v22 = vld [vmem:[%s4382_s16 + $0x310] sm:$0xff]  ;;  %v2919_v15 = vpack.c.bf16 %v1153_v38, %v1145_v37  ;;  %v2931_v13 = vpack.c.bf16 %v1201_v8, %v1193_v7 }
 0x144   : > { %3020 = vmatprep.subr.bf16.mxu1 %v3019_v26  ;;  %1637 = vmatprep.mubr.f32.mxu0 %v1013_v32  ;;  %v1137_v26 = vld [vmem:[%s4382_s16 + $0x3c8] sm:$0xff]  ;;  %v2913_v29 = vpack.c.bf16 %v1120_v21, %v1112_v20  ;;  %v3041_v30 = vpack.c.bf16 %v1122_v24, %v1114_v22  ;;  %v1144_v43 = vld [vmem:[%s4382_s16 + $0x400] sm:$0xff]  ;;  %v1202_v20 = vld [vmem:[%s4382_s16 + $0x5d0] sm:$0xff] }
 0x145   : > { %1779 = vmatprep.mubr.f32.mxu1 %v1013_v32  ;;  %v2915_v31 = vpack.c.bf16 %v1137_v26, %v1129_v25  ;;  %v1128_v32 = vld [vmem:[%s4382_s16 + $0x380] sm:$0xff]  ;;  %v1209_v21 = vld [vmem:[%s4382_s16 + $0x608] sm:$0xff]  ;;  %v1219_v24 = vld [vmem:[%s4382_s16 + $0x658] sm:$0xff] }
 0x146   : > { %2894 = vmatpush1.bf16.msra.mxu0 %v2893_v33  ;;  %v1136_v33 = vld [vmem:[%s4382_s16 + $0x3c0] sm:$0xff]  ;;  %v1217_v22 = vld [vmem:[%s4382_s16 + $0x648] sm:$0xff] }
 0x147   : > { %3022 = vmatpush1.bf16.msra.mxu1 %v3021_v34  ;;  %2896 = vmatprep.subr.bf16.mxu0 %v2895_v35  ;;  %v1130_v34 = vld [vmem:[%s4382_s16 + $0x390] sm:$0xff]  ;;  %v3043_v35 = vpack.c.bf16 %v1139_v28, %v1131_v27  ;;  %v2917_v41 = vpack.c.bf16 %v1136_v33, %v1128_v32  ;;  %v2935_v27 = vpack.c.bf16 %v1217_v22, %v1209_v21  ;;  %v1208_v28 = vld [vmem:[%s4382_s16 + $0x600] sm:$0xff]  ;;  %v1225_v33 = vld [vmem:[%s4382_s16 + $0x688] sm:$0xff] }
 0x148   : > { %3024 = vmatprep.subr.bf16.mxu1 %v3023_v39  ;;  %v1147_v39 = vld [vmem:[%s4382_s16 + $0x418] sm:$0xff]  ;;  %v3045_v42 = vpack.c.bf16 %v1138_v36, %v1130_v34  ;;  %v1218_v32 = vld [vmem:[%s4382_s16 + $0x650] sm:$0xff]  ;;  %v1233_v34 = vld [vmem:[%s4382_s16 + $0x6c8] sm:$0xff] }
 0x149   : > { %v1235_v36 = vld [vmem:[%s4382_s16 + $0x6d8] sm:$0xff]  ;;  %v1012_v21 = vld [vmem:[#allocation5] sm:$0xff] }
 0x14a   : > { %2898 = vmatpush1.bf16.msra.mxu0 %v2897_v44  ;;  %v1152_v44 = vld [vmem:[%s4382_s16 + $0x440] sm:$0xff] }
 0x14b   : > { %3026 = vmatpush1.bf16.msra.mxu1 %v3025_v45  ;;  %2900 = vmatprep.subr.bf16.mxu0 %v2899_v46  ;;  %v1146_v45 = vld [vmem:[%s4382_s16 + $0x410] sm:$0xff]  ;;  %v3047_v46 = vpack.c.bf16 %v1155_v40, %v1147_v39  ;;  %v2921_v51 = vpack.c.bf16 %v1152_v44, %v1144_v43  ;;  %v2939_v39 = vpack.c.bf16 %v1233_v34, %v1225_v33  ;;  %v1224_v40 = vld [vmem:[%s4382_s16 + $0x680] sm:$0xff]  ;;  %v1241_v44 = vld [vmem:[%s4382_s16 + $0x708] sm:$0xff] }
 0x14c   : > { %3028 = vmatprep.subr.bf16.mxu1 %v3027_v16  ;;  %v1163_v16 = vld [vmem:[%s4382_s16 + $0x498] sm:$0xff]  ;;  %v3049_v52 = vpack.c.bf16 %v1154_v47, %v1146_v45  ;;  %v1234_v43 = vld [vmem:[%s4382_s16 + $0x6d0] sm:$0xff]  ;;  %v1249_v45 = vld [vmem:[%s4382_s16 + $0x748] sm:$0xff] }
 0x14d   : > { %v1251_v47 = vld [vmem:[%s4382_s16 + $0x758] sm:$0xff] }
 0x14e   : > { %2902 = vmatpush1.bf16.msra.mxu0 %v2901_v55  ;;  %v1168_v55 = vld [vmem:[%s4382_s16 + $0x4c0] sm:$0xff]  ;;  %v1315_v33 = vld [vmem:[%s4382_s16 + $0x958] sm:$0xff] }
 0x14f   : > { %3030 = vmatpush1.bf16.msra.mxu1 %v3029_v56  ;;  %2904 = vmatprep.subr.bf16.mxu0 %v2903_v57  ;;  %v1162_v56 = vld [vmem:[%s4382_s16 + $0x490] sm:$0xff]  ;;  %v3051_v57 = vpack.c.bf16 %v1171_v50, %v1163_v16  ;;  %v2925_v63 = vpack.c.bf16 %v1168_v55, %v1160_v54  ;;  %v2943_v16 = vpack.c.bf16 %v1249_v45, %v1241_v44  ;;  %v1240_v50 = vld [vmem:[%s4382_s16 + $0x700] sm:$0xff]  ;;  %v1257_v55 = vld [vmem:[%s4382_s16 + $0x788] sm:$0xff] }
 0x150   : > { %3032 = vmatprep.subr.bf16.mxu1 %v3031_v61  ;;  %v1179_v61 = vld [vmem:[%s4382_s16 + $0x518] sm:$0xff]  ;;  %v3053_v0 = vpack.c.bf16 %v1170_v58, %v1162_v56  ;;  %v1250_v54 = vld [vmem:[%s4382_s16 + $0x750] sm:$0xff]  ;;  %v1265_v56 = vld [vmem:[%s4382_s16 + $0x7c8] sm:$0xff] }
 0x151   : > { %v1267_v58 = vld [vmem:[%s4382_s16 + $0x7d8] sm:$0xff] }
 0x152   : > { %2906 = vmatpush1.bf16.msra.mxu0 %v2905_v3  ;;  %v1184_v3 = vld [vmem:[%s4382_s16 + $0x540] sm:$0xff]  ;;  %v1015_v34 = vld [vmem:[#allocation5 + $0x18] sm:$0xff] }
 0x153   : > { %3034 = vmatpush1.bf16.msra.mxu1 %v3033_v4  ;;  %2908 = vmatprep.subr.bf16.mxu0 %v2907_v5  ;;  %v1178_v4 = vld [vmem:[%s4382_s16 + $0x510] sm:$0xff]  ;;  %v3055_v5 = vpack.c.bf16 %v1187_v62, %v1179_v61  ;;  %v2929_v11 = vpack.c.bf16 %v1184_v3, %v1176_v2  ;;  %v2947_v61 = vpack.c.bf16 %v1265_v56, %v1257_v55  ;;  %v1256_v62 = vld [vmem:[%s4382_s16 + $0x780] sm:$0xff]  ;;  %v1273_v3 = vld [vmem:[%s4382_s16 + $0x808] sm:$0xff] }
 0x154   : > { %3036 = vmatprep.subr.bf16.mxu1 %v3035_v9  ;;  %v1195_v9 = vld [vmem:[%s4382_s16 + $0x598] sm:$0xff]  ;;  %v3057_v12 = vpack.c.bf16 %v1186_v6, %v1178_v4  ;;  %v1266_v2 = vld [vmem:[%s4382_s16 + $0x7d0] sm:$0xff]  ;;  %v1281_v4 = vld [vmem:[%s4382_s16 + $0x848] sm:$0xff] }
 0x155   : > { %v1283_v6 = vld [vmem:[%s4382_s16 + $0x858] sm:$0xff] }
 0x156   : > { %2910 = vmatpush1.bf16.msra.mxu0 %v2909_v17  ;;  %v1200_v17 = vld [vmem:[%s4382_s16 + $0x5c0] sm:$0xff]  ;;  %v1323_v44 = vld [vmem:[%s4382_s16 + $0x998] sm:$0xff] }
 0x157   : > { %3038 = vmatpush1.bf16.msra.mxu1 %v3037_v18  ;;  %2912 = vmatprep.subr.bf16.mxu0 %v2911_v19  ;;  %v1194_v18 = vld [vmem:[%s4382_s16 + $0x590] sm:$0xff]  ;;  %v3059_v19 = vpack.c.bf16 %v1203_v10, %v1195_v9  ;;  %v2933_v25 = vpack.c.bf16 %v1200_v17, %v1192_v14  ;;  %v2951_v9 = vpack.c.bf16 %v1281_v4, %v1273_v3  ;;  %v1272_v10 = vld [vmem:[%s4382_s16 + $0x800] sm:$0xff]  ;;  %v1289_v17 = vld [vmem:[%s4382_s16 + $0x888] sm:$0xff] }
 0x158   : > { %3040 = vmatprep.subr.bf16.mxu1 %v3039_v23  ;;  %v1211_v23 = vld [vmem:[%s4382_s16 + $0x618] sm:$0xff]  ;;  %v3061_v26 = vpack.c.bf16 %v1202_v20, %v1194_v18  ;;  %v1282_v14 = vld [vmem:[%s4382_s16 + $0x850] sm:$0xff]  ;;  %v1297_v18 = vld [vmem:[%s4382_s16 + $0x8c8] sm:$0xff] }
 0x159   : > { %v1299_v20 = vld [vmem:[%s4382_s16 + $0x8d8] sm:$0xff] }
 0x15a   : > { %2914 = vmatpush1.bf16.msra.mxu0 %v2913_v29  ;;  %v1216_v29 = vld [vmem:[%s4382_s16 + $0x640] sm:$0xff]  ;;  %v1331_v45 = vld [vmem:[%s4382_s16 + $0x9d8] sm:$0xff] }
 0x15b   : > { %3042 = vmatpush1.bf16.msra.mxu1 %v3041_v30  ;;  %2916 = vmatprep.subr.bf16.mxu0 %v2915_v31  ;;  %v1210_v30 = vld [vmem:[%s4382_s16 + $0x610] sm:$0xff]  ;;  %v3063_v31 = vpack.c.bf16 %v1219_v24, %v1211_v23  ;;  %v2937_v37 = vpack.c.bf16 %v1216_v29, %v1208_v28  ;;  %v2955_v24 = vpack.c.bf16 %v1297_v18, %v1289_v17  ;;  %v1339_v55 = vld [vmem:[%s4382_s16 + $0xa18] sm:$0xff] }
 0x15c   : > { %3044 = vmatprep.subr.bf16.mxu1 %v3043_v35  ;;  %v1227_v35 = vld [vmem:[%s4382_s16 + $0x698] sm:$0xff]  ;;  %v3065_v38 = vpack.c.bf16 %v1218_v32, %v1210_v30  ;;  %v1298_v29 = vld [vmem:[%s4382_s16 + $0x8d0] sm:$0xff]  ;;  %v1305_v30 = vld [vmem:[%s4382_s16 + $0x908] sm:$0xff] }
 0x15d   : > { %v1307_v32 = vld [vmem:[%s4382_s16 + $0x918] sm:$0xff] }
 0x15e   : > { %2918 = vmatpush1.bf16.msra.mxu0 %v2917_v41  ;;  %v1232_v41 = vld [vmem:[%s4382_s16 + $0x6c0] sm:$0xff]  ;;  %v1347_v56 = vld [vmem:[%s4382_s16 + $0xa58] sm:$0xff] }
 0x15f   : > { %3046 = vmatpush1.bf16.msra.mxu1 %v3045_v42  ;;  %2920 = vmatprep.subr.bf16.mxu0 %v2919_v15  ;;  %v1226_v42 = vld [vmem:[%s4382_s16 + $0x690] sm:$0xff]  ;;  %v3067_v15 = vpack.c.bf16 %v1235_v36, %v1227_v35  ;;  %v2941_v48 = vpack.c.bf16 %v1232_v41, %v1224_v40  ;;  %v3087_v41 = vpack.c.bf16 %v1315_v33, %v1307_v32  ;;  %v1355_v3 = vld [vmem:[%s4382_s16 + $0xa98] sm:$0xff] }
 0x160   : > { %3048 = vmatprep.subr.bf16.mxu1 %v3047_v46  ;;  %v1243_v46 = vld [vmem:[%s4382_s16 + $0x718] sm:$0xff]  ;;  %v3069_v49 = vpack.c.bf16 %v1234_v43, %v1226_v42  ;;  %v1306_v40 = vld [vmem:[%s4382_s16 + $0x910] sm:$0xff]  ;;  %v1329_v43 = vld [vmem:[%s4382_s16 + $0x9c8] sm:$0xff] }
 0x161   : > { %v1314_v42 = vld [vmem:[%s4382_s16 + $0x950] sm:$0xff]  ;;  %v1363_v4 = vld [vmem:[%s4382_s16 + $0xad8] sm:$0xff] }
 0x162   : > { %2922 = vmatpush1.bf16.msra.mxu0 %v2921_v51  ;;  %v1248_v51 = vld [vmem:[%s4382_s16 + $0x740] sm:$0xff]  ;;  %v1371_v17 = vld [vmem:[%s4382_s16 + $0xb18] sm:$0xff] }
 0x163   : > { %3050 = vmatpush1.bf16.msra.mxu1 %v3049_v52  ;;  %2924 = vmatprep.subr.bf16.mxu0 %v2923_v53  ;;  %v1242_v52 = vld [vmem:[%s4382_s16 + $0x710] sm:$0xff]  ;;  %v3071_v53 = vpack.c.bf16 %v1251_v47, %v1243_v46  ;;  %v2945_v59 = vpack.c.bf16 %v1248_v51, %v1240_v50  ;;  %v3089_v47 = vpack.c.bf16 %v1314_v42, %v1306_v40  ;;  %v1379_v18 = vld [vmem:[%s4382_s16 + $0xb58] sm:$0xff]  ;;  %v1409_v40 = vld [vmem:[%s4382_s16 + $0xc48] sm:$0xff] }
 0x164   : > { %3052 = vmatprep.subr.bf16.mxu1 %v3051_v57  ;;  %v1259_v57 = vld [vmem:[%s4382_s16 + $0x798] sm:$0xff]  ;;  %v3073_v60 = vpack.c.bf16 %v1250_v54, %v1242_v52  ;;  %v1322_v50 = vld [vmem:[%s4382_s16 + $0x990] sm:$0xff]  ;;  %v3091_v51 = vpack.c.bf16 %v1331_v45, %v1323_v44  ;;  %v1345_v54 = vld [vmem:[%s4382_s16 + $0xa48] sm:$0xff] }
 0x165   : > { %v1330_v52 = vld [vmem:[%s4382_s16 + $0x9d0] sm:$0xff]  ;;  %v1411_v42 = vld [vmem:[%s4382_s16 + $0xc58] sm:$0xff]  ;;  %v1400_v45 = vld [vmem:[%s4382_s16 + $0xc00] sm:$0xff] }
 0x166   : > { %2926 = vmatpush1.bf16.msra.mxu0 %v2925_v63  ;;  %v1264_v63 = vld [vmem:[%s4382_s16 + $0x7c0] sm:$0xff] }
 0x167   : > { %3054 = vmatpush1.bf16.msra.mxu1 %v3053_v0  ;;  %2928 = vmatprep.subr.bf16.mxu0 %v2927_v1  ;;  %v1258_v0 = vld [vmem:[%s4382_s16 + $0x790] sm:$0xff]  ;;  %v3075_v1 = vpack.c.bf16 %v1267_v58, %v1259_v57  ;;  %v2949_v7 = vpack.c.bf16 %v1264_v63, %v1256_v62  ;;  %v3093_v58 = vpack.c.bf16 %v1330_v52, %v1322_v50  ;;  %v1425_v50 = vld [vmem:[%s4382_s16 + $0xcc8] sm:$0xff]  ;;  %v1427_v52 = vld [vmem:[%s4382_s16 + $0xcd8] sm:$0xff] }
 0x168   : > { %3056 = vmatprep.subr.bf16.mxu1 %v3055_v5  ;;  %v1275_v5 = vld [vmem:[%s4382_s16 + $0x818] sm:$0xff]  ;;  %v3077_v8 = vpack.c.bf16 %v1266_v2, %v1258_v0  ;;  %v1338_v62 = vld [vmem:[%s4382_s16 + $0xa10] sm:$0xff]  ;;  %v3095_v63 = vpack.c.bf16 %v1347_v56, %v1339_v55  ;;  %v1361_v2 = vld [vmem:[%s4382_s16 + $0xac8] sm:$0xff] }
 0x169   : > { %v1346_v0 = vld [vmem:[%s4382_s16 + $0xa50] sm:$0xff]  ;;  %v1416_v56 = vld [vmem:[%s4382_s16 + $0xc80] sm:$0xff] }
 0x16a   : > { %2930 = vmatpush1.bf16.msra.mxu0 %v2929_v11  ;;  %v1280_v11 = vld [vmem:[%s4382_s16 + $0x840] sm:$0xff] }
 0x16b   : > { %3058 = vmatpush1.bf16.msra.mxu1 %v3057_v12  ;;  %2932 = vmatprep.subr.bf16.mxu0 %v2931_v13  ;;  %v1274_v12 = vld [vmem:[%s4382_s16 + $0x810] sm:$0xff]  ;;  %v3079_v13 = vpack.c.bf16 %v1283_v6, %v1275_v5  ;;  %v2953_v22 = vpack.c.bf16 %v1280_v11, %v1272_v10  ;;  %v3097_v6 = vpack.c.bf16 %v1346_v0, %v1338_v62  ;;  %v1441_v62 = vld [vmem:[%s4382_s16 + $0xd48] sm:$0xff]  ;;  %v1443_v0 = vld [vmem:[%s4382_s16 + $0xd58] sm:$0xff] }
 0x16c   : > { %3060 = vmatprep.subr.bf16.mxu1 %v3059_v19  ;;  %v1291_v19 = vld [vmem:[%s4382_s16 + $0x898] sm:$0xff]  ;;  %v3081_v23 = vpack.c.bf16 %v1282_v14, %v1274_v12  ;;  %v1354_v10 = vld [vmem:[%s4382_s16 + $0xa90] sm:$0xff]  ;;  %v3099_v11 = vpack.c.bf16 %v1363_v4, %v1355_v3  ;;  %v1377_v14 = vld [vmem:[%s4382_s16 + $0xb48] sm:$0xff] }
 0x16d   : > { %v3083_v28 = vpack.c.bf16 %v1299_v20, %v1291_v19  ;;  %v1362_v12 = vld [vmem:[%s4382_s16 + $0xad0] sm:$0xff]  ;;  %v1432_v4 = vld [vmem:[%s4382_s16 + $0xd00] sm:$0xff] }
 0x16e   : > { %2934 = vmatpush1.bf16.msra.mxu0 %v2933_v25  ;;  %v1288_v25 = vld [vmem:[%s4382_s16 + $0x880] sm:$0xff]  ;;  %v3101_v20 = vpack.c.bf16 %v1362_v12, %v1354_v10  ;;  %v1457_v10 = vld [vmem:[%s4382_s16 + $0xdc8] sm:$0xff]  ;;  %v1459_v12 = vld [vmem:[%s4382_s16 + $0xdd8] sm:$0xff] }
 0x16f   : > { %3062 = vmatpush1.bf16.msra.mxu1 %v3061_v26  ;;  %2936 = vmatprep.subr.bf16.mxu0 %v2935_v27  ;;  %v1296_v26 = vld [vmem:[%s4382_s16 + $0x8c0] sm:$0xff]  ;;  %v1290_v27 = vld [vmem:[%s4382_s16 + $0x890] sm:$0xff] }
 0x170   : > { %3064 = vmatprep.subr.bf16.mxu1 %v3063_v31  ;;  %v1313_v31 = vld [vmem:[%s4382_s16 + $0x948] sm:$0xff]  ;;  %v2957_v35 = vpack.c.bf16 %v1296_v26, %v1288_v25  ;;  %v3085_v36 = vpack.c.bf16 %v1298_v29, %v1290_v27  ;;  %v3103_v25 = vpack.c.bf16 %v1379_v18, %v1371_v17  ;;  %v1378_v26 = vld [vmem:[%s4382_s16 + $0xb50] sm:$0xff]  ;;  %v1387_v29 = vld [vmem:[%s4382_s16 + $0xb98] sm:$0xff] }
 0x171   : > { %v1385_v27 = vld [vmem:[%s4382_s16 + $0xb88] sm:$0xff]  ;;  %v1448_v18 = vld [vmem:[%s4382_s16 + $0xd80] sm:$0xff] }
 0x172   : > { %2938 = vmatpush1.bf16.msra.mxu0 %v2937_v37  ;;  %v2959_v37 = vpack.c.bf16 %v1313_v31, %v1305_v30  ;;  %v1395_v30 = vld [vmem:[%s4382_s16 + $0xbd8] sm:$0xff] }
 0x173   : > { %3066 = vmatpush1.bf16.msra.mxu1 %v3065_v38  ;;  %2940 = vmatprep.subr.bf16.mxu0 %v2939_v39  ;;  %v1304_v38 = vld [vmem:[%s4382_s16 + $0x900] sm:$0xff] }
 0x174   : > { %3068 = vmatprep.subr.bf16.mxu1 %v3067_v15  ;;  %v1312_v39 = vld [vmem:[%s4382_s16 + $0x940] sm:$0xff]  ;;  %v1321_v15 = vld [vmem:[%s4382_s16 + $0x988] sm:$0xff] }
 0x175   : > { %v2961_v46 = vpack.c.bf16 %v1312_v39, %v1304_v38  ;;  %v1394_v38 = vld [vmem:[%s4382_s16 + $0xbd0] sm:$0xff]  ;;  %v1401_v39 = vld [vmem:[%s4382_s16 + $0xc08] sm:$0xff] }
 0x176   : > { %2942 = vmatpush1.bf16.msra.mxu0 %v2941_v48  ;;  %v2963_v48 = vpack.c.bf16 %v1329_v43, %v1321_v15  ;;  %v2983_v44 = vpack.c.bf16 %v1409_v40, %v1401_v39 }
 0x177   : > { %3070 = vmatpush1.bf16.msra.mxu1 %v3069_v49  ;;  %2944 = vmatprep.subr.bf16.mxu0 %v2943_v16  ;;  %v1320_v49 = vld [vmem:[%s4382_s16 + $0x980] sm:$0xff] }
 0x178   : > { %3072 = vmatprep.subr.bf16.mxu1 %v3071_v53  ;;  %v1328_v16 = vld [vmem:[%s4382_s16 + $0x9c0] sm:$0xff]  ;;  %v1337_v53 = vld [vmem:[%s4382_s16 + $0xa08] sm:$0xff] }
 0x179   : > { %v2965_v57 = vpack.c.bf16 %v1328_v16, %v1320_v49  ;;  %v1410_v49 = vld [vmem:[%s4382_s16 + $0xc50] sm:$0xff]  ;;  %v1417_v16 = vld [vmem:[%s4382_s16 + $0xc88] sm:$0xff] }
 0x17a   : > { %2946 = vmatpush1.bf16.msra.mxu0 %v2945_v59  ;;  %v2967_v59 = vpack.c.bf16 %v1345_v54, %v1337_v53  ;;  %v2987_v55 = vpack.c.bf16 %v1425_v50, %v1417_v16 }
 0x17b   : > { %3074 = vmatpush1.bf16.msra.mxu1 %v3073_v60  ;;  %2948 = vmatprep.subr.bf16.mxu0 %v2947_v61  ;;  %v1336_v60 = vld [vmem:[%s4382_s16 + $0xa00] sm:$0xff] }
 0x17c   : > { %3076 = vmatprep.subr.bf16.mxu1 %v3075_v1  ;;  %v1344_v61 = vld [vmem:[%s4382_s16 + $0xa40] sm:$0xff]  ;;  %v1353_v1 = vld [vmem:[%s4382_s16 + $0xa88] sm:$0xff] }
 0x17d   : > { %v2969_v5 = vpack.c.bf16 %v1344_v61, %v1336_v60  ;;  %v1426_v60 = vld [vmem:[%s4382_s16 + $0xcd0] sm:$0xff]  ;;  %v1433_v61 = vld [vmem:[%s4382_s16 + $0xd08] sm:$0xff] }
 0x17e   : > { %2950 = vmatpush1.bf16.msra.mxu0 %v2949_v7  ;;  %v2971_v7 = vpack.c.bf16 %v1361_v2, %v1353_v1  ;;  %v2991_v3 = vpack.c.bf16 %v1441_v62, %v1433_v61 }
 0x17f   : > { %3078 = vmatpush1.bf16.msra.mxu1 %v3077_v8  ;;  %2952 = vmatprep.subr.bf16.mxu0 %v2951_v9  ;;  %v1352_v8 = vld [vmem:[%s4382_s16 + $0xa80] sm:$0xff] }
 0x180   : > { %3080 = vmatprep.subr.bf16.mxu1 %v3079_v13  ;;  %v1360_v9 = vld [vmem:[%s4382_s16 + $0xac0] sm:$0xff]  ;;  %v1369_v13 = vld [vmem:[%s4382_s16 + $0xb08] sm:$0xff] }
 0x181   : > { %1638 = vmatmul.mubr.f32.vlgmr.msra.gmra.mrb[4].mxu0 %v1012_v21  ;;  %v2973_v19 = vpack.c.bf16 %v1360_v9, %v1352_v8  ;;  %v1442_v8 = vld [vmem:[%s4382_s16 + $0xd50] sm:$0xff]  ;;  %v1449_v9 = vld [vmem:[%s4382_s16 + $0xd88] sm:$0xff] }
 0x182   : > { %2954 = vmatpush1.bf16.msra.mxu0 %v2953_v22  ;;  %1780 = vmatmul.mubr.f32.vlgmr.msra.gmra.mrb[4].mxu1 %v1012_v21  ;;  %v2975_v21 = vpack.c.bf16 %v1377_v14, %v1369_v13  ;;  %v1368_v22 = vld [vmem:[%s4382_s16 + $0xb00] sm:$0xff]  ;;  %v2995_v17 = vpack.c.bf16 %v1457_v10, %v1449_v9 }
 0x183   : > { %3082 = vmatpush1.bf16.msra.mxu1 %v3081_v23  ;;  %2956 = vmatprep.subr.bf16.mxu0 %v2955_v24  ;;  %v1376_v23 = vld [vmem:[%s4382_s16 + $0xb40] sm:$0xff]  ;;  %v1370_v24 = vld [vmem:[%s4382_s16 + $0xb10] sm:$0xff] }
 0x184   : > { %3084 = vmatprep.subr.bf16.mxu1 %v3083_v28  ;;  %1708 = vmatprep.mubr.f32.mxu0 %v1015_v34  ;;  %v1393_v28 = vld [vmem:[%s4382_s16 + $0xbc8] sm:$0xff]  ;;  %v2977_v31 = vpack.c.bf16 %v1376_v23, %v1368_v22  ;;  %v3105_v32 = vpack.c.bf16 %v1378_v26, %v1370_v24  ;;  %v1458_v22 = vld [vmem:[%s4382_s16 + $0xdd0] sm:$0xff]  ;;  %v1475_v26 = vld [vmem:[%s4382_s16 + $0xe58] sm:$0xff] }
 0x185   : > { %1850 = vmatprep.mubr.f32.mxu1 %v1015_v34  ;;  %v2979_v33 = vpack.c.bf16 %v1393_v28, %v1385_v27  ;;  %v1384_v34 = vld [vmem:[%s4382_s16 + $0xb80] sm:$0xff]  ;;  %v1465_v23 = vld [vmem:[%s4382_s16 + $0xe08] sm:$0xff] }
 0x186   : > { %2958 = vmatpush1.bf16.msra.mxu0 %v2957_v35  ;;  %v1392_v35 = vld [vmem:[%s4382_s16 + $0xbc0] sm:$0xff]  ;;  %v1473_v24 = vld [vmem:[%s4382_s16 + $0xe48] sm:$0xff] }
 0x187   : > { %3086 = vmatpush1.bf16.msra.mxu1 %v3085_v36  ;;  %2960 = vmatprep.subr.bf16.mxu0 %v2959_v37  ;;  %v1386_v36 = vld [vmem:[%s4382_s16 + $0xb90] sm:$0xff]  ;;  %v3107_v37 = vpack.c.bf16 %v1395_v30, %v1387_v29  ;;  %v2981_v15 = vpack.c.bf16 %v1392_v35, %v1384_v34  ;;  %v2999_v29 = vpack.c.bf16 %v1473_v24, %v1465_v23  ;;  %v1464_v30 = vld [vmem:[%s4382_s16 + $0xe00] sm:$0xff]  ;;  %v1481_v35 = vld [vmem:[%s4382_s16 + $0xe88] sm:$0xff] }
 0x188   : > { %3088 = vmatprep.subr.bf16.mxu1 %v3087_v41  ;;  %v1403_v41 = vld [vmem:[%s4382_s16 + $0xc18] sm:$0xff]  ;;  %v3109_v43 = vpack.c.bf16 %v1394_v38, %v1386_v36  ;;  %v1474_v34 = vld [vmem:[%s4382_s16 + $0xe50] sm:$0xff]  ;;  %v1489_v36 = vld [vmem:[%s4382_s16 + $0xec8] sm:$0xff] }
 0x189   : > { %v1491_v38 = vld [vmem:[%s4382_s16 + $0xed8] sm:$0xff]  ;;  %v1014_v23 = vld [vmem:[#allocation5 + $0x10] sm:$0xff] }
 0x18a   : > { %2962 = vmatpush1.bf16.msra.mxu0 %v2961_v46  ;;  %v1408_v46 = vld [vmem:[%s4382_s16 + $0xc40] sm:$0xff] }
 0x18b   : > { %3090 = vmatpush1.bf16.msra.mxu1 %v3089_v47  ;;  %2964 = vmatprep.subr.bf16.mxu0 %v2963_v48  ;;  %v1402_v47 = vld [vmem:[%s4382_s16 + $0xc10] sm:$0xff]  ;;  %v3111_v48 = vpack.c.bf16 %v1411_v42, %v1403_v41  ;;  %v2985_v53 = vpack.c.bf16 %v1408_v46, %v1400_v45  ;;  %v3003_v41 = vpack.c.bf16 %v1489_v36, %v1481_v35  ;;  %v1480_v42 = vld [vmem:[%s4382_s16 + $0xe80] sm:$0xff]  ;;  %v1497_v46 = vld [vmem:[%s4382_s16 + $0xf08] sm:$0xff] }
 0x18c   : > { %3092 = vmatprep.subr.bf16.mxu1 %v3091_v51  ;;  %v1419_v51 = vld [vmem:[%s4382_s16 + $0xc98] sm:$0xff]  ;;  %v3113_v54 = vpack.c.bf16 %v1410_v49, %v1402_v47  ;;  %v1490_v45 = vld [vmem:[%s4382_s16 + $0xed0] sm:$0xff]  ;;  %v1505_v47 = vld [vmem:[%s4382_s16 + $0xf48] sm:$0xff] }
 0x18d   : > { %v1507_v49 = vld [vmem:[%s4382_s16 + $0xf58] sm:$0xff] }
 0x18e   : > { %2966 = vmatpush1.bf16.msra.mxu0 %v2965_v57  ;;  %v1424_v57 = vld [vmem:[%s4382_s16 + $0xcc0] sm:$0xff]  ;;  %v1063_v35 = vld [vmem:[%s4382_s16 + $0x178] sm:$0xff] }
 0x18f   : > { %3094 = vmatpush1.bf16.msra.mxu1 %v3093_v58  ;;  %2968 = vmatprep.subr.bf16.mxu0 %v2967_v59  ;;  %v1418_v58 = vld [vmem:[%s4382_s16 + $0xc90] sm:$0xff]  ;;  %v3115_v59 = vpack.c.bf16 %v1427_v52, %v1419_v51  ;;  %v2989_v1 = vpack.c.bf16 %v1424_v57, %v1416_v56  ;;  %v3007_v51 = vpack.c.bf16 %v1505_v47, %v1497_v46  ;;  %v1496_v52 = vld [vmem:[%s4382_s16 + $0xf00] sm:$0xff]  ;;  %v1513_v57 = vld [vmem:[%s4382_s16 + $0xf88] sm:$0xff] }
 0x190   : > { %3096 = vmatprep.subr.bf16.mxu1 %v3095_v63  ;;  %v1435_v63 = vld [vmem:[%s4382_s16 + $0xd18] sm:$0xff]  ;;  %v3117_v2 = vpack.c.bf16 %v1426_v60, %v1418_v58  ;;  %v1506_v56 = vld [vmem:[%s4382_s16 + $0xf50] sm:$0xff]  ;;  %v1521_v58 = vld [vmem:[%s4382_s16 + $0xfc8] sm:$0xff] }
 0x191   : > { %v1523_v60 = vld [vmem:[%s4382_s16 + $0xfd8] sm:$0xff] }
 0x192   : > { %2970 = vmatpush1.bf16.msra.mxu0 %v2969_v5  ;;  %v1440_v5 = vld [vmem:[%s4382_s16 + $0xd40] sm:$0xff]  ;;  %v1071_v46 = vld [vmem:[%s4382_s16 + $0x1b8] sm:$0xff] }
 0x193   : > { %3098 = vmatpush1.bf16.msra.mxu1 %v3097_v6  ;;  %2972 = vmatprep.subr.bf16.mxu0 %v2971_v7  ;;  %v1434_v6 = vld [vmem:[%s4382_s16 + $0xd10] sm:$0xff]  ;;  %v3119_v7 = vpack.c.bf16 %v1443_v0, %v1435_v63  ;;  %v2993_v13 = vpack.c.bf16 %v1440_v5, %v1432_v4  ;;  %v3011_v63 = vpack.c.bf16 %v1521_v58, %v1513_v57  ;;  %v1512_v0 = vld [vmem:[%s4382_s16 + $0xf80] sm:$0xff]  ;;  %v1021_v5 = vld [vmem:[%s4382_s16 + $0x28] sm:$0xff] }
 0x194   : > { %3100 = vmatprep.subr.bf16.mxu1 %v3099_v11  ;;  %v1451_v11 = vld [vmem:[%s4382_s16 + $0xd98] sm:$0xff]  ;;  %v3121_v14 = vpack.c.bf16 %v1442_v8, %v1434_v6  ;;  %v1522_v4 = vld [vmem:[%s4382_s16 + $0xfd0] sm:$0xff]  ;;  %v1029_v6 = vld [vmem:[%s4382_s16 + $0x68] sm:$0xff] }
 0x195   : > { %v1031_v8 = vld [vmem:[%s4382_s16 + $0x78] sm:$0xff] }
 0x196   : > { %2974 = vmatpush1.bf16.msra.mxu0 %v2973_v19  ;;  %v1456_v19 = vld [vmem:[%s4382_s16 + $0xdc0] sm:$0xff]  ;;  %v1079_v47 = vld [vmem:[%s4382_s16 + $0x1f8] sm:$0xff] }
 0x197   : > { %3102 = vmatpush1.bf16.msra.mxu1 %v3101_v20  ;;  %2976 = vmatprep.subr.bf16.mxu0 %v2975_v21  ;;  %v1450_v20 = vld [vmem:[%s4382_s16 + $0xd90] sm:$0xff]  ;;  %v3123_v21 = vpack.c.bf16 %v1459_v12, %v1451_v11  ;;  %v2997_v27 = vpack.c.bf16 %v1456_v19, %v1448_v18  ;;  %v3143_v11 = vpack.c.bf16 %v1029_v6, %v1021_v5  ;;  %v1020_v12 = vld [vmem:[%s4382_s16 + $0x20] sm:$0xff]  ;;  %v1037_v19 = vld [vmem:[%s4382_s16 + $0xa8] sm:$0xff] }
 0x198   : > { %3104 = vmatprep.subr.bf16.mxu1 %v3103_v25  ;;  %v1467_v25 = vld [vmem:[%s4382_s16 + $0xe18] sm:$0xff]  ;;  %v3125_v28 = vpack.c.bf16 %v1458_v22, %v1450_v20  ;;  %v1030_v18 = vld [vmem:[%s4382_s16 + $0x70] sm:$0xff]  ;;  %v1045_v20 = vld [vmem:[%s4382_s16 + $0xe8] sm:$0xff] }
 0x199   : > { %v1047_v22 = vld [vmem:[%s4382_s16 + $0xf8] sm:$0xff] }
 0x19a   : > { %2978 = vmatpush1.bf16.msra.mxu0 %v2977_v31  ;;  %v1472_v31 = vld [vmem:[%s4382_s16 + $0xe40] sm:$0xff]  ;;  %v1087_v57 = vld [vmem:[%s4382_s16 + $0x238] sm:$0xff] }
 0x19b   : > { %3106 = vmatpush1.bf16.msra.mxu1 %v3105_v32  ;;  %2980 = vmatprep.subr.bf16.mxu0 %v2979_v33  ;;  %v1466_v32 = vld [vmem:[%s4382_s16 + $0xe10] sm:$0xff]  ;;  %v3127_v33 = vpack.c.bf16 %v1475_v26, %v1467_v25  ;;  %v3001_v39 = vpack.c.bf16 %v1472_v31, %v1464_v30  ;;  %v3147_v26 = vpack.c.bf16 %v1045_v20, %v1037_v19  ;;  %v1095_v58 = vld [vmem:[%s4382_s16 + $0x278] sm:$0xff] }
 0x19c   : > { %3108 = vmatprep.subr.bf16.mxu1 %v3107_v37  ;;  %v1483_v37 = vld [vmem:[%s4382_s16 + $0xe98] sm:$0xff]  ;;  %v3129_v40 = vpack.c.bf16 %v1474_v34, %v1466_v32  ;;  %v1046_v31 = vld [vmem:[%s4382_s16 + $0xf0] sm:$0xff]  ;;  %v1053_v32 = vld [vmem:[%s4382_s16 + $0x128] sm:$0xff] }
 0x19d   : > { %v1055_v34 = vld [vmem:[%s4382_s16 + $0x138] sm:$0xff] }
 0x19e   : > { %2982 = vmatpush1.bf16.msra.mxu0 %v2981_v15  ;;  %v1488_v15 = vld [vmem:[%s4382_s16 + $0xec0] sm:$0xff]  ;;  %v1103_v5 = vld [vmem:[%s4382_s16 + $0x2b8] sm:$0xff] }
 0x19f   : > { %3110 = vmatpush1.bf16.msra.mxu1 %v3109_v43  ;;  %2984 = vmatprep.subr.bf16.mxu0 %v2983_v44  ;;  %v1482_v43 = vld [vmem:[%s4382_s16 + $0xe90] sm:$0xff]  ;;  %v3131_v44 = vpack.c.bf16 %v1491_v38, %v1483_v37  ;;  %v3005_v16 = vpack.c.bf16 %v1488_v15, %v1480_v42  ;;  %v3279_v42 = vpack.c.bf16 %v1063_v35, %v1055_v34  ;;  %v1111_v6 = vld [vmem:[%s4382_s16 + $0x2f8] sm:$0xff] }
 0x1a0   : > { %3112 = vmatprep.subr.bf16.mxu1 %v3111_v48  ;;  %v1499_v48 = vld [vmem:[%s4382_s16 + $0xf18] sm:$0xff]  ;;  %v3133_v50 = vpack.c.bf16 %v1490_v45, %v1482_v43  ;;  %v1062_v15 = vld [vmem:[%s4382_s16 + $0x170] sm:$0xff]  ;;  %v1069_v43 = vld [vmem:[%s4382_s16 + $0x1a8] sm:$0xff] }
 0x1a1   : > { %v3531_v45 = vld [vmem:[#allocation5 + $0x8] sm:$0xff]  ;;  %v1119_v19 = vld [vmem:[%s4382_s16 + $0x338] sm:$0xff] }
 0x1a2   : > { %2986 = vmatpush1.bf16.msra.mxu0 %v2985_v53  ;;  %v1504_v53 = vld [vmem:[%s4382_s16 + $0xf40] sm:$0xff]  ;;  %v1127_v20 = vld [vmem:[%s4382_s16 + $0x378] sm:$0xff] }
 0x1a3   : > { %3114 = vmatpush1.bf16.msra.mxu1 %v3113_v54  ;;  %2988 = vmatprep.subr.bf16.mxu0 %v2987_v55  ;;  %v1498_v54 = vld [vmem:[%s4382_s16 + $0xf10] sm:$0xff]  ;;  %v3135_v55 = vpack.c.bf16 %v1507_v49, %v1499_v48  ;;  %v3009_v61 = vpack.c.bf16 %v1504_v53, %v1496_v52  ;;  %v3283_v53 = vpack.c.bf16 %v1079_v47, %v1071_v46  ;;  %v1135_v34 = vld [vmem:[%s4382_s16 + $0x3b8] sm:$0xff] }
 0x1a4   : > { %3116 = vmatprep.subr.bf16.mxu1 %v3115_v59  ;;  %v1515_v59 = vld [vmem:[%s4382_s16 + $0xf98] sm:$0xff]  ;;  %v3137_v62 = vpack.c.bf16 %v1506_v56, %v1498_v54  ;;  %v1070_v52 = vld [vmem:[%s4382_s16 + $0x1b0] sm:$0xff]  ;;  %v1093_v56 = vld [vmem:[%s4382_s16 + $0x268] sm:$0xff] }
 0x1a5   : > { %v1078_v54 = vld [vmem:[%s4382_s16 + $0x1f0] sm:$0xff]  ;;  %v1143_v35 = vld [vmem:[%s4382_s16 + $0x3f8] sm:$0xff] }
 0x1a6   : > { %2990 = vmatpush1.bf16.msra.mxu0 %v2989_v1  ;;  %v1520_v1 = vld [vmem:[%s4382_s16 + $0xfc0] sm:$0xff]  ;;  %v1151_v46 = vld [vmem:[%s4382_s16 + $0x438] sm:$0xff] }
 0x1a7   : > { %3118 = vmatpush1.bf16.msra.mxu1 %v3117_v2  ;;  %2992 = vmatprep.subr.bf16.mxu0 %v2991_v3  ;;  %v1514_v2 = vld [vmem:[%s4382_s16 + $0xf90] sm:$0xff]  ;;  %v3139_v3 = vpack.c.bf16 %v1523_v60, %v1515_v59  ;;  %v3013_v9 = vpack.c.bf16 %v1520_v1, %v1512_v0  ;;  %v3285_v60 = vpack.c.bf16 %v1078_v54, %v1070_v52  ;;  %v1159_v47 = vld [vmem:[%s4382_s16 + $0x478] sm:$0xff] }
 0x1a8   : > { %3120 = vmatprep.subr.bf16.mxu1 %v3119_v7  ;;  %v1023_v7 = vld [vmem:[%s4382_s16 + $0x38] sm:$0xff]  ;;  %v3141_v10 = vpack.c.bf16 %v1522_v4, %v1514_v2  ;;  %v1086_v0 = vld [vmem:[%s4382_s16 + $0x230] sm:$0xff]  ;;  %v3287_v1 = vpack.c.bf16 %v1095_v58, %v1087_v57  ;;  %v1109_v4 = vld [vmem:[%s4382_s16 + $0x2e8] sm:$0xff] }
 0x1a9   : > { %v1094_v2 = vld [vmem:[%s4382_s16 + $0x270] sm:$0xff]  ;;  %v1167_v57 = vld [vmem:[%s4382_s16 + $0x4b8] sm:$0xff] }
 0x1aa   : > { %2994 = vmatpush1.bf16.msra.mxu0 %v2993_v13  ;;  %v1028_v13 = vld [vmem:[%s4382_s16 + $0x60] sm:$0xff]  ;;  %v1150_v52 = vld [vmem:[%s4382_s16 + $0x430] sm:$0xff]  ;;  %v1175_v58 = vld [vmem:[%s4382_s16 + $0x4f8] sm:$0xff] }
 0x1ab   : > { %3122 = vmatpush1.bf16.msra.mxu1 %v3121_v14  ;;  %2996 = vmatprep.subr.bf16.mxu0 %v2995_v17  ;;  %v1022_v14 = vld [vmem:[%s4382_s16 + $0x30] sm:$0xff]  ;;  %v3271_v17 = vpack.c.bf16 %v1031_v8, %v1023_v7  ;;  %v3145_v24 = vpack.c.bf16 %v1028_v13, %v1020_v12  ;;  %v3289_v8 = vpack.c.bf16 %v1094_v2, %v1086_v0 }
 0x1ac   : > { %3124 = vmatprep.subr.bf16.mxu1 %v3123_v21  ;;  %v1039_v21 = vld [vmem:[%s4382_s16 + $0xb8] sm:$0xff]  ;;  %v3273_v25 = vpack.c.bf16 %v1030_v18, %v1022_v14  ;;  %v1102_v12 = vld [vmem:[%s4382_s16 + $0x2b0] sm:$0xff]  ;;  %v3291_v13 = vpack.c.bf16 %v1111_v6, %v1103_v5  ;;  %v1125_v18 = vld [vmem:[%s4382_s16 + $0x368] sm:$0xff] }
 0x1ad   : > { %v3275_v30 = vpack.c.bf16 %v1047_v22, %v1039_v21  ;;  %v1110_v14 = vld [vmem:[%s4382_s16 + $0x2f0] sm:$0xff]  ;;  %v1183_v5 = vld [vmem:[%s4382_s16 + $0x538] sm:$0xff] }
 0x1ae   : > { %2998 = vmatpush1.bf16.msra.mxu0 %v2997_v27  ;;  %v1036_v27 = vld [vmem:[%s4382_s16 + $0xa0] sm:$0xff]  ;;  %v3293_v22 = vpack.c.bf16 %v1110_v14, %v1102_v12  ;;  %v1158_v54 = vld [vmem:[%s4382_s16 + $0x470] sm:$0xff]  ;;  %v1191_v6 = vld [vmem:[%s4382_s16 + $0x578] sm:$0xff] }
 0x1af   : > { %3126 = vmatpush1.bf16.msra.mxu1 %v3125_v28  ;;  %3000 = vmatprep.subr.bf16.mxu0 %v2999_v29  ;;  %v1044_v28 = vld [vmem:[%s4382_s16 + $0xe0] sm:$0xff]  ;;  %v1038_v29 = vld [vmem:[%s4382_s16 + $0xb0] sm:$0xff] }
 0x1b0   : > { %3128 = vmatprep.subr.bf16.mxu1 %v3127_v33  ;;  %v1061_v33 = vld [vmem:[%s4382_s16 + $0x168] sm:$0xff]  ;;  %v3149_v36 = vpack.c.bf16 %v1044_v28, %v1036_v27  ;;  %v3277_v37 = vpack.c.bf16 %v1046_v31, %v1038_v29  ;;  %v3295_v28 = vpack.c.bf16 %v1127_v20, %v1119_v19  ;;  %v1126_v29 = vld [vmem:[%s4382_s16 + $0x370] sm:$0xff]  ;;  %v1199_v19 = vld [vmem:[%s4382_s16 + $0x5b8] sm:$0xff] }
 0x1b1   : > { %v3151_v38 = vpack.c.bf16 %v1061_v33, %v1053_v32  ;;  %v1141_v31 = vld [vmem:[%s4382_s16 + $0x3e8] sm:$0xff]  ;;  %v1166_v0 = vld [vmem:[%s4382_s16 + $0x4b0] sm:$0xff]  ;;  %v1207_v20 = vld [vmem:[%s4382_s16 + $0x5f8] sm:$0xff] }
 0x1b2   : > { %3002 = vmatpush1.bf16.msra.mxu0 %v3001_v39  ;;  %v1052_v39 = vld [vmem:[%s4382_s16 + $0x120] sm:$0xff]  ;;  %v1174_v2 = vld [vmem:[%s4382_s16 + $0x4f0] sm:$0xff] }
 0x1b3   : > { %3130 = vmatpush1.bf16.msra.mxu1 %v3129_v40  ;;  %3004 = vmatprep.subr.bf16.mxu0 %v3003_v41  ;;  %v1060_v40 = vld [vmem:[%s4382_s16 + $0x160] sm:$0xff]  ;;  %v1054_v41 = vld [vmem:[%s4382_s16 + $0x130] sm:$0xff] }
 0x1b4   : > { %3132 = vmatprep.subr.bf16.mxu1 %v3131_v44  ;;  %v1077_v44 = vld [vmem:[%s4382_s16 + $0x1e8] sm:$0xff]  ;;  %v3153_v48 = vpack.c.bf16 %v1060_v40, %v1052_v39  ;;  %v3281_v49 = vpack.c.bf16 %v1062_v15, %v1054_v41  ;;  %v1132_v40 = vld [vmem:[%s4382_s16 + $0x3a0] sm:$0xff]  ;;  %v3299_v15 = vpack.c.bf16 %v1143_v35, %v1135_v34  ;;  %v1182_v12 = vld [vmem:[%s4382_s16 + $0x530] sm:$0xff] }
 0x1b5   : > { %v1140_v41 = vld [vmem:[%s4382_s16 + $0x3e0] sm:$0xff]  ;;  %v1190_v14 = vld [vmem:[%s4382_s16 + $0x570] sm:$0xff]  ;;  %v1215_v34 = vld [vmem:[%s4382_s16 + $0x638] sm:$0xff] }
 0x1b6   : > { %3006 = vmatpush1.bf16.msra.mxu0 %v3005_v16  ;;  %v3155_v16 = vpack.c.bf16 %v1077_v44, %v1069_v43  ;;  %v1142_v43 = vld [vmem:[%s4382_s16 + $0x3f0] sm:$0xff]  ;;  %v1149_v44 = vld [vmem:[%s4382_s16 + $0x428] sm:$0xff]  ;;  %v1223_v35 = vld [vmem:[%s4382_s16 + $0x678] sm:$0xff] }
 0x1b7   : > { %3134 = vmatpush1.bf16.msra.mxu1 %v3133_v50  ;;  %3008 = vmatprep.subr.bf16.mxu0 %v3007_v51  ;;  %v1068_v50 = vld [vmem:[%s4382_s16 + $0x1a0] sm:$0xff] }
 0x1b8   : > { %3136 = vmatprep.subr.bf16.mxu1 %v3135_v55  ;;  %v1076_v51 = vld [vmem:[%s4382_s16 + $0x1e0] sm:$0xff]  ;;  %v1085_v55 = vld [vmem:[%s4382_s16 + $0x228] sm:$0xff] }
 0x1b9   : > { %v3157_v59 = vpack.c.bf16 %v1076_v51, %v1068_v50  ;;  %v1148_v50 = vld [vmem:[%s4382_s16 + $0x420] sm:$0xff] }
 0x1ba   : > { %3010 = vmatpush1.bf16.msra.mxu0 %v3009_v61  ;;  %v3159_v61 = vpack.c.bf16 %v1093_v56, %v1085_v55  ;;  %v1156_v51 = vld [vmem:[%s4382_s16 + $0x460] sm:$0xff]  ;;  %v1165_v55 = vld [vmem:[%s4382_s16 + $0x4a8] sm:$0xff] }
 0x1bb   : > { %3138 = vmatpush1.bf16.msra.mxu1 %v3137_v62  ;;  %3012 = vmatprep.subr.bf16.mxu0 %v3011_v63  ;;  %v1084_v62 = vld [vmem:[%s4382_s16 + $0x220] sm:$0xff]  ;;  %v1173_v56 = vld [vmem:[%s4382_s16 + $0x4e8] sm:$0xff] }
 0x1bc   : > { %3140 = vmatprep.subr.bf16.mxu1 %v3139_v3  ;;  %v1092_v63 = vld [vmem:[%s4382_s16 + $0x260] sm:$0xff]  ;;  %v1101_v3 = vld [vmem:[%s4382_s16 + $0x2a8] sm:$0xff] }
 0x1bd   : > { %v3161_v7 = vpack.c.bf16 %v1092_v63, %v1084_v62  ;;  %v1164_v62 = vld [vmem:[%s4382_s16 + $0x4a0] sm:$0xff] }
 0x1be   : > { %3014 = vmatpush1.bf16.msra.mxu0 %v3013_v9  ;;  %v3163_v9 = vpack.c.bf16 %v1109_v4, %v1101_v3  ;;  %v1172_v63 = vld [vmem:[%s4382_s16 + $0x4e0] sm:$0xff]  ;;  %v1181_v3 = vld [vmem:[%s4382_s16 + $0x528] sm:$0xff] }
 0x1bf   : > { %3142 = vmatpush1.bf16.msra.mxu1 %v3141_v10  ;;  %3144 = vmatprep.subr.bf16.mxu0 %v3143_v11  ;;  %v1100_v10 = vld [vmem:[%s4382_s16 + $0x2a0] sm:$0xff]  ;;  %v1189_v4 = vld [vmem:[%s4382_s16 + $0x568] sm:$0xff] }
 0x1c0   : > { %3272 = vmatprep.subr.bf16.mxu1 %v3271_v17  ;;  %v1108_v11 = vld [vmem:[%s4382_s16 + $0x2e0] sm:$0xff]  ;;  %v1117_v17 = vld [vmem:[%s4382_s16 + $0x328] sm:$0xff] }
 0x1c1   : > { %1709 = vmatmul.mubr.f32.vlgmr.msra.gmra.mrb[4].mxu0 %v1014_v23  ;;  %v3165_v21 = vpack.c.bf16 %v1108_v11, %v1100_v10  ;;  %v1180_v10 = vld [vmem:[%s4382_s16 + $0x520] sm:$0xff] }
 0x1c2   : > { %1851 = vmatmul.mubr.f32.vlgmr.msra.gmra.mrb[4].mxu1 %v1014_v23  ;;  %3146 = vmatpush1.bf16.msra.mxu0 %v3145_v24  ;;  %v3167_v23 = vpack.c.bf16 %v1125_v18, %v1117_v17  ;;  %v1116_v24 = vld [vmem:[%s4382_s16 + $0x320] sm:$0xff]  ;;  %v1197_v17 = vld [vmem:[%s4382_s16 + $0x5a8] sm:$0xff] }
 0x1c3   : > { %3274 = vmatpush1.bf16.msra.mxu1 %v3273_v25  ;;  %3148 = vmatprep.subr.bf16.mxu0 %v3147_v26  ;;  %v1124_v25 = vld [vmem:[%s4382_s16 + $0x360] sm:$0xff]  ;;  %v1118_v26 = vld [vmem:[%s4382_s16 + $0x330] sm:$0xff]  ;;  %v1205_v18 = vld [vmem:[%s4382_s16 + $0x5e8] sm:$0xff] }
 0x1c4   : > { %3276 = vmatprep.subr.bf16.mxu1 %v3275_v30  ;;  %1921 = vmatprep.mubr.f32.mxu0 %v3531_v45  ;;  %v1133_v30 = vld [vmem:[%s4382_s16 + $0x3a8] sm:$0xff]  ;;  %v1188_v11 = vld [vmem:[%s4382_s16 + $0x560] sm:$0xff] }
 0x1c5   : > { %2063 = vmatprep.mubr.f32.mxu1 %v3531_v45  ;;  %v3171_v39 = vpack.c.bf16 %v1141_v31, %v1133_v30  ;;  %v1157_v45 = vld [vmem:[%s4382_s16 + $0x468] sm:$0xff] }
 0x1c6   : > { %3150 = vmatpush1.bf16.msra.mxu0 %v3149_v36  ;;  %v1213_v30 = vld [vmem:[%s4382_s16 + $0x628] sm:$0xff] }
 0x1c7   : > { %3278 = vmatpush1.bf16.msra.mxu1 %v3277_v37  ;;  %3152 = vmatprep.subr.bf16.mxu0 %v3151_v38  ;;  %v3169_v37 = vpack.c.bf16 %v1124_v25, %v1116_v24  ;;  %v3297_v38 = vpack.c.bf16 %v1126_v29, %v1118_v26  ;;  %v1196_v24 = vld [vmem:[%s4382_s16 + $0x5a0] sm:$0xff]  ;;  %v1198_v26 = vld [vmem:[%s4382_s16 + $0x5b0] sm:$0xff]  ;;  %v1221_v31 = vld [vmem:[%s4382_s16 + $0x668] sm:$0xff] }
 0x1c8   : > { %3280 = vmatprep.subr.bf16.mxu1 %v3279_v42  ;;  %v1134_v42 = vld [vmem:[%s4382_s16 + $0x3b0] sm:$0xff]  ;;  %v1204_v25 = vld [vmem:[%s4382_s16 + $0x5e0] sm:$0xff] }
 0x1c9   : > { %v1206_v29 = vld [vmem:[%s4382_s16 + $0x5f0] sm:$0xff] }
 0x1ca   : > { %3154 = vmatpush1.bf16.msra.mxu0 %v3153_v48  ;;  %v3173_v48 = vpack.c.bf16 %v1140_v41, %v1132_v40  ;;  %v1212_v40 = vld [vmem:[%s4382_s16 + $0x620] sm:$0xff] }
 0x1cb   : > { %3282 = vmatpush1.bf16.msra.mxu1 %v3281_v49  ;;  %3156 = vmatprep.subr.bf16.mxu0 %v3155_v16  ;;  %v3301_v49 = vpack.c.bf16 %v1142_v43, %v1134_v42  ;;  %v3175_v16 = vpack.c.bf16 %v1157_v45, %v1149_v44  ;;  %v1220_v41 = vld [vmem:[%s4382_s16 + $0x660] sm:$0xff]  ;;  %v1214_v42 = vld [vmem:[%s4382_s16 + $0x630] sm:$0xff]  ;;  %v1229_v44 = vld [vmem:[%s4382_s16 + $0x6a8] sm:$0xff] }
 0x1cc   : > { %3284 = vmatprep.subr.bf16.mxu1 %v3283_v53  ;;  %v3303_v53 = vpack.c.bf16 %v1159_v47, %v1151_v46  ;;  %v1222_v43 = vld [vmem:[%s4382_s16 + $0x670] sm:$0xff]  ;;  %v1237_v45 = vld [vmem:[%s4382_s16 + $0x6e8] sm:$0xff]  ;;  %v1231_v46 = vld [vmem:[%s4382_s16 + $0x6b8] sm:$0xff] }
 0x1cd   : > { %v1239_v47 = vld [vmem:[%s4382_s16 + $0x6f8] sm:$0xff] }
 0x1ce   : > { %3158 = vmatpush1.bf16.msra.mxu0 %v3157_v59  ;;  %v3177_v59 = vpack.c.bf16 %v1156_v51, %v1148_v50  ;;  %v1228_v50 = vld [vmem:[%s4382_s16 + $0x6a0] sm:$0xff] }
 0x1cf   : > { %3286 = vmatpush1.bf16.msra.mxu1 %v3285_v60  ;;  %3160 = vmatprep.subr.bf16.mxu0 %v3159_v61  ;;  %v3305_v60 = vpack.c.bf16 %v1158_v54, %v1150_v52  ;;  %v3179_v61 = vpack.c.bf16 %v1173_v56, %v1165_v55  ;;  %v1236_v51 = vld [vmem:[%s4382_s16 + $0x6e0] sm:$0xff]  ;;  %v1230_v52 = vld [vmem:[%s4382_s16 + $0x6b0] sm:$0xff]  ;;  %v1245_v55 = vld [vmem:[%s4382_s16 + $0x728] sm:$0xff] }
 0x1d0   : > { %3288 = vmatprep.subr.bf16.mxu1 %v3287_v1  ;;  %v3307_v1 = vpack.c.bf16 %v1175_v58, %v1167_v57  ;;  %v1238_v54 = vld [vmem:[%s4382_s16 + $0x6f0] sm:$0xff]  ;;  %v1253_v56 = vld [vmem:[%s4382_s16 + $0x768] sm:$0xff]  ;;  %v1247_v57 = vld [vmem:[%s4382_s16 + $0x738] sm:$0xff] }
 0x1d1   : > { %v1255_v58 = vld [vmem:[%s4382_s16 + $0x778] sm:$0xff] }
 0x1d2   : > { %3162 = vmatpush1.bf16.msra.mxu0 %v3161_v7  ;;  %v3181_v7 = vpack.c.bf16 %v1172_v63, %v1164_v62  ;;  %v1244_v62 = vld [vmem:[%s4382_s16 + $0x720] sm:$0xff] }
 0x1d3   : > { %3290 = vmatpush1.bf16.msra.mxu1 %v3289_v8  ;;  %3164 = vmatprep.subr.bf16.mxu0 %v3163_v9  ;;  %v3309_v8 = vpack.c.bf16 %v1174_v2, %v1166_v0  ;;  %v3183_v9 = vpack.c.bf16 %v1189_v4, %v1181_v3  ;;  %v1252_v63 = vld [vmem:[%s4382_s16 + $0x760] sm:$0xff]  ;;  %v1246_v0 = vld [vmem:[%s4382_s16 + $0x730] sm:$0xff]  ;;  %v1261_v3 = vld [vmem:[%s4382_s16 + $0x7a8] sm:$0xff] }
 0x1d4   : > { %v4697_v27 = vpop.f32.mrb[0].mxu0  ;;  %3292 = vmatprep.subr.bf16.mxu1 %v3291_v13  ;;  %v3311_v13 = vpack.c.bf16 %v1191_v6, %v1183_v5  ;;  %v1254_v2 = vld [vmem:[%s4382_s16 + $0x770] sm:$0xff]  ;;  %v1269_v4 = vld [vmem:[%s4382_s16 + $0x7e8] sm:$0xff]  ;;  %v1263_v5 = vld [vmem:[%s4382_s16 + $0x7b8] sm:$0xff] }
 0x1d5   : > { %v4702_v32 = vpop.f32.mrb[1].mxu0  ;;  %v4704_v33 = vpop.f32.mrb[0].mxu1  ;;  %v1271_v6 = vld [vmem:[%s4382_s16 + $0x7f8] sm:$0xff] }
 0x1d6   : > { %3166 = vmatpush1.bf16.msra.mxu0 %v3165_v21  ;;  %v4708_v36 = vpop.f32.mrb[1].mxu1  ;;  %v3185_v21 = vpack.c.bf16 %v1188_v11, %v1180_v10  ;;  %v1260_v10 = vld [vmem:[%s4382_s16 + $0x7a0] sm:$0xff] }
 0x1d7   : > { %3294 = vmatpush1.bf16.msra.mxu1 %v3293_v22  ;;  %3168 = vmatprep.subr.bf16.mxu0 %v3167_v23  ;;  %v3313_v22 = vpack.c.bf16 %v1190_v14, %v1182_v12  ;;  %v3187_v23 = vpack.c.bf16 %v1205_v18, %v1197_v17  ;;  %v1268_v11 = vld [vmem:[%s4382_s16 + $0x7e0] sm:$0xff]  ;;  %v1262_v12 = vld [vmem:[%s4382_s16 + $0x7b0] sm:$0xff]  ;;  %v1277_v17 = vld [vmem:[%s4382_s16 + $0x828] sm:$0xff] }
 0x1d8   : > { %3296 = vmatprep.subr.bf16.mxu1 %v3295_v28  ;;  %v3315_v28 = vpack.c.bf16 %v1207_v20, %v1199_v19  ;;  %v1270_v14 = vld [vmem:[%s4382_s16 + $0x7f0] sm:$0xff]  ;;  %v1285_v18 = vld [vmem:[%s4382_s16 + $0x868] sm:$0xff]  ;;  %v1279_v19 = vld [vmem:[%s4382_s16 + $0x838] sm:$0xff] }
 0x1d9   : > { %v1287_v20 = vld [vmem:[%s4382_s16 + $0x878] sm:$0xff] }
 0x1da   : > { %3170 = vmatpush1.bf16.msra.mxu0 %v3169_v37  ;;  %v3189_v37 = vpack.c.bf16 %v1204_v25, %v1196_v24  ;;  %v1276_v24 = vld [vmem:[%s4382_s16 + $0x820] sm:$0xff] }
 0x1db   : > { %3298 = vmatpush1.bf16.msra.mxu1 %v3297_v38  ;;  %3172 = vmatprep.subr.bf16.mxu0 %v3171_v39  ;;  %v3317_v38 = vpack.c.bf16 %v1206_v29, %v1198_v26  ;;  %v3191_v39 = vpack.c.bf16 %v1221_v31, %v1213_v30  ;;  %v1284_v25 = vld [vmem:[%s4382_s16 + $0x860] sm:$0xff]  ;;  %v1278_v26 = vld [vmem:[%s4382_s16 + $0x830] sm:$0xff]  ;;  %v1293_v30 = vld [vmem:[%s4382_s16 + $0x8a8] sm:$0xff] }
 0x1dc   : > { %3300 = vmatprep.subr.bf16.mxu1 %v3299_v15  ;;  %v3319_v15 = vpack.c.bf16 %v1223_v35, %v1215_v34  ;;  %v1286_v29 = vld [vmem:[%s4382_s16 + $0x870] sm:$0xff]  ;;  %v1301_v31 = vld [vmem:[%s4382_s16 + $0x8e8] sm:$0xff]  ;;  %v1295_v34 = vld [vmem:[%s4382_s16 + $0x8b8] sm:$0xff] }
 0x1dd   : > { %v1303_v35 = vld [vmem:[%s4382_s16 + $0x8f8] sm:$0xff] }
 0x1de   : > { %3174 = vmatpush1.bf16.msra.mxu0 %v3173_v48  ;;  %v3193_v48 = vpack.c.bf16 %v1220_v41, %v1212_v40  ;;  %v1292_v40 = vld [vmem:[%s4382_s16 + $0x8a0] sm:$0xff] }
 0x1df   : > { %3302 = vmatpush1.bf16.msra.mxu1 %v3301_v49  ;;  %3176 = vmatprep.subr.bf16.mxu0 %v3175_v16  ;;  %v3321_v49 = vpack.c.bf16 %v1222_v43, %v1214_v42  ;;  %v3195_v16 = vpack.c.bf16 %v1237_v45, %v1229_v44  ;;  %v1300_v41 = vld [vmem:[%s4382_s16 + $0x8e0] sm:$0xff]  ;;  %v1294_v42 = vld [vmem:[%s4382_s16 + $0x8b0] sm:$0xff]  ;;  %v1309_v44 = vld [vmem:[%s4382_s16 + $0x928] sm:$0xff] }
 0x1e0   : > { %3304 = vmatprep.subr.bf16.mxu1 %v3303_v53  ;;  %v3323_v53 = vpack.c.bf16 %v1239_v47, %v1231_v46  ;;  %v1302_v43 = vld [vmem:[%s4382_s16 + $0x8f0] sm:$0xff]  ;;  %v1317_v45 = vld [vmem:[%s4382_s16 + $0x968] sm:$0xff]  ;;  %v3532_v46 = vld [vmem:[#allocation5] sm:$0xff] }
 0x1e1   : > { %v1311_v47 = vld [vmem:[%s4382_s16 + $0x938] sm:$0xff] }
 0x1e2   : > { %3178 = vmatpush1.bf16.msra.mxu0 %v3177_v59  ;;  %v3197_v59 = vpack.c.bf16 %v1236_v51, %v1228_v50  ;;  %v3215_v50 = vpack.c.bf16 %v1317_v45, %v1309_v44  ;;  %v1308_v51 = vld [vmem:[%s4382_s16 + $0x920] sm:$0xff] }
 0x1e3   : > { %3306 = vmatpush1.bf16.msra.mxu1 %v3305_v60  ;;  %3180 = vmatprep.subr.bf16.mxu0 %v3179_v61  ;;  %v3325_v60 = vpack.c.bf16 %v1238_v54, %v1230_v52  ;;  %v3199_v61 = vpack.c.bf16 %v1253_v56, %v1245_v55  ;;  %v1316_v52 = vld [vmem:[%s4382_s16 + $0x960] sm:$0xff]  ;;  %v1318_v55 = vld [vmem:[%s4382_s16 + $0x970] sm:$0xff]  ;;  %v1325_v56 = vld [vmem:[%s4382_s16 + $0x9a8] sm:$0xff] }
 0x1e4   : > { %3308 = vmatprep.subr.bf16.mxu1 %v3307_v1  ;;  %v3327_v1 = vpack.c.bf16 %v1255_v58, %v1247_v57  ;;  %v1333_v57 = vld [vmem:[%s4382_s16 + $0x9e8] sm:$0xff]  ;;  %v3533_v58 = vld [vmem:[#allocation5 + $0x18] sm:$0xff] }
 0x1e6   : > { %3182 = vmatpush1.bf16.msra.mxu0 %v3181_v7  ;;  %v3201_v7 = vpack.c.bf16 %v1252_v63, %v1244_v62  ;;  %v3219_v63 = vpack.c.bf16 %v1333_v57, %v1325_v56  ;;  %v1388_v56 = vld [vmem:[%s4382_s16 + $0xba0] sm:$0xff] }
 0x1e7   : > { %3310 = vmatpush1.bf16.msra.mxu1 %v3309_v8  ;;  %3184 = vmatprep.subr.bf16.mxu0 %v3183_v9  ;;  %v3329_v8 = vpack.c.bf16 %v1254_v2, %v1246_v0  ;;  %v3203_v9 = vpack.c.bf16 %v1269_v4, %v1261_v3  ;;  %v1324_v0 = vld [vmem:[%s4382_s16 + $0x9a0] sm:$0xff]  ;;  %v1326_v2 = vld [vmem:[%s4382_s16 + $0x9b0] sm:$0xff] }
 0x1e8   : > { %3312 = vmatprep.subr.bf16.mxu1 %v3311_v13  ;;  %v3331_v13 = vpack.c.bf16 %v1271_v6, %v1263_v5  ;;  %v1334_v4 = vld [vmem:[%s4382_s16 + $0x9f0] sm:$0xff]  ;;  %v1341_v5 = vld [vmem:[%s4382_s16 + $0xa28] sm:$0xff]  ;;  %v1396_v57 = vld [vmem:[%s4382_s16 + $0xbe0] sm:$0xff] }
 0x1e9   : > { %v1349_v6 = vld [vmem:[%s4382_s16 + $0xa68] sm:$0xff] }
 0x1ea   : > { %3186 = vmatpush1.bf16.msra.mxu0 %v3185_v21  ;;  %v3205_v21 = vpack.c.bf16 %v1268_v11, %v1260_v10  ;;  %v3349_v10 = vpack.c.bf16 %v1334_v4, %v1326_v2  ;;  %v3223_v11 = vpack.c.bf16 %v1349_v6, %v1341_v5  ;;  %v1404_v4 = vld [vmem:[%s4382_s16 + $0xc20] sm:$0xff]  ;;  %v1406_v6 = vld [vmem:[%s4382_s16 + $0xc30] sm:$0xff] }
 0x1eb   : > { %3314 = vmatpush1.bf16.msra.mxu1 %v3313_v22  ;;  %3188 = vmatprep.subr.bf16.mxu0 %v3187_v23  ;;  %v3333_v22 = vpack.c.bf16 %v1270_v14, %v1262_v12  ;;  %v3207_v23 = vpack.c.bf16 %v1285_v18, %v1277_v17  ;;  %v1340_v12 = vld [vmem:[%s4382_s16 + $0xa20] sm:$0xff]  ;;  %v1342_v14 = vld [vmem:[%s4382_s16 + $0xa30] sm:$0xff] }
 0x1ec   : > { %3316 = vmatprep.subr.bf16.mxu1 %v3315_v28  ;;  %v3335_v28 = vpack.c.bf16 %v1287_v20, %v1279_v19  ;;  %v1350_v18 = vld [vmem:[%s4382_s16 + $0xa70] sm:$0xff]  ;;  %v1357_v19 = vld [vmem:[%s4382_s16 + $0xaa8] sm:$0xff]  ;;  %v1412_v5 = vld [vmem:[%s4382_s16 + $0xc60] sm:$0xff] }
 0x1ed   : > { %v1365_v20 = vld [vmem:[%s4382_s16 + $0xae8] sm:$0xff] }
 0x1ee   : > { %3190 = vmatpush1.bf16.msra.mxu0 %v3189_v37  ;;  %v3209_v37 = vpack.c.bf16 %v1284_v25, %v1276_v24  ;;  %v3353_v24 = vpack.c.bf16 %v1350_v18, %v1342_v14  ;;  %v3227_v25 = vpack.c.bf16 %v1365_v20, %v1357_v19  ;;  %v1420_v18 = vld [vmem:[%s4382_s16 + $0xca0] sm:$0xff]  ;;  %v1422_v20 = vld [vmem:[%s4382_s16 + $0xcb0] sm:$0xff] }
 0x1ef   : > { %3318 = vmatpush1.bf16.msra.mxu1 %v3317_v38  ;;  %3192 = vmatprep.subr.bf16.mxu0 %v3191_v39  ;;  %v3337_v38 = vpack.c.bf16 %v1286_v29, %v1278_v26  ;;  %v3211_v39 = vpack.c.bf16 %v1301_v31, %v1293_v30  ;;  %v1356_v26 = vld [vmem:[%s4382_s16 + $0xaa0] sm:$0xff]  ;;  %v1358_v29 = vld [vmem:[%s4382_s16 + $0xab0] sm:$0xff] }
 0x1f0   : > { %3320 = vmatprep.subr.bf16.mxu1 %v3319_v15  ;;  %v3339_v15 = vpack.c.bf16 %v1303_v35, %v1295_v34  ;;  %v1366_v31 = vld [vmem:[%s4382_s16 + $0xaf0] sm:$0xff]  ;;  %v1373_v34 = vld [vmem:[%s4382_s16 + $0xb28] sm:$0xff]  ;;  %v1428_v19 = vld [vmem:[%s4382_s16 + $0xce0] sm:$0xff] }
 0x1f1   : > { %v1381_v35 = vld [vmem:[%s4382_s16 + $0xb68] sm:$0xff] }
 0x1f2   : > { %3194 = vmatpush1.bf16.msra.mxu0 %v3193_v48  ;;  %v1319_v48 = vld [vmem:[%s4382_s16 + $0x978] sm:$0xff] }
 0x1f3   : > { %3322 = vmatpush1.bf16.msra.mxu1 %v3321_v49  ;;  %3196 = vmatprep.subr.bf16.mxu0 %v3195_v16  ;;  %v3213_v49 = vpack.c.bf16 %v1300_v41, %v1292_v40  ;;  %v3341_v16 = vpack.c.bf16 %v1302_v43, %v1294_v42  ;;  %v3343_v54 = vpack.c.bf16 %v1319_v48, %v1311_v47  ;;  %v1372_v42 = vld [vmem:[%s4382_s16 + $0xb20] sm:$0xff]  ;;  %v1374_v43 = vld [vmem:[%s4382_s16 + $0xb30] sm:$0xff]  ;;  %v1389_v47 = vld [vmem:[%s4382_s16 + $0xba8] sm:$0xff] }
 0x1f4   : > { %3324 = vmatprep.subr.bf16.mxu1 %v3323_v53  ;;  %v1310_v53 = vld [vmem:[%s4382_s16 + $0x930] sm:$0xff]  ;;  %v3357_v40 = vpack.c.bf16 %v1366_v31, %v1358_v29  ;;  %v3231_v41 = vpack.c.bf16 %v1381_v35, %v1373_v34  ;;  %v1397_v48 = vld [vmem:[%s4382_s16 + $0xbe8] sm:$0xff]  ;;  %v1436_v31 = vld [vmem:[%s4382_s16 + $0xd20] sm:$0xff] }
 0x1f5   : > { %v3345_v62 = vpack.c.bf16 %v1318_v55, %v1310_v53  ;;  %v3235_v55 = vpack.c.bf16 %v1397_v48, %v1389_v47  ;;  %v1444_v34 = vld [vmem:[%s4382_s16 + $0xd60] sm:$0xff]  ;;  %v1438_v35 = vld [vmem:[%s4382_s16 + $0xd30] sm:$0xff] }
 0x1f6   : > { %3198 = vmatpush1.bf16.msra.mxu0 %v3197_v59  ;;  %v1327_v59 = vld [vmem:[%s4382_s16 + $0x9b8] sm:$0xff]  ;;  %v1460_v47 = vld [vmem:[%s4382_s16 + $0xde0] sm:$0xff]  ;;  %v1454_v48 = vld [vmem:[%s4382_s16 + $0xdb0] sm:$0xff] }
 0x1f7   : > { %3326 = vmatpush1.bf16.msra.mxu1 %v3325_v60  ;;  %3200 = vmatprep.subr.bf16.mxu0 %v3199_v61  ;;  %v1335_v60 = vld [vmem:[%s4382_s16 + $0x9f8] sm:$0xff]  ;;  %v3217_v61 = vpack.c.bf16 %v1316_v52, %v1308_v51 }
 0x1f8   : > { %3328 = vmatprep.subr.bf16.mxu1 %v3327_v1  ;;  %v1332_v1 = vld [vmem:[%s4382_s16 + $0x9e0] sm:$0xff]  ;;  %v3347_v3 = vpack.c.bf16 %v1335_v60, %v1327_v59  ;;  %v1399_v51 = vld [vmem:[%s4382_s16 + $0xbf8] sm:$0xff]  ;;  %v1398_v60 = vld [vmem:[%s4382_s16 + $0xbf0] sm:$0xff] }
 0x1fa   : > { %3202 = vmatpush1.bf16.msra.mxu0 %v3201_v7  ;;  %v1343_v7 = vld [vmem:[%s4382_s16 + $0xa38] sm:$0xff] }
 0x1fb   : > { %3330 = vmatpush1.bf16.msra.mxu1 %v3329_v8  ;;  %3204 = vmatprep.subr.bf16.mxu0 %v3203_v9  ;;  %v1351_v8 = vld [vmem:[%s4382_s16 + $0xa78] sm:$0xff]  ;;  %v3221_v9 = vpack.c.bf16 %v1332_v1, %v1324_v0  ;;  %v3237_v1 = vpack.c.bf16 %v1396_v57, %v1388_v56 }
 0x1fc   : > { %3332 = vmatprep.subr.bf16.mxu1 %v3331_v13  ;;  %v1348_v13 = vld [vmem:[%s4382_s16 + $0xa60] sm:$0xff]  ;;  %v3351_v17 = vpack.c.bf16 %v1351_v8, %v1343_v7  ;;  %v1415_v0 = vld [vmem:[%s4382_s16 + $0xc78] sm:$0xff]  ;;  %v1414_v8 = vld [vmem:[%s4382_s16 + $0xc70] sm:$0xff] }
 0x1fd   : > { %v3369_v14 = vpack.c.bf16 %v1414_v8, %v1406_v6  ;;  %v1479_v56 = vld [vmem:[%s4382_s16 + $0xe78] sm:$0xff]  ;;  %v1484_v8 = vld [vmem:[%s4382_s16 + $0xea0] sm:$0xff] }
 0x1fe   : > { %3206 = vmatpush1.bf16.msra.mxu0 %v3205_v21  ;;  %v1359_v21 = vld [vmem:[%s4382_s16 + $0xab8] sm:$0xff] }
 0x1ff   : > { %3334 = vmatpush1.bf16.msra.mxu1 %v3333_v22  ;;  %3208 = vmatprep.subr.bf16.mxu0 %v3207_v23  ;;  %v1367_v22 = vld [vmem:[%s4382_s16 + $0xaf8] sm:$0xff]  ;;  %v3225_v23 = vpack.c.bf16 %v1348_v13, %v1340_v12  ;;  %v3241_v13 = vpack.c.bf16 %v1412_v5, %v1404_v4 }
 0x200   : > { %3336 = vmatprep.subr.bf16.mxu1 %v3335_v28  ;;  %v1364_v28 = vld [vmem:[%s4382_s16 + $0xae0] sm:$0xff]  ;;  %v3355_v30 = vpack.c.bf16 %v1367_v22, %v1359_v21  ;;  %v1431_v12 = vld [vmem:[%s4382_s16 + $0xcf8] sm:$0xff]  ;;  %v1430_v22 = vld [vmem:[%s4382_s16 + $0xcf0] sm:$0xff] }
 0x201   : > { %1922 = vmatmul.mubr.f32.vlgmr.msra.gmra.mrb[6].mxu0 %v3532_v46  ;;  %v3373_v29 = vpack.c.bf16 %v1430_v22, %v1422_v20  ;;  %v1495_v4 = vld [vmem:[%s4382_s16 + $0xef8] sm:$0xff]  ;;  %v1500_v22 = vld [vmem:[%s4382_s16 + $0xf20] sm:$0xff] }
 0x202   : > { %3210 = vmatpush1.bf16.msra.mxu0 %v3209_v37  ;;  %2064 = vmatmul.mubr.f32.vlgmr.msra.gmra.mrb[6].mxu1 %v3532_v46  ;;  %v1375_v37 = vld [vmem:[%s4382_s16 + $0xb38] sm:$0xff]  ;;  %v1382_v46 = vld [vmem:[%s4382_s16 + $0xb70] sm:$0xff] }
 0x203   : > { %3338 = vmatpush1.bf16.msra.mxu1 %v3337_v38  ;;  %3212 = vmatprep.subr.bf16.mxu0 %v3211_v39  ;;  %v1383_v38 = vld [vmem:[%s4382_s16 + $0xb78] sm:$0xff]  ;;  %v3229_v39 = vpack.c.bf16 %v1364_v28, %v1356_v26  ;;  %v3245_v28 = vpack.c.bf16 %v1428_v19, %v1420_v18 }
 0x204   : > { %3340 = vmatprep.subr.bf16.mxu1 %v3339_v15  ;;  %1992 = vmatprep.mubr.f32.mxu0 %v3533_v58  ;;  %v1380_v15 = vld [vmem:[%s4382_s16 + $0xb60] sm:$0xff]  ;;  %v3359_v45 = vpack.c.bf16 %v1383_v38, %v1375_v37  ;;  %v1447_v26 = vld [vmem:[%s4382_s16 + $0xd78] sm:$0xff]  ;;  %v1446_v38 = vld [vmem:[%s4382_s16 + $0xd70] sm:$0xff] }
 0x205   : > { %2134 = vmatprep.mubr.f32.mxu1 %v3533_v58  ;;  %v3233_v53 = vpack.c.bf16 %v1380_v15, %v1372_v42  ;;  %v1390_v58 = vld [vmem:[%s4382_s16 + $0xbb0] sm:$0xff]  ;;  %v1463_v42 = vld [vmem:[%s4382_s16 + $0xdf8] sm:$0xff]  ;;  %v3249_v15 = vpack.c.bf16 %v1444_v34, %v1436_v31 }
 0x206   : > { %3214 = vmatpush1.bf16.msra.mxu0 %v3213_v49  ;;  %v3365_v2 = vpack.c.bf16 %v1398_v60, %v1390_v58  ;;  %v1468_v60 = vld [vmem:[%s4382_s16 + $0xe20] sm:$0xff]  ;;  %v1511_v18 = vld [vmem:[%s4382_s16 + $0xf78] sm:$0xff] }
 0x207   : > { %3342 = vmatpush1.bf16.msra.mxu1 %v3341_v16  ;;  %3216 = vmatprep.subr.bf16.mxu0 %v3215_v50  ;;  %v1391_v50 = vld [vmem:[%s4382_s16 + $0xbb8] sm:$0xff] }
 0x208   : > { %3344 = vmatprep.subr.bf16.mxu1 %v3343_v54  ;;  %v3361_v54 = vpack.c.bf16 %v1382_v46, %v1374_v43  ;;  %v3363_v59 = vpack.c.bf16 %v1399_v51, %v1391_v50  ;;  %v3377_v43 = vpack.c.bf16 %v1446_v38, %v1438_v35  ;;  %v1452_v46 = vld [vmem:[%s4382_s16 + $0xda0] sm:$0xff]  ;;  %v1462_v51 = vld [vmem:[%s4382_s16 + $0xdf0] sm:$0xff]  ;;  %v1527_v31 = vld [vmem:[%s4382_s16 + $0xff8] sm:$0xff] }
 0x209   : > { %v3253_v57 = vpack.c.bf16 %v1460_v47, %v1452_v46  ;;  %v3381_v58 = vpack.c.bf16 %v1462_v51, %v1454_v48  ;;  %v1516_v38 = vld [vmem:[%s4382_s16 + $0xfa0] sm:$0xff]  ;;  %v688_v46 = vlaneseq }
 0x20a   : > { %3218 = vmatpush1.bf16.msra.mxu0 %v3217_v61  ;;  %v1405_v61 = vld [vmem:[%s4382_s16 + $0xc28] sm:$0xff] }
 0x20b   : > { %3346 = vmatpush1.bf16.msra.mxu1 %v3345_v62  ;;  %3220 = vmatprep.subr.bf16.mxu0 %v3219_v63  ;;  %v1413_v62 = vld [vmem:[%s4382_s16 + $0xc68] sm:$0xff]  ;;  %v1407_v63 = vld [vmem:[%s4382_s16 + $0xc38] sm:$0xff]  ;;  %v4919_v47 = vshrl.u32 %v688_v46, 7 }
 0x20c   : > { %3348 = vmatprep.subr.bf16.mxu1 %v3347_v3  ;;  %v3239_v3 = vpack.c.bf16 %v1413_v62, %v1405_v61  ;;  %v3367_v7 = vpack.c.bf16 %v1415_v0, %v1407_v63  ;;  %v1476_v61 = vld [vmem:[%s4382_s16 + $0xe60] sm:$0xff]  ;;  %v1470_v62 = vld [vmem:[%s4382_s16 + $0xe30] sm:$0xff] }
 0x20d   : > { %v1478_v0 = vld [vmem:[%s4382_s16 + $0xe70] sm:$0xff]  ;;  %v3257_v5 = vpack.c.bf16 %v1476_v61, %v1468_v60  ;;  %v690_v51 = vsub.s32 0, %v4919_v47 }
 0x20e   : > { %3222 = vmatpush1.bf16.msra.mxu0 %v3221_v9  ;;  %v1421_v9 = vld [vmem:[%s4382_s16 + $0xca8] sm:$0xff]  ;;  %v3385_v6 = vpack.c.bf16 %v1478_v0, %v1470_v62 }
 0x20f   : > { %3350 = vmatpush1.bf16.msra.mxu1 %v3349_v10  ;;  %3224 = vmatprep.subr.bf16.mxu0 %v3223_v11  ;;  %v1429_v10 = vld [vmem:[%s4382_s16 + $0xce8] sm:$0xff]  ;;  %v1423_v11 = vld [vmem:[%s4382_s16 + $0xcb8] sm:$0xff] }
 0x210   : > { %3352 = vmatprep.subr.bf16.mxu1 %v3351_v17  ;;  %v3243_v17 = vpack.c.bf16 %v1429_v10, %v1421_v9  ;;  %v3371_v21 = vpack.c.bf16 %v1431_v12, %v1423_v11  ;;  %v1492_v9 = vld [vmem:[%s4382_s16 + $0xee0] sm:$0xff]  ;;  %v1486_v10 = vld [vmem:[%s4382_s16 + $0xeb0] sm:$0xff] }
 0x211   : > { %v1494_v12 = vld [vmem:[%s4382_s16 + $0xef0] sm:$0xff]  ;;  %v3261_v19 = vpack.c.bf16 %v1492_v9, %v1484_v8 }
 0x212   : > { %3226 = vmatpush1.bf16.msra.mxu0 %v3225_v23  ;;  %v1437_v23 = vld [vmem:[%s4382_s16 + $0xd28] sm:$0xff]  ;;  %v3389_v20 = vpack.c.bf16 %v1494_v12, %v1486_v10 }
 0x213   : > { %3354 = vmatpush1.bf16.msra.mxu1 %v3353_v24  ;;  %3228 = vmatprep.subr.bf16.mxu0 %v3227_v25  ;;  %v1445_v24 = vld [vmem:[%s4382_s16 + $0xd68] sm:$0xff]  ;;  %v1439_v25 = vld [vmem:[%s4382_s16 + $0xd38] sm:$0xff] }
 0x214   : > { %v4833_v44 = vpop.f32.mrb[2].mxu0  ;;  %3356 = vmatprep.subr.bf16.mxu1 %v3355_v30  ;;  %v3247_v30 = vpack.c.bf16 %v1445_v24, %v1437_v23  ;;  %v3375_v37 = vpack.c.bf16 %v1447_v26, %v1439_v25  ;;  %v1508_v23 = vld [vmem:[%s4382_s16 + $0xf60] sm:$0xff]  ;;  %v1502_v24 = vld [vmem:[%s4382_s16 + $0xf30] sm:$0xff] }
 0x215   : > { %v4838_v49 = vpop.f32.mrb[3].mxu0  ;;  %v4840_v16 = vpop.f32.mrb[2].mxu1  ;;  %v1510_v26 = vld [vmem:[%s4382_s16 + $0xf70] sm:$0xff]  ;;  %v3265_v34 = vpack.c.bf16 %v1508_v23, %v1500_v22 }
 0x216   : > { %3230 = vmatpush1.bf16.msra.mxu0 %v3229_v39  ;;  %v4844_v52 = vpop.f32.mrb[3].mxu1  ;;  %v1453_v39 = vld [vmem:[%s4382_s16 + $0xda8] sm:$0xff]  ;;  %v3393_v35 = vpack.c.bf16 %v1510_v26, %v1502_v24 }
 0x217   : > { %3358 = vmatpush1.bf16.msra.mxu1 %v3357_v40  ;;  %3232 = vmatprep.subr.bf16.mxu0 %v3231_v41  ;;  %v1461_v40 = vld [vmem:[%s4382_s16 + $0xde8] sm:$0xff]  ;;  %v1455_v41 = vld [vmem:[%s4382_s16 + $0xdb8] sm:$0xff] }
 0x218   : > { %3360 = vmatprep.subr.bf16.mxu1 %v3359_v45  ;;  %v3251_v45 = vpack.c.bf16 %v1461_v40, %v1453_v39  ;;  %v3379_v50 = vpack.c.bf16 %v1463_v42, %v1455_v41  ;;  %v1524_v39 = vld [vmem:[%s4382_s16 + $0xfe0] sm:$0xff]  ;;  %v1518_v41 = vld [vmem:[%s4382_s16 + $0xfb0] sm:$0xff] }
 0x219   : > { %v1526_v42 = vld [vmem:[%s4382_s16 + $0xff0] sm:$0xff] }
 0x21a   : > { %3234 = vmatpush1.bf16.msra.mxu0 %v3233_v53  ;;  %v1469_v53 = vld [vmem:[%s4382_s16 + $0xe28] sm:$0xff] }
 0x21b   : > { %3362 = vmatpush1.bf16.msra.mxu1 %v3361_v54  ;;  %3236 = vmatprep.subr.bf16.mxu0 %v3235_v55  ;;  %v1477_v54 = vld [vmem:[%s4382_s16 + $0xe68] sm:$0xff]  ;;  %v1471_v55 = vld [vmem:[%s4382_s16 + $0xe38] sm:$0xff] }
 0x21c   : > { %3364 = vmatprep.subr.bf16.mxu1 %v3363_v59  ;;  %v3255_v59 = vpack.c.bf16 %v1477_v54, %v1469_v53  ;;  %v3383_v63 = vpack.c.bf16 %v1479_v56, %v1471_v55  ;;  %v684_v48 = vld [vmem:[%s423_s24] ss:$8 sm:$0xf]  ;;  %v4923_v53 = vsub.s32 1, %v4919_v47  ;;  %v4926_v54 = vsub.s32 2, %v4919_v47 }
 0x21d   : > { %v2611_v56 = vld [vmem:[%s423_s24 + $0x2] ss:$8 sm:$0xf]  ;;  %v2609_v60 = vld [vmem:[%s423_s24 + $0x1] ss:$8 sm:$0xf] }
 0x21e   : > { %3238 = vmatpush1.bf16.msra.mxu0 %v3237_v1  ;;  %v1485_v1 = vld [vmem:[%s4382_s16 + $0xea8] sm:$0xff] }
 0x21f   : > { %3366 = vmatpush1.bf16.msra.mxu1 %v3365_v2  ;;  %3240 = vmatprep.subr.bf16.mxu0 %v3239_v3  ;;  %v1493_v2 = vld [vmem:[%s4382_s16 + $0xee8] sm:$0xff]  ;;  %v1487_v3 = vld [vmem:[%s4382_s16 + $0xeb8] sm:$0xff] }
 0x220   : > { %3368 = vmatprep.subr.bf16.mxu1 %v3367_v7  ;;  %v3259_v7 = vpack.c.bf16 %v1493_v2, %v1485_v1  ;;  %v3387_v11 = vpack.c.bf16 %v1495_v4, %v1487_v3  ;;  %v2610_v61 = vld [vmem:[%s423_s24 + $0x1] ss:$8 sm:$0xf0] }
 0x221   : > { %v4940_v4 = vor.u32 %v2610_v61, %v2609_v60 }
 0x222   : > { %3242 = vmatpush1.bf16.msra.mxu0 %v3241_v13  ;;  %v1501_v13 = vld [vmem:[%s4382_s16 + $0xf28] sm:$0xff] }
 0x223   : > { %3370 = vmatpush1.bf16.msra.mxu1 %v3369_v14  ;;  %3244 = vmatprep.subr.bf16.mxu0 %v3243_v17  ;;  %v1509_v14 = vld [vmem:[%s4382_s16 + $0xf68] sm:$0xff]  ;;  %v1503_v17 = vld [vmem:[%s4382_s16 + $0xf38] sm:$0xff] }
 0x224   : > { %3372 = vmatprep.subr.bf16.mxu1 %v3371_v21  ;;  %v3263_v21 = vpack.c.bf16 %v1509_v14, %v1501_v13  ;;  %v3391_v25 = vpack.c.bf16 %v1511_v18, %v1503_v17  ;;  %v1536_v17 = vrot.slane %v4940_v4, %v690_v51 }
 0x226   : > { %3246 = vmatpush1.bf16.msra.mxu0 %v3245_v28  ;;  %v1517_v28 = vld [vmem:[%s4382_s16 + $0xfa8] sm:$0xff] }
 0x227   : > { %3374 = vmatpush1.bf16.msra.mxu1 %v3373_v29  ;;  %3248 = vmatprep.subr.bf16.mxu0 %v3247_v30  ;;  %v1525_v29 = vld [vmem:[%s4382_s16 + $0xfe8] sm:$0xff]  ;;  %v1519_v30 = vld [vmem:[%s4382_s16 + $0xfb8] sm:$0xff] }
 0x228   : > { %3376 = vmatprep.subr.bf16.mxu1 %v3375_v37  ;;  %v3267_v37 = vpack.c.bf16 %v1525_v29, %v1517_v28  ;;  %v3395_v40 = vpack.c.bf16 %v1527_v31, %v1519_v30 }
 0x22a   : > { %3250 = vmatpush1.bf16.msra.mxu0 %v3249_v15  ;;  %v3269_v15 = vpack.c.bf16 %v1524_v39, %v1516_v38 }
 0x22b   : > { %3378 = vmatpush1.bf16.msra.mxu1 %v3377_v43  ;;  %3252 = vmatprep.subr.bf16.mxu0 %v3251_v45  ;;  %v3397_v43 = vpack.c.bf16 %v1526_v42, %v1518_v41  ;;  %v3534_v45 = vld [vmem:[#allocation5 + $0x10] sm:$0xff] }
 0x22c   : > { %3380 = vmatprep.subr.bf16.mxu1 %v3379_v50  ;;  %v685_v50 = vld [vmem:[%s423_s24] ss:$8 sm:$0xf0] }
 0x22d   : > { %v4928_v55 = vor.u32 %v685_v50, %v684_v48 }
 0x22e   : > { %3254 = vmatpush1.bf16.msra.mxu0 %v3253_v57  ;;  %v2612_v57 = vld [vmem:[%s423_s24 + $0x2] ss:$8 sm:$0xf0] }
 0x22f   : > { %3382 = vmatpush1.bf16.msra.mxu1 %v3381_v58  ;;  %3256 = vmatprep.subr.bf16.mxu0 %v3255_v59  ;;  %v2613_v58 = vld [vmem:[%s423_s24 + $0x3] ss:$8 sm:$0xf]  ;;  %v4930_v62 = vor.u32 %v2612_v57, %v2611_v56  ;;  %v691_v0 = vrot.slane %v4928_v55, %v690_v51  ;;  %v695_v2 = vrot.slane %v4928_v55, %v4923_v53 }
 0x230   : > { %3384 = vmatprep.subr.bf16.mxu1 %v3383_v63  ;;  %v2614_v59 = vld [vmem:[%s423_s24 + $0x3] ss:$8 sm:$0xf0]  ;;  %v702_v63 = vsub.s32 3, %v4919_v47  ;;  %v699_v3 = vrot.slane %v4928_v55, %v4926_v54 }
 0x231   : > { %v4934_v1 = vor.u32 %v2614_v59, %v2613_v58  ;;  %v795_v9 = vadd.f32 %v4697_v27, %v691_v0  ;;  %v2157_v12 = vrot.slane %v4930_v62, %v4926_v54  ;;  %v797_v13 = vadd.f32 %v4702_v32, %v695_v2 }
 0x232   : > { %3258 = vmatpush1.bf16.msra.mxu0 %v3257_v5  ;;  %v2615_v5 = vld [vmem:[%s423_s24 + $0x4] ss:$8 sm:$0xf]  ;;  %v703_v8 = vrot.slane %v4928_v55, %v702_v63  ;;  %v866_v14 = vadd.f32 %v4704_v33, %v699_v3  ;;  %v1540_v27 = vrot.slane %v4940_v4, %v4923_v53  ;;  %v2161_v22 = vrot.slane %v4930_v62, %v702_v63 }
 0x233   : > { %3386 = vmatpush1.bf16.msra.mxu1 %v3385_v6  ;;  %3260 = vmatprep.subr.bf16.mxu0 %v3259_v7  ;;  %v2616_v6 = vld [vmem:[%s423_s24 + $0x4] ss:$8 sm:$0xf0]  ;;  %v2149_v7 = vrot.slane %v4930_v62, %v690_v51  ;;  %v2210_v10 = vrot.slane %v4934_v1, %v690_v51  ;;  %v1548_v32 = vrot.slane %v4940_v4, %v702_v63 }
 0x234   : > { %3388 = vmatprep.subr.bf16.mxu1 %v3387_v11  ;;  %v2153_v11 = vrot.slane %v4930_v62, %v4923_v53  ;;  %v4953_v18 = vor.u32 %v2616_v6, %v2615_v5  ;;  %v2218_v24 = vrot.slane %v4934_v1, %v4926_v54  ;;  %v2188_v29 = vmul.f32 %v2157_v12, %v866_v14 }
 0x235   : > { %v2186_v33 = vmul.f32 %v2149_v7, %v795_v9  ;;  %v2247_v23 = vmul.f32 %v2210_v10, %v795_v9  ;;  %v4974_v12 = vsub.s32 4, %v4919_v47 }
 0x236   : > { %3262 = vmatpush1.bf16.msra.mxu0 %v3261_v19  ;;  %v1544_v19 = vrot.slane %v4940_v4, %v4926_v54  ;;  %v2187_v28 = vmul.f32 %v2153_v11, %v797_v13  ;;  %v2271_v31 = vrot.slane %v4953_v18, %v690_v51  ;;  %v2275_v39 = vrot.slane %v4953_v18, %v4923_v53 }
 0x237   : > { %3390 = vmatpush1.bf16.msra.mxu1 %v3389_v20  ;;  %3264 = vmatprep.subr.bf16.mxu0 %v3263_v21  ;;  %v2214_v20 = vrot.slane %v4934_v1, %v4923_v53  ;;  %v868_v21 = vadd.f32 %v4708_v36, %v703_v8  ;;  %v2249_v46 = vmul.f32 %v2218_v24, %v866_v14 }
 0x238   : > { %3392 = vmatprep.subr.bf16.mxu1 %v3391_v25  ;;  %v2222_v25 = vrot.slane %v4934_v1, %v702_v63 }
 0x239   : > { %v2189_v41 = vmul.f32 %v2161_v22, %v868_v21 }
 0x23a   : > { %3266 = vmatpush1.bf16.msra.mxu0 %v3265_v34  ;;  %v2250_v51 = vmul.f32 %v2222_v25, %v868_v21 }
 0x23b   : > { %3394 = vmatpush1.bf16.msra.mxu1 %v3393_v35  ;;  %3268 = vmatprep.subr.bf16.mxu0 %v3267_v37  ;;  %v2279_v37 = vrot.slane %v4953_v18, %v4926_v54 }
 0x23c   : > { %3396 = vmatprep.subr.bf16.mxu1 %v3395_v40 }
 0x23e   : > { %3270 = vmatpush1.bf16.msra.mxu0 %v3269_v15 }
 0x23f   : > { %3398 = vmatpush1.bf16.msra.mxu1 %v3397_v43  ;;  %v2283_v43 = vrot.slane %v4953_v18, %v702_v63 }
 0x241   : > { %1993 = vmatmul.mubr.f32.vlgmr.msra.gmra.mrb[6].mxu0 %v3534_v45 }
 0x242   : > { %2135 = vmatmul.mubr.f32.vlgmr.msra.gmra.mrb[6].mxu1 %v3534_v45  ;;  %v2248_v45 = vmul.f32 %v2214_v20, %v797_v13  ;;  %v4977_v13 = vsub.s32 5, %v4919_v47  ;;  %v707_v20 = vrot.slane %v4928_v55, %v4974_v12 }
 0x244   : > { %v711_v21 = vrot.slane %v4928_v55, %v4977_v13  ;;  %v2169_v25 = vrot.slane %v4930_v62, %v4977_v13 }
 0x246   : > { %v939_v24 = vadd.f32 %v4838_v49, %v711_v21 }
 0x294   : > { %v1710_v26 = vpop.f32.mrb[4].mxu0 }
 0x295   : > { %v3399_v30 = vadd.f32 %v1710_v26, %v1536_v17  ;;  %v1852_v34 = vpop.f32.mrb[4].mxu1  ;;  %v1712_v35 = vpop.f32.mrb[5].mxu0  ;;  %v4980_v17 = vsub.s32 6, %v4919_v47  ;;  %v2230_v26 = vrot.slane %v4934_v1, %v4977_v13 }
 0x296   : > { %v3401_v36 = vadd.f32 %v1852_v34, %v1544_v19  ;;  %v3400_v38 = vadd.f32 %v1712_v35, %v1540_v27  ;;  %v1854_v40 = vpop.f32.mrb[5].mxu1  ;;  %v4983_v27 = vsub.s32 7, %v4919_v47  ;;  %v937_v47 = vadd.f32 %v4833_v44, %v707_v20 }
 0x297   : > { %v2194_v42 = vmul.f32 %v3399_v30, %v2186_v33  ;;  %v3402_v15 = vadd.f32 %v1854_v40, %v1548_v32  ;;  %v2308_v57 = vmul.f32 %v3399_v30, %v2271_v31  ;;  %v715_v22 = vrot.slane %v4928_v55, %v4980_v17 }
 0x298   : > { %v2196_v48 = vmul.f32 %v3401_v36, %v2188_v29  ;;  %v2195_v50 = vmul.f32 %v3400_v38, %v2187_v28  ;;  %v2310_v54 = vmul.f32 %v3401_v36, %v2279_v37  ;;  %v2309_v61 = vmul.f32 %v3400_v38, %v2275_v39 }
 0x299   : > { %v2255_v56 = vadd.f32 %v2247_v23, %v2194_v42  ;;  %v2197_v58 = vmul.f32 %v3402_v15, %v2189_v41  ;;  %v2311_v2 = vmul.f32 %v3402_v15, %v2283_v43  ;;  %v719_v32 = vrot.slane %v4928_v55, %v4983_v27 }
 0x29a   : > { %v2257_v59 = vadd.f32 %v2249_v46, %v2196_v48  ;;  %v2256_v60 = vadd.f32 %v2248_v45, %v2195_v50  ;;  %v2165_v33 = vrot.slane %v4930_v62, %v4974_v12  ;;  %v2226_v23 = vrot.slane %v4934_v1, %v4974_v12 }
 0x29b   : > { %v2316_v0 = vadd.f32 %v2308_v57, %v2255_v56  ;;  %v2258_v53 = vadd.f32 %v2250_v51, %v2197_v58  ;;  %v1008_v28 = vadd.f32 %v4840_v16, %v715_v22  ;;  %v2173_v55 = vrot.slane %v4930_v62, %v4980_v17 }
 0x29c   : > { %v2318_v3 = vadd.f32 %v2310_v54, %v2257_v59  ;;  %v2317_v5 = vadd.f32 %v2309_v61, %v2256_v60  ;;  %v2234_v29 = vrot.slane %v4934_v1, %v4980_v17  ;;  %v1010_v30 = vadd.f32 %v4844_v52, %v719_v32 }
 0x29d   : > { %v2319_v6 = vadd.f32 %v2311_v2, %v2258_v53  ;;  %v2324_v7 = vsub.f32 0.0, %v2316_v0  ;;  %v2177_v49 = vrot.slane %v4930_v62, %v4983_v27  ;;  %v2238_v31 = vrot.slane %v4934_v1, %v4983_v27 }
 0x29e   : > { %v2336_v63 = vsub.f32 0.0, %v2318_v3  ;;  %v2325_v9 = vsub.f32 0.0, %v2317_v5  ;;  %v1552_v34 = vrot.slane %v4940_v4, %v4974_v12  ;;  %v1560_v16 = vrot.slane %v4940_v4, %v4980_v17 }
 0x29f   : > { %v2326_v8 = vmul.f32 1.442695, %v2324_v7  ;;  %v2337_v10 = vsub.f32 0.0, %v2319_v6  ;;  %v1556_v35 = vrot.slane %v4940_v4, %v4977_v13  ;;  %v2190_v36 = vmul.f32 %v2165_v33, %v937_v47 }
 0x2a0   : > { %v2338_v11 = vmul.f32 1.442695, %v2336_v63  ;;  %v2328_v14 = vmul.f32 1.442695, %v2325_v9  ;;  %v2251_v37 = vmul.f32 %v2226_v23, %v937_v47  ;;  %v2191_v38 = vmul.f32 %v2169_v25, %v939_v24 }
 0x2a1   : > { %3499 = vpow2.f32 %v2326_v8  ;;  %v2340_v19 = vmul.f32 1.442695, %v2337_v10  ;;  %v1564_v52 = vrot.slane %v4940_v4, %v4983_v27  ;;  %v2252_v62 = vmul.f32 %v2230_v26, %v939_v24  ;;  %v2362_v24 = vld [vmem:[%s349_s29] sm:$0xff]  ;;  %v2363_v26 = vld [vmem:[%s349_s29 + $0x8] sm:$0xff] }
 0x2a2   : > { %3501 = vpow2.f32 %v2338_v11  ;;  %v2192_v40 = vmul.f32 %v2173_v55, %v1008_v28  ;;  %v2253_v41 = vmul.f32 %v2234_v29, %v1008_v28  ;;  %v2193_v43 = vmul.f32 %v2177_v49, %v1010_v30 }
 0x2a3   : > { %3503 = vpow2.f32 %v2328_v14  ;;  %v2254_v45 = vmul.f32 %v2238_v31, %v1010_v30  ;;  %v2287_v48 = vrot.slane %v4953_v18, %v4974_v12  ;;  %v2295_v4 = vrot.slane %v4953_v18, %v4980_v17 }
 0x2a4   : > { %3505 = vpow2.f32 %v2340_v19  ;;  %v2291_v59 = vrot.slane %v4953_v18, %v4977_v13  ;;  %v2299_v53 = vrot.slane %v4953_v18, %v4983_v27 }
 0x2ab   : > { %v3500_v44 = vpop.eup %3499 }
 0x2ac   : > { %v3502_v39 = vpop.eup %3501  ;;  %v2330_v1 = vadd.f32 1.0, %v3500_v44 }
 0x2ad   : > { %v3504_v15 = vpop.eup %3503  ;;  %v2342_v60 = vadd.f32 1.0, %v3502_v39 }
 0x2ae   : > { %v3506_v56 = vpop.eup %3505  ;;  %3507 = vrcp.f32 %v2330_v1  ;;  %v2331_v2 = vadd.f32 1.0, %v3504_v15 }
 0x2af   : > { %v2343_v6 = vadd.f32 1.0, %v3506_v56  ;;  %3509 = vrcp.f32 %v2342_v60 }
 0x2b0   : > { %3511 = vrcp.f32 %v2331_v2 }
 0x2b1   : > { %3513 = vrcp.f32 %v2343_v6 }
 0x2b8   : > { %v3508_v33 = vpop.eup %3507 }
 0x2b9   : > { %v3510_v47 = vpop.eup %3509  ;;  %v2364_v29 = vmul.f32 %v3508_v33, %v2362_v24 }
 0x2ba   : > { %v3512_v23 = vpop.eup %3511 }
 0x2bb   : > { %v3514_v25 = vpop.eup %3513  ;;  %v2365_v30 = vmul.f32 %v3512_v23, %v2363_v26 }
 0x314   : > { %v1994_v42 = vpop.f32.mrb[6].mxu0 }
 0x315   : > { %v3403_v46 = vadd.f32 %v1994_v42, %v1552_v34  ;;  %v2136_v50 = vpop.f32.mrb[6].mxu1  ;;  %v1996_v51 = vpop.f32.mrb[7].mxu0 }
 0x316   : > { %v3405_v57 = vadd.f32 %v2136_v50, %v1560_v16  ;;  %v3404_v58 = vadd.f32 %v1996_v51, %v1556_v35  ;;  %v2138_v54 = vpop.f32.mrb[7].mxu1 }
 0x317   : > { %v2198_v61 = vmul.f32 %v3403_v46, %v2190_v36  ;;  %v3406_v0 = vadd.f32 %v2138_v54, %v1564_v52  ;;  %v2312_v63 = vmul.f32 %v3403_v46, %v2287_v48 }
 0x318   : > { %v2200_v3 = vmul.f32 %v3405_v57, %v2192_v40  ;;  %v2199_v5 = vmul.f32 %v3404_v58, %v2191_v38  ;;  %v2314_v10 = vmul.f32 %v3405_v57, %v2295_v4  ;;  %v2313_v12 = vmul.f32 %v3404_v58, %v2291_v59 }
 0x319   : > { %v2259_v7 = vadd.f32 %v2251_v37, %v2198_v61  ;;  %v2201_v8 = vmul.f32 %v3406_v0, %v2193_v43  ;;  %v2315_v17 = vmul.f32 %v3406_v0, %v2299_v53 }
 0x31a   : > { %v2261_v9 = vadd.f32 %v2253_v41, %v2200_v3  ;;  %v2260_v11 = vadd.f32 %v2252_v62, %v2199_v5 }
 0x31b   : > { %v2320_v13 = vadd.f32 %v2312_v63, %v2259_v7  ;;  %v2262_v14 = vadd.f32 %v2254_v45, %v2201_v8 }
 0x31c   : > { %v2322_v19 = vadd.f32 %v2314_v10, %v2261_v9  ;;  %v2321_v18 = vadd.f32 %v2313_v12, %v2260_v11 }
 0x31d   : > { %v2348_v27 = vsub.f32 0.0, %v2320_v13  ;;  %v2323_v20 = vadd.f32 %v2315_v17, %v2262_v14 }
 0x31e   : > { %3515 = vtanh.f32 %v2322_v19  ;;  %v2349_v21 = vsub.f32 0.0, %v2321_v18 }
 0x31f   : > { %v2350_v22 = vmul.f32 1.442695, %v2348_v27  ;;  %3517 = vtanh.f32 %v2323_v20 }
 0x320   : > { %v2352_v32 = vmul.f32 1.442695, %v2349_v21 }
 0x321   : > { %3519 = vpow2.f32 %v2350_v22 }
 0x322   : > { %3521 = vpow2.f32 %v2352_v32 }
 0x328   : > { %v3516_v28 = vpop.eup %3515 }
 0x329   : > { %v3518_v55 = vpop.eup %3517  ;;  %v2366_v44 = vmul.f32 %v3516_v28, %v3510_v47 }
 0x32a   : > { %v2367_v49 = vmul.f32 %v3518_v55, %v3514_v25 }
 0x32b   : > { %v3520_v31 = vpop.eup %3519  ;;  %v2368_v34 = vadd.f32 %v2366_v44, %v2364_v29 }
 0x32c   : > { %v3522_v16 = vpop.eup %3521  ;;  %v2354_v35 = vadd.f32 1.0, %v3520_v31  ;;  %v2369_v36 = vadd.f32 %v2367_v49, %v2365_v30 }
 0x32d   : > { %3523 = vtanh.f32 %v2368_v34  ;;  %v2355_v37 = vadd.f32 1.0, %v3522_v16  ;;  %2376 = vst [vmem:[%s417_s0] sm:$0xff] %v2368_v34 }
 0x32e   : > { %3525 = vrcp.f32 %v2354_v35  ;;  %2377 = vst [vmem:[%s417_s0 + $0x8] sm:$0xff] %v2369_v36 }
 0x32f   : > { %3527 = vrcp.f32 %v2355_v37 }
 0x330   : > { %3694 = shalt.err (!%p3691_p5)
}
 0x331   : > { %s3695_s29 = scalar_lea.hbm %s5040_s19, 256  ;;  %s3699_s11 = scalar_lea.hbm %s5123_s7, 512 }
 0x332   : > { %p3696_p11 = scmp.ne.s32.totalorder %s5040_s19, %s3695_s29  ;;  %p3700_p0 = scmp.lt.u32.totalorder %s5040_s19, %s5123_s7 }
 0x333   : > { %p3701_p9 = scmp.lt.u32.totalorder %s3699_s11, %s3695_s29  ;;  %p3703_p13 = scmp.lt.u32.totalorder %s3695_s29, %s5040_s19 }
 0x334   : > { %p3697_p7 = pnand %p3696_p11, %p5178_p1 }
 0x335   : > { %p3702_p2 = por %p3701_p9, %p3700_p0 }
 0x336   : > { %p3698_p8 = pneg %p3697_p7 }
 0x337   : > { %p3704_p3 = por %p3703_p13, %p3702_p2 }
 0x339   : > { %p3705_p4 = pnand %p3704_p3, %p3698_p8 }
 0x33b   : > { %3708 = shalt.err (!%p3705_p4)
}
 0x33c   : > { %3430 = dma.vmem_to_hbm [thread:$0]  (%p5178_p1), %s5042_s23, 256, %s5040_s19, %s2384_s9   ;;  %3529 = vtanh.f32 %v2369_v36  ;;  %v3524_v38 = vpop.eup %3523 }
 0x33d   : > { %v3526_v52 = vpop.eup %3525  ;;  %s410_s2 = scalar_lea.vmem [#allocation10], %s4105_s14  ;;  %s5179_s0 = sld [smem:[#allocation26_spill]] }
 0x33e   : > { %s2398_s3 = sshll.u32 %s410_s2, 4  ;;  %v3528_v39 = vpop.eup %3527  ;;  %v2372_v62 = vmul.f32 %v3526_v52, %v3524_v38  ;;  %s2379_s23 = scalar_lea.sflag [#allocation4], %s4102_s17  ;;  %s5074_s3 = int_to_ptr.vmem [resolvable:$true] %s2398_s3 }
 0x33f   : > { %s3709_s14 = scalar_lea.vmem %s5074_s3, 256  ;;  %s3797_s18 = smov [#allocation10]  }
 0x340   : > { %2374 = vst [vmem:[%s410_s2] sm:$0xff] %v2372_v62  ;;  %p3710_p10 = scmp.ne.s32.totalorder %s5074_s3, %s3709_s14  ;;  %s3713_s19 = sshll.u32 %s3797_s18, 4  ;;  %s3714_s19 = int_to_ptr.vmem [resolvable:$false] %s3713_s19 }
 0x341   : > { %s3715_s28 = scalar_lea.vmem %s3714_s19, 512  ;;  %p3716_p5 = scmp.lt.s32.totalorder %s5074_s3, %s3714_s19 }
 0x342   : > { %p3711_p6 = pnand %p3710_p10, %p5178_p1  ;;  %p3717_p11 = scmp.lt.s32.totalorder %s3715_s28, %s3709_s14 }
 0x343   : > { %s5072_s26 = scalar_lea.hbm %s5179_s0, %s2629_s13 }
 0x344   : > { %p3712_p12 = pneg %p3711_p6  ;;  %p3718_p7 = por %p3717_p11, %p3716_p5 }
 0x346   : > { %v3530_v40 = vpop.eup %3529  ;;  %p3719_p8 = pnand %p3718_p7, %p3712_p12 }
 0x347   : > { %v2373_v41 = vmul.f32 %v3530_v40, %v3528_v39 }
 0x349   : > { %2375 = vst [vmem:[%s410_s2 + $0x8] sm:$0xff] %v2373_v41 }
 0x34a   : > { %3722 = shalt.err (!%p3719_p8)
}
 0x34b   : > { %s3723_s17 = scalar_lea.hbm %s5072_s26, 256  ;;  %s3727_s20 = scalar_lea.hbm %s5179_s0, 512 }
 0x34c   : > { %p3724_p0 = scmp.ne.s32.totalorder %s5072_s26, %s3723_s17  ;;  %p3728_p13 = scmp.lt.u32.totalorder %s5072_s26, %s5179_s0 }
 0x34d   : > { %p3729_p3 = scmp.lt.u32.totalorder %s3727_s20, %s3723_s17  ;;  %p3731_p10 = scmp.lt.u32.totalorder %s3723_s17, %s5072_s26 }
 0x34e   : > { %p3725_p9 = pnand %p3724_p0, %p5178_p1 }
 0x34f   : > { %p3730_p4 = por %p3729_p3, %p3728_p13 }
 0x350   : > { %p3726_p2 = pneg %p3725_p9 }
 0x351   : > { %p3732_p6 = por %p3731_p10, %p3730_p4 }
 0x353   : > { %p3733_p12 = pnand %p3732_p6, %p3726_p2 }
 0x355   : > { %3736 = shalt.err (!%p3733_p12)
}
 0x356   : > { %3429 = dma.vmem_to_hbm [thread:$0]  (%p5178_p1), %s5074_s3, 256, %s5072_s26, %s2379_s23  }
 0x357 PF: > { %s5180_s21 = sld [smem:[#allocation18_spill]]  ;;  %s5181_s29 = sld [smem:[#allocation22_spill]] }
 0x358   : > { %p5183_p11 = scmp.ge.s32.totalorder %s3787_s27, 2 }
 0x35d   : > { %s2424_s10 = sand.u32 1, %s5180_s21   ;;  %p5182_p5 = scmp.ne.s32.totalorder %s5181_s29, 0 }
 0x35e   : > { %s2425_s15 = scalar_lea.sflag [#allocation4], %s2424_s10 }
 0x35f   : > { %p3451_p7 = pnand %p5183_p11, %p5182_p5 }
 0x361   : > { %3766 = dma.done.wait (!%p3451_p7), %s2425_s15, 256  }
 0x362   : > { %3768 = vsyncadd (!%p3451_p7), %s2425_s15, 4294967040  ;;  %s2434_s11 = scalar_lea.sflag [#allocation12], %s2424_s10 }
 0x363   : > { %3770 = dma.done.wait (!%p3451_p7), %s2434_s11, 256  }
 0x364   : > { %3772 = vsyncadd (!%p3451_p7), %s2434_s11, 4294967040  ;;  %s5184_s27 = sld [smem:[#allocation20_spill]]  ;;  %s5185_s12 = sld [smem:[#allocation19_spill]] }
 0x365   : > { %s5186_s26 = sld [smem:[#allocation21_spill]]  ;;  %s5187_s24 = smov %s3779_s25 }
 0x36a   : > { %p23_p1 = scmp.ge.s32.totalorder %s5184_s27, 4   ;;  %s5188_s25 = smov %s5185_s12 }
 0x36c   :  { %25 = sbr.rel (!%p23_p1) target bundleno = 12 (0xc), region = 142 }
 0x373   :  { %2439 = vsyncpa [#allocation3], 1 }
 0x374   :  { %2441 = vsyncpa [#allocation3 + $0x1], 1 }
 0x375   :  { %2442 = vsyncpa [#allocation6], 1 }
 0x376   :  { %2443 = vsyncpa [#allocation4], 1 }
 0x377   :  { %2445 = vsyncpa [#allocation4 + $0x1], 1 }
 0x378   :  { %2446 = vsyncpa [#allocation12], 1 }
 0x379   :  { %2448 = vsyncpa [#allocation12 + $0x1], 1 }

</bundles_post_ra>
